<compile_context>
chip_gen: v6e
topology: v6e:2x2x1
jax: 0.10.0
libtpu: 0.0.40
codegen_flags: <defaults>
</compile_context>

<pallas_src>
import math
import numpy as np
import jax
import jax.numpy as jnp
from jax.experimental import pallas as pl
from jax.experimental.pallas import tpu as pltpu

# ---- configuration consistent with FNO1d(C, H, W, in_len, out_len) ----
B = 2
C, H, W = 4, 4, 4
IN_LEN = 8                   # T
OUT_LEN = 8
WIDTH = C * H * W            # 64  (Fourier-layer channel count)
OC = WIDTH // 16             # 4   (spectral-conv out channels == MLP mid channels)
MODES = IN_LEN // 4          # 2
NUM_LAYERS = 4

NJ = 2 * MODES - 1           # 3   sandwich terms per layer (mode-0 imag part is exactly 0)
BW = B * WIDTH               # 128 lanes: batch*channels
BOC = B * OC                 # 8   lanes: batch*mid-channels

assert MODES < IN_LEN // 2, "exact folding assumes no Nyquist bin and a zero mode-0 sine term"

# Precision note: Mosaic only lowers DEFAULT (bf16, fails 1e-3 gate) or HIGHEST (fp32);
# Precision.HIGH (bf16_3x) is rejected by the Pallas TPU dot lowering, so keep HIGHEST.
_PREC = jax.lax.Precision.HIGHEST


def _dot(a, b):
    return jax.lax.dot(a, b, precision=_PREC, preferred_element_type=jnp.float32)


def _gelu(v):   # exact (erf) GELU, matching F.gelu default
    return 0.5 * v * (1.0 + jax.lax.erf(v * (1.0 / math.sqrt(2.0))))


# ---- static row layout of the single packed (PARAM_ROWS, 128) parameter slab ----
def _layout(sizes):
    offs, off = {}, 0
    for name, n in sizes:
        offs[name] = off
        off += n
    return offs, off


_OFFS, PARAM_ROWS = _layout([
    ("ww",  NUM_LAYERS * BW),        # kron(I_B, ww_l^T)           (128,128) per layer
    ("a",   NUM_LAYERS * NJ * BOC),  # kron(I_B, A_lj)^T           (8,128) per (l,j)
    ("mw2", NUM_LAYERS * BOC),       # kron(I_B, mw2_l^T)          (8,128) per layer
    ("qw1", BOC),                    # kron(I_B, qw1)              (8,128)
    ("qw2", BOC),                    # kron(I_B, qw2^T)            (8,128)
    ("l",   NJ * IN_LEN),            # stacked circulant time matrices (24,8) lane-padded
    ("pw",  OUT_LEN),                # predict_linear weight (8,8) lane-padded
    ("pb",  OUT_LEN),                # predict_linear bias, pre-broadcast to 128 lanes
    ("mb2", NUM_LAYERS),             # bias rows (1,128)
    ("wb",  NUM_LAYERS),
    ("qb2", 1),
    ("mb1", NUM_LAYERS),             # bias rows (1,8) lane-padded
    ("qb1", 1),
])
OFF_WW, OFF_A, OFF_MW2 = _OFFS["ww"], _OFFS["a"], _OFFS["mw2"]
OFF_QW1, OFF_QW2, OFF_L = _OFFS["qw1"], _OFFS["qw2"], _OFFS["l"]
OFF_PW, OFF_PB = _OFFS["pw"], _OFFS["pb"]
OFF_MB2, OFF_WB, OFF_QB2 = _OFFS["mb2"], _OFFS["wb"], _OFFS["qb2"]
OFF_MB1, OFF_QB1 = _OFFS["mb1"], _OFFS["qb1"]
for _n in ("ww", "a", "mw2", "qw1", "qw2", "l", "pw", "pb"):
    assert _OFFS[_n] % 8 == 0        # matmul operand sub-slabs start on sublane tiles


def fno1d_kernel(x_ref, p_ref, o_ref):
    X = x_ref[...]                                            # (T, B*WIDTH) = (8, 128)
    L = p_ref[OFF_L:OFF_L + NJ * IN_LEN, :IN_LEN]             # (NJ*T, T) = (24, 8)

    for l in range(NUM_LAYERS):
        # ---- SpectralConv1dT: rfft -> truncated complex mix -> irfft, folded exactly
        # into (a) one kron-free time-mixing matmul and (b) one batched channel
        # contraction (NJ as batch dim) with the MLP's first 1x1 conv pre-folded in.
        Z = _dot(L, X)                                        # (NJ*T, BW) = (24, 128)
        Z3 = Z.reshape(NJ, IN_LEN, BW)                        # tile-aligned split, free
        A3 = p_ref[OFF_A + l * NJ * BOC:OFF_A + (l + 1) * NJ * BOC, :].reshape(NJ, BOC, BW)
        hpj = jax.lax.dot_general(                            # 'jtc,joc->jto'
            Z3, A3, (((2,), (2,)), ((0,), (0,))),
            precision=_PREC, preferred_element_type=jnp.float32)   # (NJ, T, BOC)
        hp = hpj.sum(axis=0) + p_ref[OFF_MB1 + l:OFF_MB1 + l + 1, :BOC]   # (T, BOC)
        h = _gelu(hp)
        # ---- second 1x1 conv of the MLP ----
        x1 = _dot(h, p_ref[OFF_MW2 + l * BOC:OFF_MW2 + (l + 1) * BOC, :]) \
             + p_ref[OFF_MB2 + l:OFF_MB2 + l + 1, :]                        # (T, BW)
        # ---- w residual branch (1x1 conv) ----
        x2 = _dot(X, p_ref[OFF_WW + l * BW:OFF_WW + (l + 1) * BW, :]) \
             + p_ref[OFF_WB + l:OFF_WB + l + 1, :]                          # (T, BW)
        X = x1 + x2
        if l < NUM_LAYERS - 1:                                # final Fourier layer: no GELU
            X = _gelu(X)

    # ---- q: MLP(width -> width, mid = width // 16) ----
    hq = jax.lax.dot_general(X, p_ref[OFF_QW1:OFF_QW1 + BOC, :],
                             (((1,), (1,)), ((), ())),
                             precision=_PREC, preferred_element_type=jnp.float32)  # (T, BOC)
    hq = _gelu(hq + p_ref[OFF_QB1:OFF_QB1 + 1, :BOC])
    Xq = _dot(hq, p_ref[OFF_QW2:OFF_QW2 + BOC, :]) + p_ref[OFF_QB2:OFF_QB2 + 1, :]  # (T, BW)

    # ---- predict_linear: Linear(in_len, out_len) over the time axis ----
    o_ref[...] = _dot(p_ref[OFF_PW:OFF_PW + OUT_LEN, :IN_LEN], Xq) \
                 + p_ref[OFF_PB:OFF_PB + OUT_LEN, :]                                # (8, 128)


def _cost_estimate():
    per_layer = (2 * (NJ * IN_LEN) * IN_LEN * BW       # time-mixing matmul
                 + 2 * NJ * IN_LEN * BW * BOC          # batched channel contraction
                 + 2 * IN_LEN * BOC * BW               # mw2
                 + 2 * IN_LEN * BW * BW)               # ww residual
    tail = 2 * IN_LEN * BW * BOC + 2 * IN_LEN * BOC * BW + 2 * OUT_LEN * IN_LEN * BW
    flops = NUM_LAYERS * per_layer + tail
    trans = NUM_LAYERS * IN_LEN * BOC + (NUM_LAYERS - 1) * IN_LEN * BW + IN_LEN * BOC
    bytes_accessed = 4 * (IN_LEN * BW + PARAM_ROWS * BW + OUT_LEN * BW)
    return pl.CostEstimate(flops=int(flops), transcendentals=int(trans),
                           bytes_accessed=int(bytes_accessed))


def fno1d_forward(x, params):
    Bx, T, Cx, Hx, Wx = x.shape
    width = Cx * Hx * Wx
    assert (Bx, T, width) == (B, IN_LEN, WIDTH)
    # (B, T, C, H, W) -> (T, B*width): time on sublanes, batch*channels on 128 lanes.
    xp = jnp.transpose(x, (1, 0, 2, 3, 4)).reshape(T, Bx * width).astype(jnp.float32)

    vmem = pl.BlockSpec(memory_space=pltpu.MemorySpace.VMEM)
    out = pl.pallas_call(
        fno1d_kernel,
        out_shape=jax.ShapeDtypeStruct((OUT_LEN, Bx * width), jnp.float32),
        in_specs=[vmem, vmem],
        out_specs=vmem,
        cost_estimate=_cost_estimate(),
    )(xp, params)

    # (OUT_LEN, B*width) -> (B, OUT_LEN, C, H, W)
    return jnp.transpose(out.reshape(OUT_LEN, Bx, Cx, Hx, Wx), (1, 0, 2, 3, 4))


def init_params(key):
    ks = jax.random.split(key, 16)
    scale = 1.0 / (WIDTH * OC)
    wr = scale * jax.random.uniform(ks[0], (NUM_LAYERS, WIDTH, OC, MODES), jnp.float32)
    wi = scale * jax.random.uniform(ks[1], (NUM_LAYERS, WIDTH, OC, MODES), jnp.float32)

    def u(k, shape, fan_in):
        a = 1.0 / math.sqrt(fan_in)
        return jax.random.uniform(k, shape, jnp.float32, -a, a)

    mw1 = u(ks[2], (NUM_LAYERS, OC, OC), OC)
    mb1 = u(ks[3], (NUM_LAYERS, OC, 1), OC)
    mw2 = u(ks[4], (NUM_LAYERS, WIDTH, OC), OC)
    mb2 = u(ks[5], (NUM_LAYERS, WIDTH, 1), OC)
    ww = u(ks[6], (NUM_LAYERS, WIDTH, WIDTH), WIDTH)
    wb = u(ks[7], (NUM_LAYERS, WIDTH, 1), WIDTH)
    qw1 = u(ks[8], (OC, WIDTH), WIDTH)
    qb1 = u(ks[9], (OC, 1), WIDTH)
    qw2 = u(ks[10], (WIDTH, OC), OC)
    qb2 = u(ks[11], (WIDTH, 1), OC)
    pw = u(ks[12], (OUT_LEN, IN_LEN), IN_LEN)
    pb = u(ks[13], (1, OUT_LEN), IN_LEN)

    hdot = lambda a, b: jax.lax.dot(a, b, precision=jax.lax.Precision.HIGHEST,
                                    preferred_element_type=jnp.float32)
    eye_b = jnp.eye(B, dtype=jnp.float32)

    # ---- circulant time-mixing blocks of truncated rfft -> mix -> irfft ----
    #   C_k[t', t] =  cfac_k * cos(2*pi*k*(t'-t)/T)   (pairs with Re spectral weights)
    #   D_k[t', t] = -cfac_k * sin(2*pi*k*(t'-t)/T)   (pairs with Im weights, k > 0)
    # Exact because MODES < T/2 (no Nyquist) and the mode-0 sine block is identically 0.
    t = jnp.arange(IN_LEN, dtype=jnp.float32)
    diff = t[:, None] - t[None, :]
    lblocks = []
    for k in range(MODES):
        cfac = (1.0 if k == 0 else 2.0) / IN_LEN
        ang = 2.0 * jnp.pi * k * diff / IN_LEN
        lblocks.append(cfac * jnp.cos(ang))
        if k > 0:
            lblocks.append(-cfac * jnp.sin(ang))
    assert len(lblocks) == NJ
    lstack = jnp.concatenate(lblocks, axis=0)                       # (NJ*T, T)

    # ---- per-(layer, mode) channel matrices, conv1 folded in, stored transposed
    #      and batch-block-diagonal so the kernel contracts over the 128-lane axis ----
    a_rows = []
    for l in range(NUM_LAYERS):
        blocks = []
        for k in range(MODES):
            for part in ([0] if k == 0 else [0, 1]):                # (cos,Re) then (sin,Im)
                wk = wr[l, :, :, k] if part == 0 else wi[l, :, :, k]   # (WIDTH, OC)
                afold = hdot(wk, mw1[l].T)                              # fold first 1x1 conv
                blocks.append(jnp.kron(eye_b, afold).T)                 # (BOC, BW)
        a_rows.append(jnp.concatenate(blocks, axis=0))               # (NJ*BOC, BW)

    wwbig = jnp.concatenate([jnp.kron(eye_b, ww[l].T) for l in range(NUM_LAYERS)], axis=0)
    mw2big = jnp.concatenate([jnp.kron(eye_b, mw2[l].T) for l in range(NUM_LAYERS)], axis=0)
    qw1big_t = jnp.kron(eye_b, qw1)                                  # (BOC, BW)
    qw2big = jnp.kron(eye_b, qw2.T)                                  # (BOC, BW)
    pb128 = jnp.tile(pb.reshape(OUT_LEN, 1), (1, BW))                # (OUT_LEN, BW)

    mb2rows = jnp.concatenate([jnp.tile(mb2[l].reshape(1, WIDTH), (1, B))
                               for l in range(NUM_LAYERS)], axis=0)  # (L, BW)
    wbrows = jnp.concatenate([jnp.tile(wb[l].reshape(1, WIDTH), (1, B))
                              for l in range(NUM_LAYERS)], axis=0)   # (L, BW)
    qb2row = jnp.tile(qb2.reshape(1, WIDTH), (1, B))                 # (1, BW)
    mb1rows = jnp.concatenate([jnp.tile(mb1[l].reshape(1, OC), (1, B))
                               for l in range(NUM_LAYERS)], axis=0)  # (L, BOC)
    qb1row = jnp.tile(qb1.reshape(1, OC), (1, B))                    # (1, BOC)

    def pad_lanes(a):
        return jnp.pad(a, ((0, 0), (0, BW - a.shape[1])))

    params = jnp.concatenate([
        wwbig,                                   # OFF_WW
        jnp.concatenate(a_rows, axis=0),         # OFF_A
        mw2big,                                  # OFF_MW2
        qw1big_t,                                # OFF_QW1
        qw2big,                                  # OFF_QW2
        pad_lanes(lstack),                       # OFF_L
        pad_lanes(pw),                           # OFF_PW
        pb128,                                   # OFF_PB
        mb2rows,                                 # OFF_MB2
        wbrows,                                  # OFF_WB
        qb2row,                                  # OFF_QB2
        pad_lanes(mb1rows),                      # OFF_MB1
        pad_lanes(qb1row),                       # OFF_QB1
    ], axis=0)
    assert params.shape == (PARAM_ROWS, BW)

    raw = dict(wr=wr, wi=wi, mw1=mw1, mb1=mb1, mw2=mw2, mb2=mb2, ww=ww, wb=wb,
               qw1=qw1, qb1=qb1, qw2=qw2, qb2=qb2, pw=pw, pb=pb)
    return params, raw


def reference_forward(x, raw):
    """Pure-JAX mirror of the PyTorch FNO1d forward (uses jnp.fft like torch.fft)."""
    P = jax.lax.Precision.HIGHEST
    Bx, T, Cx, Hx, Wx = x.shape
    width = Cx * Hx * Wx
    v = jnp.transpose(x, (0, 2, 3, 4, 1)).reshape(Bx, width, T)

    def spectral(v, wr, wi):
        vft = jnp.fft.rfft(v, axis=-1)
        w = (wr + 1j * wi).astype(jnp.complex64)
        out = jnp.einsum('bix,iox->box', vft[:, :, :MODES], w, precision=P)
        full = jnp.zeros((Bx, OC, T // 2 + 1), jnp.complex64)
        full = full.at[:, :, :MODES].set(out)
        return jnp.fft.irfft(full, n=T, axis=-1)

    def conv1x1(v, w, b):
        return jnp.einsum('oi,bit->bot', w, v, precision=P) + b.reshape(1, -1, 1)

    def mlp(v, w1, b1, w2, b2):
        h = jax.nn.gelu(conv1x1(v, w1, b1), approximate=False)
        return conv1x1(h, w2, b2)

    for l in range(NUM_LAYERS):
        x1 = spectral(v, raw['wr'][l], raw['wi'][l])
        x1 = mlp(x1, raw['mw1'][l], raw['mb1'][l], raw['mw2'][l], raw['mb2'][l])
        x2 = conv1x1(v, raw['ww'][l], raw['wb'][l])
        v = x1 + x2
        if l < NUM_LAYERS - 1:
            v = jax.nn.gelu(v, approximate=False)
    v = mlp(v, raw['qw1'], raw['qb1'], raw['qw2'], raw['qb2'])
    v = jnp.einsum('bit,ot->bio', v, raw['pw'], precision=P) + raw['pb'].reshape(1, 1, -1)
    v = v.reshape(Bx, Cx, Hx, Wx, OUT_LEN)
    return jnp.transpose(v, (0, 4, 1, 2, 3))


if __name__ == "__main__":
    key = jax.random.PRNGKey(0)
    kx, kp = jax.random.split(key)
    x = jax.random.normal(kx, (B, IN_LEN, C, H, W), jnp.float32)
    params, raw = init_params(kp)

    out = fno1d_forward(x, params)
    out = jax.block_until_ready(out)
    assert out.shape == (B, OUT_LEN, C, H, W)

    ref = reference_forward(x, raw)
    np.testing.assert_allclose(np.asarray(out), np.asarray(ref), rtol=1e-3, atol=1e-3)

    print("KERNEL_OK")
</pallas_src>

<mosaic_0001>
module attributes {stable_mosaic.version = 11 : i64} {
  func.func @fno1d_kernel(%arg0: memref<8x128xf32, #tpu.memory_space<vmem>>, %arg1: memref<710x128xf32, #tpu.memory_space<vmem>>, %arg2: memref<8x128xf32, #tpu.memory_space<vmem>>) attributes {dimension_semantics = [], scalar_prefetch = 0 : i64, scratch_operands = 0 : i64, tpu.core_type = #tpu.core_type<tc>} {
    %c0 = arith.constant 0 : index
    %c0_0 = arith.constant 0 : index
    %0 = vector.load %arg0[%c0, %c0_0] : memref<8x128xf32, #tpu.memory_space<vmem>>, vector<8x128xf32>
    %c656 = arith.constant 656 : index
    %c0_1 = arith.constant 0 : index
    %1 = vector.load %arg1[%c656, %c0_1] : memref<710x128xf32, #tpu.memory_space<vmem>>, vector<24x8xf32>
    %cst = arith.constant dense<0.000000e+00> : vector<24x128xf32>
    %2 = tpu.matmul %1, %0, %cst {dimension_numbers = #tpu.dot_dimension_numbers<[1], [0], [0], [1], [0, 0, 1, 1], [], []>, precision = #tpu.contract_precision<fp32>} : vector<24x8xf32>, vector<8x128xf32>, vector<24x128xf32> -> vector<24x128xf32>
    %3 = vector.shape_cast %2 : vector<24x128xf32> to vector<3x8x128xf32>
    %c512 = arith.constant 512 : index
    %c0_2 = arith.constant 0 : index
    %4 = vector.load %arg1[%c512, %c0_2] : memref<710x128xf32, #tpu.memory_space<vmem>>, vector<24x128xf32>
    %5 = vector.shape_cast %4 : vector<24x128xf32> to vector<3x8x128xf32>
    %cst_3 = arith.constant dense<0.000000e+00> : vector<3x8x8xf32>
    %6 = tpu.matmul %3, %5, %cst_3 {dimension_numbers = #tpu.dot_dimension_numbers<[2], [2], [1], [1], [0, 0, 0, 1, 1, 1], [0], [0]>, precision = #tpu.contract_precision<fp32>} : vector<3x8x128xf32>, vector<3x8x128xf32>, vector<3x8x8xf32> -> vector<3x8x8xf32>
    %cst_4 = arith.constant dense<0.000000e+00> : vector<8x8xf32>
    %7 = vector.multi_reduction <add>, %6, %cst_4 [0] : vector<3x8x8xf32> to vector<8x8xf32>
    %c705 = arith.constant 705 : index
    %c0_5 = arith.constant 0 : index
    %8 = vector.load %arg1[%c705, %c0_5] : memref<710x128xf32, #tpu.memory_space<vmem>>, vector<1x8xf32>
    %9 = vector.broadcast %8 : vector<1x8xf32> to vector<8x8xf32>
    %10 = arith.addf %7, %9 : vector<8x8xf32>
    %cst_6 = arith.constant 5.000000e-01 : f32
    %11 = vector.broadcast %cst_6 : f32 to vector<8x8xf32>
    %12 = arith.mulf %11, %10 : vector<8x8xf32>
    %cst_7 = arith.constant 0.707106769 : f32
    %13 = vector.broadcast %cst_7 : f32 to vector<8x8xf32>
    %14 = arith.mulf %10, %13 : vector<8x8xf32>
    %15 = math.erf %14 : vector<8x8xf32>
    %cst_8 = arith.constant 1.000000e+00 : f32
    %16 = vector.broadcast %cst_8 : f32 to vector<8x8xf32>
    %17 = arith.addf %16, %15 : vector<8x8xf32>
    %18 = arith.mulf %12, %17 : vector<8x8xf32>
    %c608 = arith.constant 608 : index
    %c0_9 = arith.constant 0 : index
    %19 = vector.load %arg1[%c608, %c0_9] : memref<710x128xf32, #tpu.memory_space<vmem>>, vector<8x128xf32>
    %cst_10 = arith.constant dense<0.000000e+00> : vector<8x128xf32>
    %20 = tpu.matmul %18, %19, %cst_10 {dimension_numbers = #tpu.dot_dimension_numbers<[1], [0], [0], [1], [0, 0, 1, 1], [], []>, precision = #tpu.contract_precision<fp32>} : vector<8x8xf32>, vector<8x128xf32>, vector<8x128xf32> -> vector<8x128xf32>
    %c696 = arith.constant 696 : index
    %c0_11 = arith.constant 0 : index
    %21 = vector.load %arg1[%c696, %c0_11] : memref<710x128xf32, #tpu.memory_space<vmem>>, vector<1x128xf32>
    %22 = vector.broadcast %21 : vector<1x128xf32> to vector<8x128xf32>
    %23 = arith.addf %20, %22 : vector<8x128xf32>
    %c0_12 = arith.constant 0 : index
    %c0_13 = arith.constant 0 : index
    %24 = vector.load %arg1[%c0_12, %c0_13] : memref<710x128xf32, #tpu.memory_space<vmem>>, vector<128x128xf32>
    %cst_14 = arith.constant dense<0.000000e+00> : vector<8x128xf32>
    %25 = tpu.matmul %0, %24, %cst_14 {dimension_numbers = #tpu.dot_dimension_numbers<[1], [0], [0], [1], [0, 0, 1, 1], [], []>, precision = #tpu.contract_precision<fp32>} : vector<8x128xf32>, vector<128x128xf32>, vector<8x128xf32> -> vector<8x128xf32>
    %c700 = arith.constant 700 : index
    %c0_15 = arith.constant 0 : index
    %26 = vector.load %arg1[%c700, %c0_15] : memref<710x128xf32, #tpu.memory_space<vmem>>, vector<1x128xf32>
    %27 = vector.broadcast %26 : vector<1x128xf32> to vector<8x128xf32>
    %28 = arith.addf %25, %27 : vector<8x128xf32>
    %29 = arith.addf %23, %28 : vector<8x128xf32>
    %cst_16 = arith.constant 5.000000e-01 : f32
    %30 = vector.broadcast %cst_16 : f32 to vector<8x128xf32>
    %31 = arith.mulf %30, %29 : vector<8x128xf32>
    %cst_17 = arith.constant 0.707106769 : f32
    %32 = vector.broadcast %cst_17 : f32 to vector<8x128xf32>
    %33 = arith.mulf %29, %32 : vector<8x128xf32>
    %34 = math.erf %33 : vector<8x128xf32>
    %cst_18 = arith.constant 1.000000e+00 : f32
    %35 = vector.broadcast %cst_18 : f32 to vector<8x128xf32>
    %36 = arith.addf %35, %34 : vector<8x128xf32>
    %37 = arith.mulf %31, %36 : vector<8x128xf32>
    %cst_19 = arith.constant dense<0.000000e+00> : vector<24x128xf32>
    %38 = tpu.matmul %1, %37, %cst_19 {dimension_numbers = #tpu.dot_dimension_numbers<[1], [0], [0], [1], [0, 0, 1, 1], [], []>, precision = #tpu.contract_precision<fp32>} : vector<24x8xf32>, vector<8x128xf32>, vector<24x128xf32> -> vector<24x128xf32>
    %39 = vector.shape_cast %38 : vector<24x128xf32> to vector<3x8x128xf32>
    %c536 = arith.constant 536 : index
    %c0_20 = arith.constant 0 : index
    %40 = vector.load %arg1[%c536, %c0_20] : memref<710x128xf32, #tpu.memory_space<vmem>>, vector<24x128xf32>
    %41 = vector.shape_cast %40 : vector<24x128xf32> to vector<3x8x128xf32>
    %cst_21 = arith.constant dense<0.000000e+00> : vector<3x8x8xf32>
    %42 = tpu.matmul %39, %41, %cst_21 {dimension_numbers = #tpu.dot_dimension_numbers<[2], [2], [1], [1], [0, 0, 0, 1, 1, 1], [0], [0]>, precision = #tpu.contract_precision<fp32>} : vector<3x8x128xf32>, vector<3x8x128xf32>, vector<3x8x8xf32> -> vector<3x8x8xf32>
    %cst_22 = arith.constant dense<0.000000e+00> : vector<8x8xf32>
    %43 = vector.multi_reduction <add>, %42, %cst_22 [0] : vector<3x8x8xf32> to vector<8x8xf32>
    %c706 = arith.constant 706 : index
    %c0_23 = arith.constant 0 : index
    %44 = vector.load %arg1[%c706, %c0_23] : memref<710x128xf32, #tpu.memory_space<vmem>>, vector<1x8xf32>
    %45 = vector.broadcast %44 : vector<1x8xf32> to vector<8x8xf32>
    %46 = arith.addf %43, %45 : vector<8x8xf32>
    %cst_24 = arith.constant 5.000000e-01 : f32
    %47 = vector.broadcast %cst_24 : f32 to vector<8x8xf32>
    %48 = arith.mulf %47, %46 : vector<8x8xf32>
    %cst_25 = arith.constant 0.707106769 : f32
    %49 = vector.broadcast %cst_25 : f32 to vector<8x8xf32>
    %50 = arith.mulf %46, %49 : vector<8x8xf32>
    %51 = math.erf %50 : vector<8x8xf32>
    %cst_26 = arith.constant 1.000000e+00 : f32
    %52 = vector.broadcast %cst_26 : f32 to vector<8x8xf32>
    %53 = arith.addf %52, %51 : vector<8x8xf32>
    %54 = arith.mulf %48, %53 : vector<8x8xf32>
    %c616 = arith.constant 616 : index
    %c0_27 = arith.constant 0 : index
    %55 = vector.load %arg1[%c616, %c0_27] : memref<710x128xf32, #tpu.memory_space<vmem>>, vector<8x128xf32>
    %cst_28 = arith.constant dense<0.000000e+00> : vector<8x128xf32>
    %56 = tpu.matmul %54, %55, %cst_28 {dimension_numbers = #tpu.dot_dimension_numbers<[1], [0], [0], [1], [0, 0, 1, 1], [], []>, precision = #tpu.contract_precision<fp32>} : vector<8x8xf32>, vector<8x128xf32>, vector<8x128xf32> -> vector<8x128xf32>
    %c697 = arith.constant 697 : index
    %c0_29 = arith.constant 0 : index
    %57 = vector.load %arg1[%c697, %c0_29] : memref<710x128xf32, #tpu.memory_space<vmem>>, vector<1x128xf32>
    %58 = vector.broadcast %57 : vector<1x128xf32> to vector<8x128xf32>
    %59 = arith.addf %56, %58 : vector<8x128xf32>
    %c128 = arith.constant 128 : index
    %c0_30 = arith.constant 0 : index
    %60 = vector.load %arg1[%c128, %c0_30] : memref<710x128xf32, #tpu.memory_space<vmem>>, vector<128x128xf32>
    %cst_31 = arith.constant dense<0.000000e+00> : vector<8x128xf32>
    %61 = tpu.matmul %37, %60, %cst_31 {dimension_numbers = #tpu.dot_dimension_numbers<[1], [0], [0], [1], [0, 0, 1, 1], [], []>, precision = #tpu.contract_precision<fp32>} : vector<8x128xf32>, vector<128x128xf32>, vector<8x128xf32> -> vector<8x128xf32>
    %c701 = arith.constant 701 : index
    %c0_32 = arith.constant 0 : index
    %62 = vector.load %arg1[%c701, %c0_32] : memref<710x128xf32, #tpu.memory_space<vmem>>, vector<1x128xf32>
    %63 = vector.broadcast %62 : vector<1x128xf32> to vector<8x128xf32>
    %64 = arith.addf %61, %63 : vector<8x128xf32>
    %65 = arith.addf %59, %64 : vector<8x128xf32>
    %cst_33 = arith.constant 5.000000e-01 : f32
    %66 = vector.broadcast %cst_33 : f32 to vector<8x128xf32>
    %67 = arith.mulf %66, %65 : vector<8x128xf32>
    %cst_34 = arith.constant 0.707106769 : f32
    %68 = vector.broadcast %cst_34 : f32 to vector<8x128xf32>
    %69 = arith.mulf %65, %68 : vector<8x128xf32>
    %70 = math.erf %69 : vector<8x128xf32>
    %cst_35 = arith.constant 1.000000e+00 : f32
    %71 = vector.broadcast %cst_35 : f32 to vector<8x128xf32>
    %72 = arith.addf %71, %70 : vector<8x128xf32>
    %73 = arith.mulf %67, %72 : vector<8x128xf32>
    %cst_36 = arith.constant dense<0.000000e+00> : vector<24x128xf32>
    %74 = tpu.matmul %1, %73, %cst_36 {dimension_numbers = #tpu.dot_dimension_numbers<[1], [0], [0], [1], [0, 0, 1, 1], [], []>, precision = #tpu.contract_precision<fp32>} : vector<24x8xf32>, vector<8x128xf32>, vector<24x128xf32> -> vector<24x128xf32>
    %75 = vector.shape_cast %74 : vector<24x128xf32> to vector<3x8x128xf32>
    %c560 = arith.constant 560 : index
    %c0_37 = arith.constant 0 : index
    %76 = vector.load %arg1[%c560, %c0_37] : memref<710x128xf32, #tpu.memory_space<vmem>>, vector<24x128xf32>
    %77 = vector.shape_cast %76 : vector<24x128xf32> to vector<3x8x128xf32>
    %cst_38 = arith.constant dense<0.000000e+00> : vector<3x8x8xf32>
    %78 = tpu.matmul %75, %77, %cst_38 {dimension_numbers = #tpu.dot_dimension_numbers<[2], [2], [1], [1], [0, 0, 0, 1, 1, 1], [0], [0]>, precision = #tpu.contract_precision<fp32>} : vector<3x8x128xf32>, vector<3x8x128xf32>, vector<3x8x8xf32> -> vector<3x8x8xf32>
    %cst_39 = arith.constant dense<0.000000e+00> : vector<8x8xf32>
    %79 = vector.multi_reduction <add>, %78, %cst_39 [0] : vector<3x8x8xf32> to vector<8x8xf32>
    %c707 = arith.constant 707 : index
    %c0_40 = arith.constant 0 : index
    %80 = vector.load %arg1[%c707, %c0_40] : memref<710x128xf32, #tpu.memory_space<vmem>>, vector<1x8xf32>
    %81 = vector.broadcast %80 : vector<1x8xf32> to vector<8x8xf32>
    %82 = arith.addf %79, %81 : vector<8x8xf32>
    %cst_41 = arith.constant 5.000000e-01 : f32
    %83 = vector.broadcast %cst_41 : f32 to vector<8x8xf32>
    %84 = arith.mulf %83, %82 : vector<8x8xf32>
    %cst_42 = arith.constant 0.707106769 : f32
    %85 = vector.broadcast %cst_42 : f32 to vector<8x8xf32>
    %86 = arith.mulf %82, %85 : vector<8x8xf32>
    %87 = math.erf %86 : vector<8x8xf32>
    %cst_43 = arith.constant 1.000000e+00 : f32
    %88 = vector.broadcast %cst_43 : f32 to vector<8x8xf32>
    %89 = arith.addf %88, %87 : vector<8x8xf32>
    %90 = arith.mulf %84, %89 : vector<8x8xf32>
    %c624 = arith.constant 624 : index
    %c0_44 = arith.constant 0 : index
    %91 = vector.load %arg1[%c624, %c0_44] : memref<710x128xf32, #tpu.memory_space<vmem>>, vector<8x128xf32>
    %cst_45 = arith.constant dense<0.000000e+00> : vector<8x128xf32>
    %92 = tpu.matmul %90, %91, %cst_45 {dimension_numbers = #tpu.dot_dimension_numbers<[1], [0], [0], [1], [0, 0, 1, 1], [], []>, precision = #tpu.contract_precision<fp32>} : vector<8x8xf32>, vector<8x128xf32>, vector<8x128xf32> -> vector<8x128xf32>
    %c698 = arith.constant 698 : index
    %c0_46 = arith.constant 0 : index
    %93 = vector.load %arg1[%c698, %c0_46] : memref<710x128xf32, #tpu.memory_space<vmem>>, vector<1x128xf32>
    %94 = vector.broadcast %93 : vector<1x128xf32> to vector<8x128xf32>
    %95 = arith.addf %92, %94 : vector<8x128xf32>
    %c256 = arith.constant 256 : index
    %c0_47 = arith.constant 0 : index
    %96 = vector.load %arg1[%c256, %c0_47] : memref<710x128xf32, #tpu.memory_space<vmem>>, vector<128x128xf32>
    %cst_48 = arith.constant dense<0.000000e+00> : vector<8x128xf32>
    %97 = tpu.matmul %73, %96, %cst_48 {dimension_numbers = #tpu.dot_dimension_numbers<[1], [0], [0], [1], [0, 0, 1, 1], [], []>, precision = #tpu.contract_precision<fp32>} : vector<8x128xf32>, vector<128x128xf32>, vector<8x128xf32> -> vector<8x128xf32>
    %c702 = arith.constant 702 : index
    %c0_49 = arith.constant 0 : index
    %98 = vector.load %arg1[%c702, %c0_49] : memref<710x128xf32, #tpu.memory_space<vmem>>, vector<1x128xf32>
    %99 = vector.broadcast %98 : vector<1x128xf32> to vector<8x128xf32>
    %100 = arith.addf %97, %99 : vector<8x128xf32>
    %101 = arith.addf %95, %100 : vector<8x128xf32>
    %cst_50 = arith.constant 5.000000e-01 : f32
    %102 = vector.broadcast %cst_50 : f32 to vector<8x128xf32>
    %103 = arith.mulf %102, %101 : vector<8x128xf32>
    %cst_51 = arith.constant 0.707106769 : f32
    %104 = vector.broadcast %cst_51 : f32 to vector<8x128xf32>
    %105 = arith.mulf %101, %104 : vector<8x128xf32>
    %106 = math.erf %105 : vector<8x128xf32>
    %cst_52 = arith.constant 1.000000e+00 : f32
    %107 = vector.broadcast %cst_52 : f32 to vector<8x128xf32>
    %108 = arith.addf %107, %106 : vector<8x128xf32>
    %109 = arith.mulf %103, %108 : vector<8x128xf32>
    %cst_53 = arith.constant dense<0.000000e+00> : vector<24x128xf32>
    %110 = tpu.matmul %1, %109, %cst_53 {dimension_numbers = #tpu.dot_dimension_numbers<[1], [0], [0], [1], [0, 0, 1, 1], [], []>, precision = #tpu.contract_precision<fp32>} : vector<24x8xf32>, vector<8x128xf32>, vector<24x128xf32> -> vector<24x128xf32>
    %111 = vector.shape_cast %110 : vector<24x128xf32> to vector<3x8x128xf32>
    %c584 = arith.constant 584 : index
    %c0_54 = arith.constant 0 : index
    %112 = vector.load %arg1[%c584, %c0_54] : memref<710x128xf32, #tpu.memory_space<vmem>>, vector<24x128xf32>
    %113 = vector.shape_cast %112 : vector<24x128xf32> to vector<3x8x128xf32>
    %cst_55 = arith.constant dense<0.000000e+00> : vector<3x8x8xf32>
    %114 = tpu.matmul %111, %113, %cst_55 {dimension_numbers = #tpu.dot_dimension_numbers<[2], [2], [1], [1], [0, 0, 0, 1, 1, 1], [0], [0]>, precision = #tpu.contract_precision<fp32>} : vector<3x8x128xf32>, vector<3x8x128xf32>, vector<3x8x8xf32> -> vector<3x8x8xf32>
    %cst_56 = arith.constant dense<0.000000e+00> : vector<8x8xf32>
    %115 = vector.multi_reduction <add>, %114, %cst_56 [0] : vector<3x8x8xf32> to vector<8x8xf32>
    %c708 = arith.constant 708 : index
    %c0_57 = arith.constant 0 : index
    %116 = vector.load %arg1[%c708, %c0_57] : memref<710x128xf32, #tpu.memory_space<vmem>>, vector<1x8xf32>
    %117 = vector.broadcast %116 : vector<1x8xf32> to vector<8x8xf32>
    %118 = arith.addf %115, %117 : vector<8x8xf32>
    %cst_58 = arith.constant 5.000000e-01 : f32
    %119 = vector.broadcast %cst_58 : f32 to vector<8x8xf32>
    %120 = arith.mulf %119, %118 : vector<8x8xf32>
    %cst_59 = arith.constant 0.707106769 : f32
    %121 = vector.broadcast %cst_59 : f32 to vector<8x8xf32>
    %122 = arith.mulf %118, %121 : vector<8x8xf32>
    %123 = math.erf %122 : vector<8x8xf32>
    %cst_60 = arith.constant 1.000000e+00 : f32
    %124 = vector.broadcast %cst_60 : f32 to vector<8x8xf32>
    %125 = arith.addf %124, %123 : vector<8x8xf32>
    %126 = arith.mulf %120, %125 : vector<8x8xf32>
    %c632 = arith.constant 632 : index
    %c0_61 = arith.constant 0 : index
    %127 = vector.load %arg1[%c632, %c0_61] : memref<710x128xf32, #tpu.memory_space<vmem>>, vector<8x128xf32>
    %cst_62 = arith.constant dense<0.000000e+00> : vector<8x128xf32>
    %128 = tpu.matmul %126, %127, %cst_62 {dimension_numbers = #tpu.dot_dimension_numbers<[1], [0], [0], [1], [0, 0, 1, 1], [], []>, precision = #tpu.contract_precision<fp32>} : vector<8x8xf32>, vector<8x128xf32>, vector<8x128xf32> -> vector<8x128xf32>
    %c699 = arith.constant 699 : index
    %c0_63 = arith.constant 0 : index
    %129 = vector.load %arg1[%c699, %c0_63] : memref<710x128xf32, #tpu.memory_space<vmem>>, vector<1x128xf32>
    %130 = vector.broadcast %129 : vector<1x128xf32> to vector<8x128xf32>
    %131 = arith.addf %128, %130 : vector<8x128xf32>
    %c384 = arith.constant 384 : index
    %c0_64 = arith.constant 0 : index
    %132 = vector.load %arg1[%c384, %c0_64] : memref<710x128xf32, #tpu.memory_space<vmem>>, vector<128x128xf32>
    %cst_65 = arith.constant dense<0.000000e+00> : vector<8x128xf32>
    %133 = tpu.matmul %109, %132, %cst_65 {dimension_numbers = #tpu.dot_dimension_numbers<[1], [0], [0], [1], [0, 0, 1, 1], [], []>, precision = #tpu.contract_precision<fp32>} : vector<8x128xf32>, vector<128x128xf32>, vector<8x128xf32> -> vector<8x128xf32>
    %c703 = arith.constant 703 : index
    %c0_66 = arith.constant 0 : index
    %134 = vector.load %arg1[%c703, %c0_66] : memref<710x128xf32, #tpu.memory_space<vmem>>, vector<1x128xf32>
    %135 = vector.broadcast %134 : vector<1x128xf32> to vector<8x128xf32>
    %136 = arith.addf %133, %135 : vector<8x128xf32>
    %137 = arith.addf %131, %136 : vector<8x128xf32>
    %c640 = arith.constant 640 : index
    %c0_67 = arith.constant 0 : index
    %138 = vector.load %arg1[%c640, %c0_67] : memref<710x128xf32, #tpu.memory_space<vmem>>, vector<8x128xf32>
    %cst_68 = arith.constant dense<0.000000e+00> : vector<8x8xf32>
    %139 = tpu.matmul %137, %138, %cst_68 {dimension_numbers = #tpu.dot_dimension_numbers<[1], [1], [0], [0], [0, 0, 1, 0], [], []>, precision = #tpu.contract_precision<fp32>} : vector<8x128xf32>, vector<8x128xf32>, vector<8x8xf32> -> vector<8x8xf32>
    %c709 = arith.constant 709 : index
    %c0_69 = arith.constant 0 : index
    %140 = vector.load %arg1[%c709, %c0_69] : memref<710x128xf32, #tpu.memory_space<vmem>>, vector<1x8xf32>
    %141 = vector.broadcast %140 : vector<1x8xf32> to vector<8x8xf32>
    %142 = arith.addf %139, %141 : vector<8x8xf32>
    %cst_70 = arith.constant 5.000000e-01 : f32
    %143 = vector.broadcast %cst_70 : f32 to vector<8x8xf32>
    %144 = arith.mulf %143, %142 : vector<8x8xf32>
    %cst_71 = arith.constant 0.707106769 : f32
    %145 = vector.broadcast %cst_71 : f32 to vector<8x8xf32>
    %146 = arith.mulf %142, %145 : vector<8x8xf32>
    %147 = math.erf %146 : vector<8x8xf32>
    %cst_72 = arith.constant 1.000000e+00 : f32
    %148 = vector.broadcast %cst_72 : f32 to vector<8x8xf32>
    %149 = arith.addf %148, %147 : vector<8x8xf32>
    %150 = arith.mulf %144, %149 : vector<8x8xf32>
    %c648 = arith.constant 648 : index
    %c0_73 = arith.constant 0 : index
    %151 = vector.load %arg1[%c648, %c0_73] : memref<710x128xf32, #tpu.memory_space<vmem>>, vector<8x128xf32>
    %cst_74 = arith.constant dense<0.000000e+00> : vector<8x128xf32>
    %152 = tpu.matmul %150, %151, %cst_74 {dimension_numbers = #tpu.dot_dimension_numbers<[1], [0], [0], [1], [0, 0, 1, 1], [], []>, precision = #tpu.contract_precision<fp32>} : vector<8x8xf32>, vector<8x128xf32>, vector<8x128xf32> -> vector<8x128xf32>
    %c704 = arith.constant 704 : index
    %c0_75 = arith.constant 0 : index
    %153 = vector.load %arg1[%c704, %c0_75] : memref<710x128xf32, #tpu.memory_space<vmem>>, vector<1x128xf32>
    %154 = vector.broadcast %153 : vector<1x128xf32> to vector<8x128xf32>
    %155 = arith.addf %152, %154 : vector<8x128xf32>
    %c680 = arith.constant 680 : index
    %c0_76 = arith.constant 0 : index
    %156 = vector.load %arg1[%c680, %c0_76] : memref<710x128xf32, #tpu.memory_space<vmem>>, vector<8x8xf32>
    %cst_77 = arith.constant dense<0.000000e+00> : vector<8x128xf32>
    %157 = tpu.matmul %156, %155, %cst_77 {dimension_numbers = #tpu.dot_dimension_numbers<[1], [0], [0], [1], [0, 0, 1, 1], [], []>, precision = #tpu.contract_precision<fp32>} : vector<8x8xf32>, vector<8x128xf32>, vector<8x128xf32> -> vector<8x128xf32>
    %c688 = arith.constant 688 : index
    %c0_78 = arith.constant 0 : index
    %158 = vector.load %arg1[%c688, %c0_78] : memref<710x128xf32, #tpu.memory_space<vmem>>, vector<8x128xf32>
    %159 = arith.addf %157, %158 : vector<8x128xf32>
    %c0_79 = arith.constant 0 : index
    %c0_80 = arith.constant 0 : index
    %160 = vector.load %arg2[%c0_79, %c0_80] : memref<8x128xf32, #tpu.memory_space<vmem>>, vector<8x128xf32>
    tpu.vector_store %arg2[%c0_79, %c0_80], %159 {strides = array<i32>} : memref<8x128xf32, #tpu.memory_space<vmem>>, vector<8x128xf32>,
    return
  }
}

</mosaic_0001>

<bundles_post_ra>
// kernel: tpu_custom_call.1
= control target key start
LH: loop header
LB: loop body
LE: loop exit
PB: predicated region body
PF: predicated region fallthrough
CT: control target
= control target key end

     0   :  { %7 = vsyncpa [#allocation3], 0  ;;  %s18423_s0 = inlined_call_operand.hbm [shape: f32[8,128], index: 0, kind: input, shape index: {}]   ;;  %s18424_s1 = inlined_call_operand.hbm [shape: f32[710,128], index: 1, kind: input, shape index: {}]   ;;  %s18425_s2 = inlined_call_operand.hbm [shape: f32[8,128], index: 2, kind: output, shape index: {}]  }
   0x1   :  { %8 = vsyncpa [#allocation6], 0 }
   0x2   :  { %9 = vsyncpa [#allocation4], 0  ;;  %s15984_s9 = smov [#allocation2]   ;;  %s15985_s11 = smov [#allocation5]  }
   0x3   :  { %s16_s10 = sshll.u32 %s15984_s9, 4  ;;  %s25_s12 = sshll.u32 %s15985_s11, 4  ;;  %s17_s10 = int_to_ptr.vmem [resolvable:$true] %s16_s10  ;;  %s26_s12 = int_to_ptr.vmem [resolvable:$true] %s25_s12 }
   0x4   :  { %s15926_s13 = scalar_lea.vmem %s17_s10, 128  ;;  %p15931_p1 = scmp.lt.s32.totalorder %s17_s10, %s17_s10 }
   0x5   :  { %p15927_p0 = scmp.ne.s32.totalorder %s17_s10, %s15926_s13  ;;  %p15932_p2 = scmp.lt.s32.totalorder %s15926_s13, %s15926_s13 }
   0x7   :  { %p15933_p3 = por %p15932_p2, %p15931_p1 }
   0x9   :  { %p15934_p4 = pnand %p15933_p3, %p15927_p0 }
   0xb   :  { %15937 = shalt.err (!%p15934_p4)
}
   0xc   :  { %19 = dma.hbm_to_vmem [thread:$0]  %s18423_s0, 128, %s17_s10, [#allocation3]  }
   0xd   :  { %s15946_s16 = scalar_lea.vmem %s26_s12, 11392  ;;  %p15951_p6 = scmp.lt.s32.totalorder %s26_s12, %s26_s12 }
   0xe   :  { %p15947_p5 = scmp.ne.s32.totalorder %s26_s12, %s15946_s16  ;;  %p15952_p7 = scmp.lt.s32.totalorder %s15946_s16, %s15946_s16 }
  0x10   :  { %p15953_p8 = por %p15952_p7, %p15951_p6 }
  0x12   :  { %p15954_p9 = pnand %p15953_p8, %p15947_p5 }
  0x14   :  { %15957 = shalt.err (!%p15954_p9)
}
  0x15   :  { %s15986_s17 = smov 128   ;;  %s15987_s18 = smov 8  }
  0x16   :  { %31 = dma.hbm_to_vmem [thread:$0]  %s18424_s1, 11392, %s26_s12, [#allocation6], %s15986_s17, %s15986_s17, %s15987_s18  }
  0x17   :  { %15978 = dma.done.wait [#allocation3], 128  }
  0x18   :  { %15979 = vsyncadd [#allocation3], 4294967168 }
  0x19   :  { %15980 = dma.done.wait [#allocation6], 11392  }
  0x1a   :  { %15981 = vsyncadd [#allocation6], 4294955904  ;;  %v15988_v0 = vmov 0.0   ;;  %vm15989_vm0 = vmmov 0   ;;  %vm42_vm1 = vcmask 64512   ;;  %v38_v1 = vld [vmem:[#allocation2] sm:$0xff] }
  0x1b   :  { %14221 = vmatprep.subr.mxu0 %v15988_v0  ;;  %14232 = vmatprep.subr.mxu1 %v15988_v0  ;;  %v39_v2 = vld [vmem:[#allocation5 + $0x290] sm:$0xff]  ;;  %v40_v3 = vld [vmem:[#allocation5 + $0x298] sm:$0xff]  ;;  %v16018_v4 = vand.u32 4294901760, %v38_v1  ;;  %v41_v7 = vld [vmem:[#allocation5 + $0x2a0] sm:$0xff]  ;;  %s15990_s0 = smov [#allocation7]  }
  0x1c   :  { %14223 = vmatprep.mubr.msk.f32.mxu0 %vm15989_vm0, %v15988_v0  ;;  %14234 = vmatprep.mubr.msk.f32.mxu1 %vm15989_vm0, %v15988_v0  ;;  %v44_v5 = vsel %vm42_vm1, %v39_v2, 0  ;;  %v47_v6 = vsel %vm42_vm1, %v40_v3, 0  ;;  %v50_v10 = vsel %vm42_vm1, %v41_v7, 0  ;;  %v584_v28 = vld [vmem:[#allocation5 + $0x200] sm:$0xff]  ;;  %v585_v53 = vld [vmem:[#allocation5 + $0x208] sm:$0xff]  ;;  %s13465_s1 = sshll.u32 %s15990_s0, 4  ;;  %s13466_s1 = int_to_ptr.vmem [resolvable:$true] %s13465_s1 }
  0x1d   :  { %v16022_v8 = vand.u32 4294901760, %v44_v5  ;;  %v16024_v9 = vand.u32 4294901760, %v47_v6  ;;  %14222 = vmatpush3.msra.mxu0 %v16018_v4  ;;  %v16029_v11 = vsub.f32 %v38_v1, %v16018_v4  ;;  %v16031_v12 = vand.u32 4294901760, %v50_v10  ;;  %s15958_s21 = scalar_lea.vmem %s13466_s1, 128  ;;  %p15963_p11 = scmp.lt.s32.totalorder %s13466_s1, %s13466_s1 }
  0x1e   :  { %14243 = vmatprep.subr.mxu0 %v15988_v0  ;;  %v16135_v29 = vand.u32 4294901760, %v584_v28  ;;  %v16147_v59 = vand.u32 4294901760, %v585_v53  ;;  %p15959_p10 = scmp.ne.s32.totalorder %s13466_s1, %s15958_s21  ;;  %p15964_p12 = scmp.lt.s32.totalorder %s15958_s21, %s15958_s21 }
  0x1f   :  { %v16034_v13 = vsub.f32 %v44_v5, %v16022_v8  ;;  %v16038_v14 = vsub.f32 %v47_v6, %v16024_v9  ;;  %v16041_v15 = vand.u32 4294901760, %v16029_v11  ;;  %v16044_v16 = vsub.f32 %v50_v10, %v16031_v12 }
  0x20   :  { %v16138_v30 = vsub.f32 %v584_v28, %v16135_v29  ;;  %v16150_v5 = vsub.f32 %v585_v53, %v16147_v59  ;;  %p15965_p13 = por %p15964_p12, %p15963_p11 }
  0x21   :  { %v16047_v17 = vand.u32 4294901760, %v16034_v13  ;;  %v16050_v18 = vand.u32 4294901760, %v16038_v14  ;;  %v182_v19 = vsub.f32 %v16029_v11, %v16041_v15  ;;  %v16059_v22 = vand.u32 4294901760, %v16044_v16 }
  0x22   :  { %v696_v31 = vand.u32 4294901760, %v16138_v30  ;;  %v1142_v28 = vand.u32 4294901760, %v16150_v5  ;;  %p15966_p0 = pnand %p15965_p13, %p15959_p10 }
  0x23   :  { %v121_v20 = vsub.f32 %v16034_v13, %v16047_v17  ;;  %v131_v21 = vsub.f32 %v16038_v14, %v16050_v18  ;;  %v16061_v23 = vand.u32 4294901760, %v182_v19  ;;  %v141_v26 = vsub.f32 %v16044_v16, %v16059_v22 }
  0x24   :  { %v697_v32 = vsub.f32 %v16138_v30, %v696_v31 }
  0x25   :  { %v16063_v24 = vand.u32 4294901760, %v121_v20  ;;  %14233 = vmatpush3.msra.mxu1 %v16061_v23  ;;  %v16068_v25 = vand.u32 4294901760, %v131_v21  ;;  %v16082_v27 = vand.u32 4294901760, %v141_v26 }
  0x26   :  { %14235 = vmatmul.mubr.f32.vlgmr.msra.gmra.mxu1 %v16022_v8  ;;  %14254 = vmatprep.subr.mxu1 %v15988_v0  ;;  %v698_v33 = vand.u32 4294901760, %v697_v32 }
  0x27   :  { %14224 = vmatmul.mubr.f32.vlgmr.msra.gmra.mxu0 %v16063_v24  ;;  %14237 = vmatprep.mubr.msk.f32.mxu1 %vm15989_vm0, %v15988_v0 }
  0x28   :  { %14226 = vmatprep.mubr.msk.f32.mxu0 %vm15989_vm0, %v15988_v0  ;;  %14244 = vmatpush3.msra.mxu0 %v16029_v11 }
  0x29   :  { %14255 = vmatpush3.msra.mxu1 %v16018_v4  ;;  %14265 = vmatprep.subr.mxu0 %v15988_v0 }
  0x2a   :  { %14238 = vmatmul.mubr.f32.gmra.mxu1 %v16024_v9  ;;  %14276 = vmatprep.subr.mxu1 %v15988_v0 }
  0x2b   :  { %14227 = vmatmul.mubr.f32.gmra.mxu0 %v16068_v25  ;;  %14240 = vmatprep.mubr.msk.f32.mxu1 %vm15989_vm0, %v15988_v0 }
  0x2c   :  { %14229 = vmatprep.mubr.msk.f32.mxu0 %vm15989_vm0, %v15988_v0 }
  0x2e   :  { %14241 = vmatmul.mubr.f32.gmra.mxu1 %v16031_v12 }
  0x2f   :  { %14230 = vmatmul.mubr.f32.gmra.mxu0 %v16082_v27  ;;  %14256 = vmatprep.mubr.msk.f32.mxu1 %vm15989_vm0, %v15988_v0 }
  0x30   :  { %14245 = vmatprep.mubr.msk.f32.mxu0 %vm15989_vm0, %v15988_v0 }
  0x32   :  { %14257 = vmatmul.mubr.f32.vlgmr.msra.gmra.mxu1 %v16047_v17 }
  0x33   :  { %14246 = vmatmul.mubr.f32.vlgmr.msra.gmra.mxu0 %v16034_v13  ;;  %14259 = vmatprep.mubr.msk.f32.mxu1 %vm15989_vm0, %v15988_v0 }
  0x34   :  { %14248 = vmatprep.mubr.msk.f32.mxu0 %vm15989_vm0, %v15988_v0  ;;  %14266 = vmatpush3.msra.mxu0 %v16041_v15 }
  0x35   :  { %14277 = vmatpush3.msra.mxu1 %v16018_v4  ;;  %14287 = vmatprep.subr.mxu0 %v15988_v0 }
  0x36   :  { %14292 = vmatprep.subr.mxu1 %v15988_v0  ;;  %14260 = vmatmul.mubr.f32.gmra.mxu1 %v16050_v18 }
  0x37   :  { %14249 = vmatmul.mubr.f32.gmra.mxu0 %v16038_v14  ;;  %14262 = vmatprep.mubr.msk.f32.mxu1 %vm15989_vm0, %v15988_v0 }
  0x38   :  { %14251 = vmatprep.mubr.msk.f32.mxu0 %vm15989_vm0, %v15988_v0 }
  0x3a   :  { %14263 = vmatmul.mubr.f32.gmra.mxu1 %v16059_v22 }
  0x3b   :  { %14252 = vmatmul.mubr.f32.gmra.mxu0 %v16044_v16  ;;  %14278 = vmatprep.mubr.msk.f32.mxu1 %vm15989_vm0, %v15988_v0 }
  0x3c   :  { %14267 = vmatprep.mubr.msk.f32.mxu0 %vm15989_vm0, %v15988_v0 }
  0x3e   :  { %14279 = vmatmul.mubr.f32.vlgmr.msra.gmra.mxu1 %v16022_v8 }
  0x3f   :  { %14268 = vmatmul.mubr.f32.vlgmr.msra.gmra.mxu0 %v16022_v8  ;;  %14281 = vmatprep.mubr.msk.f32.mxu1 %vm15989_vm0, %v15988_v0 }
  0x40   :  { %14270 = vmatprep.mubr.msk.f32.mxu0 %vm15989_vm0, %v15988_v0  ;;  %14288 = vmatpush3.xpose.msra.mxu0 %v16135_v29 }
  0x41   :  { %14297 = vmatprep.subr.mxu0 %v15988_v0  ;;  %14293 = vmatpush3.xpose.msra.mxu1 %v698_v33 }
  0x42   :  { %14282 = vmatmul.mubr.f32.gmra.mxu1 %v16024_v9  ;;  %14302 = vmatprep.subr.mxu1 %v15988_v0 }
  0x43   :  { %14271 = vmatmul.mubr.f32.gmra.mxu0 %v16024_v9  ;;  %14284 = vmatprep.mubr.msk.f32.mxu1 %vm15989_vm0, %v15988_v0 }
  0x44   :  { %14273 = vmatprep.mubr.msk.f32.mxu0 %vm15989_vm0, %v15988_v0 }
  0x46   :  { %14285 = vmatmul.mubr.f32.gmra.mxu1 %v16031_v12 }
  0x47   :  { %14274 = vmatmul.mubr.f32.gmra.mxu0 %v16031_v12  ;;  %14294 = vmatprep.mubr.msk.f32.mxu1 %vm15989_vm0, %v15988_v0 }
  0x48   :  { %14289 = vmatprep.mubr.msk.f32.mxu0 %vm15989_vm0, %v15988_v0 }
  0xe6   :  { %v220_v35 = vpop.f32.mrf.mxu1 }
  0xe7   :  { %v124_v34 = vpop.f32.mrf.mxu0 }
  0xe8   :  { %v14236_v37 = vpop.f32.mrf.mxu1  ;;  %v221_v52 = vadd.f32 %v220_v35, %v124_v34  ;;  %v586_v35 = vld [vmem:[#allocation5 + $0x210] sm:$0xff] }
  0xe9   :  { %v14225_v36 = vpop.f32.mrf.mxu0 }
  0xea   :  { %v226_v39 = vpop.f32.mrf.mxu1 }
  0xeb   :  { %v134_v38 = vpop.f32.mrf.mxu0 }
  0xec   :  { %v14239_v41 = vpop.f32.mrf.mxu1  ;;  %v227_v60 = vadd.f32 %v226_v39, %v134_v38 }
  0xed   :  { %v14228_v40 = vpop.f32.mrf.mxu0 }
  0xee   :  { %v232_v43 = vpop.f32.mrf.mxu1 }
  0xef   :  { %v144_v42 = vpop.f32.mrf.mxu0 }
  0xf0   :  { %v14242_v45 = vpop.f32.mrf.mxu1  ;;  %v233_v32 = vadd.f32 %v232_v43, %v144_v42  ;;  %v1143_v42 = vsub.f32 %v16150_v5, %v1142_v28  ;;  %v16159_v43 = vand.u32 4294901760, %v586_v35 }
  0xf1   :  { %v14231_v44 = vpop.f32.mrf.mxu0 }
  0xf2   :  { %v394_v47 = vpop.f32.mrf.mxu1 }
  0xf3   :  { %v306_v46 = vpop.f32.mrf.mxu0 }
  0xf4   :  { %v14258_v49 = vpop.f32.mrf.mxu1  ;;  %v307_v56 = vadd.f32 %v306_v46, %v221_v52  ;;  %v16168_v52 = vsub.f32 %v586_v35, %v16159_v43 }
  0xf5   :  { %v14247_v48 = vpop.f32.mrf.mxu0 }
  0xf6   :  { %v402_v51 = vpop.f32.mrf.mxu1  ;;  %v395_v63 = vadd.f32 %v394_v47, %v307_v56 }
  0xf7   :  { %v313_v50 = vpop.f32.mrf.mxu0 }
  0xf8   :  { %v14261_v55 = vpop.f32.mrf.mxu1  ;;  %v314_v1 = vadd.f32 %v313_v50, %v227_v60 }
  0xf9   :  { %v14250_v54 = vpop.f32.mrf.mxu0 }
  0xfa   :  { %v410_v58 = vpop.f32.mrf.mxu1  ;;  %v403_v19 = vadd.f32 %v402_v51, %v314_v1  ;;  %v1144_v51 = vand.u32 4294901760, %v1143_v42 }
  0xfb   :  { %v320_v57 = vpop.f32.mrf.mxu0 }
  0xfc   :  { %v14264_v62 = vpop.f32.mrf.mxu1  ;;  %v321_v38 = vadd.f32 %v320_v57, %v233_v32 }
  0xfd   :  { %v14253_v61 = vpop.f32.mrf.mxu0 }
  0xfe   :  { %v568_v3 = vpop.f32.mrf.mxu1  ;;  %v411_v49 = vadd.f32 %v410_v58, %v321_v38 }
  0xff   :  { %v484_v2 = vpop.f32.mrf.mxu0 }
 0x100   :  { %v485_v6 = vadd.f32 %v484_v2, %v395_v63  ;;  %v14280_v10 = vpop.f32.mrf.mxu1  ;;  %v1941_v2 = vld [vmem:[#allocation5 + $0x260] sm:$0xff] }
 0x101   :  { %v14269_v7 = vpop.f32.mrf.mxu0 }
 0x102   :  { %v569_v20 = vadd.f32 %v568_v3, %v485_v6  ;;  %v574_v26 = vpop.f32.mrf.mxu1  ;;  %v16236_v3 = vand.u32 4294901760, %v1941_v2 }
 0x103   :  { %v490_v21 = vpop.f32.mrf.mxu0 }
 0x104   :  { %v653_v33 = vand.u32 4294901760, %v569_v20  ;;  %v491_v34 = vadd.f32 %v490_v21, %v403_v19  ;;  %v14283_v37 = vpop.f32.mrf.mxu1 }
 0x105   :  { %v14272_v36 = vpop.f32.mrf.mxu0 }
 0x106   :  { %v654_v39 = vsub.f32 %v569_v20, %v653_v33  ;;  %v575_v40 = vadd.f32 %v574_v26, %v491_v34  ;;  %14295 = vmatmul.mubr.f32.vlgmr.msra.gmra.mxu1 %v653_v33  ;;  %v580_v44 = vpop.f32.mrf.mxu1 }
 0x107   :  { %v496_v41 = vpop.f32.mrf.mxu0  ;;  %14303 = vmatpush3.xpose.msra.mxu1 %v16135_v29  ;;  %14304 = vmatprep.mubr.msk.f32.mxu1 %vm15989_vm0, %v15988_v0 }
 0x108   :  { %v655_v45 = vand.u32 4294901760, %v654_v39  ;;  %v16161_v46 = vand.u32 4294901760, %v575_v40  ;;  %14312 = vmatprep.subr.mxu1 %v15988_v0  ;;  %v14286_v48 = vpop.f32.mrf.mxu1  ;;  %v497_v55 = vadd.f32 %v496_v41, %v411_v49 }
 0x109   :  { %v14275_v47 = vpop.f32.mrf.mxu0 }
 0x10a   :  { %v656_v50 = vsub.f32 %v654_v39, %v655_v45  ;;  %14305 = vmatmul.mubr.f32.vlgmr.msra.gmra.mxu1 %v655_v45  ;;  %v1100_v54 = vsub.f32 %v575_v40, %v16161_v46  ;;  %v581_v57 = vadd.f32 %v580_v44, %v497_v55 }
 0x10b   :  { %14313 = vmatpush3.xpose.msra.mxu1 %v16135_v29  ;;  %14314 = vmatprep.mubr.msk.f32.mxu1 %vm15989_vm0, %v15988_v0  ;;  %v1588_v29 = vand.u32 4294901760, %v16168_v52 }
 0x10c   :  { %v657_v53 = vand.u32 4294901760, %v656_v50  ;;  %14322 = vmatprep.subr.mxu1 %v15988_v0  ;;  %v1101_v56 = vand.u32 4294901760, %v1100_v54  ;;  %v1545_v61 = vand.u32 4294901760, %v581_v57 }
 0x10d   :  { %v1589_v58 = vsub.f32 %v16168_v52, %v1588_v29 }
 0x10e   :  { %14290 = vmatmul.mubr.f32.vlgmr.msra.gmra.mxu0 %v657_v53  ;;  %14315 = vmatmul.mubr.f32.vlgmr.msra.gmra.mxu1 %v653_v33  ;;  %v1102_v60 = vsub.f32 %v1100_v54, %v1101_v56 }
 0x10f   :  { %14298 = vmatpush3.xpose.msra.mxu0 %v16138_v30  ;;  %14323 = vmatpush3.xpose.msra.mxu1 %v1144_v51  ;;  %v1590_v30 = vand.u32 4294901760, %v1589_v58 }
 0x110   :  { %14299 = vmatprep.mubr.msk.f32.mxu0 %vm15989_vm0, %v15988_v0  ;;  %14324 = vmatprep.mubr.msk.f32.mxu1 %vm15989_vm0, %v15988_v0  ;;  %v1103_v62 = vand.u32 4294901760, %v1102_v60 }
 0x111   :  { %14307 = vmatprep.subr.mxu0 %v15988_v0  ;;  %14332 = vmatprep.subr.mxu1 %v15988_v0 }
 0x112   :  { %14300 = vmatmul.mubr.f32.vlgmr.msra.gmra.mxu0 %v654_v39  ;;  %14325 = vmatmul.mubr.f32.vlgmr.msra.gmra.mxu1 %v16161_v46 }
 0x113   :  { %14308 = vmatpush3.xpose.msra.mxu0 %v696_v31  ;;  %14333 = vmatpush3.xpose.msra.mxu1 %v16147_v59  ;;  %v1546_v31 = vsub.f32 %v581_v57, %v1545_v61 }
 0x114   :  { %14309 = vmatprep.mubr.msk.f32.mxu0 %vm15989_vm0, %v15988_v0  ;;  %14334 = vmatprep.mubr.msk.f32.mxu1 %vm15989_vm0, %v15988_v0 }
 0x115   :  { %14317 = vmatprep.subr.mxu0 %v15988_v0  ;;  %14342 = vmatprep.subr.mxu1 %v15988_v0 }
 0x116   :  { %14310 = vmatmul.mubr.f32.vlgmr.msra.gmra.mxu0 %v653_v33  ;;  %14335 = vmatmul.mubr.f32.vlgmr.msra.gmra.mxu1 %v1101_v56 }
 0x117   :  { %14318 = vmatpush3.xpose.msra.mxu0 %v16147_v59  ;;  %14343 = vmatpush3.xpose.msra.mxu1 %v16147_v59  ;;  %v1547_v59 = vand.u32 4294901760, %v1546_v31 }
 0x118   :  { %14319 = vmatprep.mubr.msk.f32.mxu0 %vm15989_vm0, %v15988_v0  ;;  %14344 = vmatprep.mubr.msk.f32.mxu1 %vm15989_vm0, %v15988_v0 }
 0x119   :  { %14327 = vmatprep.subr.mxu0 %v15988_v0  ;;  %14352 = vmatprep.subr.mxu1 %v15988_v0  ;;  %v1548_v63 = vsub.f32 %v1546_v31, %v1547_v59 }
 0x11a   :  { %14320 = vmatmul.mubr.f32.vlgmr.msra.gmra.mxu0 %v1103_v62  ;;  %14345 = vmatmul.mubr.f32.vlgmr.msra.gmra.mxu1 %v16161_v46 }
 0x11b   :  { %14328 = vmatpush3.xpose.msra.mxu0 %v16150_v5  ;;  %14353 = vmatpush3.xpose.msra.mxu1 %v1590_v30  ;;  %v1549_v1 = vand.u32 4294901760, %v1548_v63  ;;  %v16239_v5 = vsub.f32 %v1941_v2, %v16236_v3 }
 0x11c   :  { %14329 = vmatprep.mubr.msk.f32.mxu0 %vm15989_vm0, %v15988_v0  ;;  %14354 = vmatprep.mubr.msk.f32.mxu1 %vm15989_vm0, %v15988_v0 }
 0x11d   :  { %14337 = vmatprep.subr.mxu0 %v15988_v0  ;;  %14362 = vmatprep.subr.mxu1 %v15988_v0  ;;  %v2059_v6 = vand.u32 4294901760, %v16239_v5 }
 0x11e   :  { %14330 = vmatmul.mubr.f32.vlgmr.msra.gmra.mxu0 %v1100_v54  ;;  %14355 = vmatmul.mubr.f32.vlgmr.msra.gmra.mxu1 %v1545_v61 }
 0x11f   :  { %14338 = vmatpush3.xpose.msra.mxu0 %v1142_v28  ;;  %14363 = vmatpush3.xpose.msra.mxu1 %v16159_v43  ;;  %v2060_v7 = vsub.f32 %v16239_v5, %v2059_v6 }
 0x120   :  { %14339 = vmatprep.mubr.msk.f32.mxu0 %vm15989_vm0, %v15988_v0  ;;  %14364 = vmatprep.mubr.msk.f32.mxu1 %vm15989_vm0, %v15988_v0 }
 0x121   :  { %14347 = vmatprep.subr.mxu0 %v15988_v0  ;;  %14372 = vmatprep.subr.mxu1 %v15988_v0  ;;  %v2061_v10 = vand.u32 4294901760, %v2060_v7 }
 0x122   :  { %14340 = vmatmul.mubr.f32.vlgmr.msra.gmra.mxu0 %v16161_v46  ;;  %14365 = vmatmul.mubr.f32.vlgmr.msra.gmra.mxu1 %v1547_v59 }
 0x123   :  { %14348 = vmatpush3.xpose.msra.mxu0 %v16159_v43  ;;  %14373 = vmatpush3.xpose.msra.mxu1 %v16159_v43 }
 0x124   :  { %14349 = vmatprep.mubr.msk.f32.mxu0 %vm15989_vm0, %v15988_v0  ;;  %14374 = vmatprep.mubr.msk.f32.mxu1 %vm15989_vm0, %v15988_v0 }
 0x125   :  { %14357 = vmatprep.subr.mxu0 %v15988_v0  ;;  %14382 = vmatprep.subr.mxu1 %v15988_v0 }
 0x126   :  { %14350 = vmatmul.mubr.f32.vlgmr.msra.gmra.mxu0 %v1549_v1  ;;  %14375 = vmatmul.mubr.f32.vlgmr.msra.gmra.mxu1 %v1545_v61 }
 0x127   :  { %14358 = vmatpush3.xpose.msra.mxu0 %v16168_v52  ;;  %14359 = vmatprep.mubr.msk.f32.mxu0 %vm15989_vm0, %v15988_v0 }
 0x128   :  { %14367 = vmatprep.subr.mxu0 %v15988_v0  ;;  %14384 = vmatprep.mubr.msk.f32.mxu1 %vm15989_vm0, %v15988_v0 }
 0x129   :  { %14383 = vmatpush3.msra.mxu1 %v2061_v10 }
 0x12a   :  { %14360 = vmatmul.mubr.f32.vlgmr.msra.gmra.mxu0 %v1546_v31  ;;  %14392 = vmatprep.subr.mxu1 %v15988_v0 }
 0x12b   :  { %14368 = vmatpush3.xpose.msra.mxu0 %v1588_v29  ;;  %14369 = vmatprep.mubr.msk.f32.mxu0 %vm15989_vm0, %v15988_v0 }
 0x12c   :  { %14377 = vmatprep.subr.mxu0 %v15988_v0 }
 0x12e   :  { %14370 = vmatmul.mubr.f32.vlgmr.msra.gmra.mxu0 %v1545_v61 }
 0x12f   :  { %14379 = vmatprep.mubr.msk.f32.mxu0 %vm15989_vm0, %v15988_v0  ;;  %14378 = vmatpush3.msra.mxu0 %v16236_v3 }
 0x130   :  { %14387 = vmatprep.subr.mxu0 %v15988_v0 }
 0x1c6   :  { %v735_v19 = vpop.f32.mrf.mxu1 }
 0x1c8   :  { %v14296_v20 = vpop.f32.mrf.mxu1 }
 0x1ca   :  { %v883_v21 = vpop.f32.mrf.mxu1 }
 0x1cc   :  { %v14306_v26 = vpop.f32.mrf.mxu1 }
 0x1ce   :  { %v659_v28 = vpop.f32.mrf.mxu0  ;;  %v1029_v32 = vpop.f32.mrf.mxu1 }
 0x1cf   :  { %v736_v50 = vadd.f32 %v735_v19, %v659_v28 }
 0x1d0   :  { %v14291_v33 = vpop.f32.mrf.mxu0  ;;  %v14316_v34 = vpop.f32.mrf.mxu1 }
 0x1d2   :  { %v809_v35 = vpop.f32.mrf.mxu0  ;;  %v1181_v36 = vpop.f32.mrf.mxu1 }
 0x1d3   :  { %v810_v54 = vadd.f32 %v809_v35, %v736_v50 }
 0x1d4   :  { %v14301_v37 = vpop.f32.mrf.mxu0  ;;  %v14326_v38 = vpop.f32.mrf.mxu1 }
 0x1d5   :  { %v884_v60 = vadd.f32 %v883_v21, %v810_v54 }
 0x1d6   :  { %v957_v39 = vpop.f32.mrf.mxu0  ;;  %v1329_v40 = vpop.f32.mrf.mxu1 }
 0x1d7   :  { %v958_v63 = vadd.f32 %v957_v39, %v884_v60 }
 0x1d8   :  { %v14311_v41 = vpop.f32.mrf.mxu0  ;;  %v14336_v44 = vpop.f32.mrf.mxu1 }
 0x1d9   :  { %v1030_v20 = vadd.f32 %v1029_v32, %v958_v63 }
 0x1da   :  { %v1105_v42 = vpop.f32.mrf.mxu0  ;;  %v1475_v43 = vpop.f32.mrf.mxu1 }
 0x1db   :  { %v1182_v47 = vadd.f32 %v1181_v36, %v1105_v42  ;;  %v1925_v21 = vsel %vm42_vm1, %v1030_v20, 0.0  ;;  %v2411_v42 = vld [vmem:[#allocation5 + $0x78] sm:$0xff] }
 0x1dc   :  { %v14321_v45 = vpop.f32.mrf.mxu0  ;;  %v14346_v46 = vpop.f32.mrf.mxu1  ;;  %v16251_v32 = vand.u32 4294901760, %v2411_v42 }
 0x1de   :  { %v1255_v48 = vpop.f32.mrf.mxu0  ;;  %v1627_v49 = vpop.f32.mrf.mxu1  ;;  %v16256_v50 = vsub.f32 %v2411_v42, %v16251_v32 }
 0x1df   :  { %v1256_v51 = vadd.f32 %v1255_v48, %v1182_v47  ;;  %v2409_v47 = vld [vmem:[#allocation5 + $0x68] sm:$0xff] }
 0x1e0   :  { %v14331_v52 = vpop.f32.mrf.mxu0  ;;  %v14356_v53 = vpop.f32.mrf.mxu1  ;;  %v2511_v60 = vand.u32 4294901760, %v16256_v50 }
 0x1e1   :  { %v1330_v56 = vadd.f32 %v1329_v40, %v1256_v51  ;;  %v13475_v40 = vld [vmem:[#allocation5 + $0x2c1] ss:$0 sm:$0xff]  ;;  %v16258_v53 = vand.u32 4294901760, %v2409_v47 }
 0x1e2   :  { %v1403_v55 = vpop.f32.mrf.mxu0  ;;  %v1775_v29 = vpop.f32.mrf.mxu1  ;;  %v2408_v51 = vld [vmem:[#allocation5 + $0x60] sm:$0xff] }
 0x1e3   :  { %v1404_v31 = vadd.f32 %v1403_v55, %v1330_v56  ;;  %v2407_v55 = vld [vmem:[#allocation5 + $0x58] sm:$0xff]  ;;  %v16264_v56 = vand.u32 4294901760, %v2408_v51 }
 0x1e4   :  { %v14341_v57 = vpop.f32.mrf.mxu0  ;;  %v14366_v58 = vpop.f32.mrf.mxu1 }
 0x1e5   :  { %v1476_v7 = vadd.f32 %v1475_v43, %v1404_v31  ;;  %v2410_v43 = vld [vmem:[#allocation5 + $0x70] sm:$0xff]  ;;  %v2405_v31 = vld [vmem:[#allocation5 + $0x48] sm:$0xff] }
 0x1e6   :  { %v1551_v61 = vpop.f32.mrf.mxu0  ;;  %v1921_v30 = vpop.f32.mrf.mxu1  ;;  %v16253_v46 = vand.u32 4294901760, %v2410_v43  ;;  %v2406_v57 = vld [vmem:[#allocation5 + $0x50] sm:$0xff] }
 0x1e7   :  { %v1628_v1 = vadd.f32 %v1627_v49, %v1551_v61  ;;  %v1926_v33 = vsel %vm42_vm1, %v1476_v7, 0.0  ;;  %v16270_v61 = vsub.f32 %v2409_v47, %v16258_v53  ;;  %v16277_v63 = vand.u32 4294901760, %v2406_v57 }
 0x1e8   :  { %v14351_v62 = vpop.f32.mrf.mxu0  ;;  %v14376_v59 = vpop.f32.mrf.mxu1  ;;  %v1927_v37 = vadd.f32 %v1926_v33, %v1925_v21  ;;  %v16261_v54 = vsub.f32 %v2410_v43, %v16253_v46  ;;  %v2512_v7 = vsub.f32 %v16256_v50, %v2511_v60 }
 0x1e9   :  { %v2525_v20 = vand.u32 4294901760, %v16270_v61 }
 0x1ea   :  { %v1701_v2 = vpop.f32.mrf.mxu0  ;;  %v2518_v59 = vand.u32 4294901760, %v16261_v54 }
 0x1eb   :  { %v1702_v10 = vadd.f32 %v1701_v2, %v1628_v1  ;;  %v16283_v1 = vsub.f32 %v2408_v51, %v16264_v56 }
 0x1ec   :  { %v14361_v19 = vpop.f32.mrf.mxu0  ;;  %v2519_v33 = vsub.f32 %v16261_v54, %v2518_v59 }
 0x1ed   :  { %v1776_v26 = vadd.f32 %v1775_v29, %v1702_v10  ;;  %v16289_v10 = vand.u32 4294901760, %v2405_v31  ;;  %v2404_v19 = vld [vmem:[#allocation5 + $0x40] sm:$0xff]  ;;  %v2532_v21 = vand.u32 4294901760, %v16283_v1 }
 0x1ee   :  { %v1849_v28 = vpop.f32.mrf.mxu0  ;;  %v2520_v42 = vand.u32 4294901760, %v2519_v33 }
 0x1ef   :  { %v1850_v34 = vadd.f32 %v1849_v28, %v1776_v26  ;;  %v2533_v47 = vsub.f32 %v16283_v1, %v2532_v21 }
 0x1f0   :  { %v14371_v35 = vpop.f32.mrf.mxu0 }
 0x1f1   :  { %v1922_v36 = vadd.f32 %v1921_v30, %v1850_v34  ;;  %v16272_v30 = vand.u32 4294901760, %v2407_v55  ;;  %v16299_v34 = vsub.f32 %v2406_v57, %v16277_v63  ;;  %v2403_v35 = vld [vmem:[#allocation5 + $0x38] sm:$0xff] }
 0x1f3   :  { %v1928_v38 = vsel %vm42_vm1, %v1922_v36, 0.0  ;;  %v16293_v26 = vsub.f32 %v2407_v55, %v16272_v30  ;;  %v16305_v36 = vand.u32 4294901760, %v2404_v19  ;;  %v18429_v43 = vand.u32 4294901760, %v16299_v34 }
 0x1f4   :  { %v1929_v39 = vadd.f32 %v1928_v38, %v1927_v37  ;;  %v2513_v38 = vand.u32 4294901760, %v2512_v7  ;;  %v2399_v7 = vld [vmem:[#allocation5 + $0x18] sm:$0xff] }
 0x1f6   :  { %v1935_v41 = vadd.f32 %v13475_v40, %v1929_v39  ;;  %v16309_v40 = vsub.f32 %v2405_v31, %v16289_v10  ;;  %v2402_v39 = vld [vmem:[#allocation5 + $0x30] sm:$0xff] }
 0x1f8   :  { %v1937_v44 = vmul.f32 0.70710677, %v1935_v41  ;;  %v1936_v48 = vmul.f32 0.5, %v1935_v41  ;;  %v2526_v41 = vsub.f32 %v16270_v61, %v2525_v20  ;;  %v18427_v51 = vand.u32 4294901760, %v16309_v40 }
 0x1fa   :  { %15902 = verf.f32 %v1937_v44  ;;  %v16315_v44 = vand.u32 4294901760, %v2403_v35  ;;  %v2527_v55 = vand.u32 4294901760, %v2526_v41 }
 0x1fc   :  { %v16337_v57 = vsub.f32 %v2403_v35, %v16315_v44 }
 0x207   :  { %v15903_v45 = vpop.eup %15902 }
 0x208   :  { %v1939_v49 = vadd.f32 1.0, %v15903_v45  ;;  %v2401_v45 = vld [vmem:[#allocation5 + $0x28] sm:$0xff] }
 0x209   :  { %v16339_v31 = vand.u32 4294901760, %v2401_v45 }
 0x20a   :  { %v1940_v52 = vmul.f32 %v1939_v49, %v1936_v48  ;;  %v16326_v48 = vsub.f32 %v2404_v19, %v16305_v36  ;;  %v16328_v49 = vand.u32 4294901760, %v2402_v39  ;;  %v2534_v19 = vand.u32 4294901760, %v2533_v47 }
 0x20c   :  { %v1948_v29 = vsel %vm42_vm1, %v1940_v52, 0  ;;  %v2400_v52 = vld [vmem:[#allocation5 + $0x20] sm:$0xff]  ;;  %v16352_v33 = vsub.f32 %v2402_v39, %v16328_v49  ;;  %v16365_v39 = vand.u32 4294901760, %v2399_v7 }
 0x20d   :  { %v16266_v58 = vand.u32 4294901760, %v1948_v29  ;;  %v16354_v35 = vand.u32 4294901760, %v2400_v52 }
 0x20f   :  { %v2017_v62 = vsub.f32 %v1948_v29, %v16266_v58  ;;  %14385 = vmatmul.mubr.f32.vlgmr.msra.gmra.mxu1 %v16266_v58 }
 0x210   :  { %14393 = vmatpush3.msra.mxu1 %v16236_v3  ;;  %14394 = vmatprep.mubr.msk.f32.mxu1 %vm15989_vm0, %v15988_v0 }
 0x211   :  { %v2018_v2 = vand.u32 4294901760, %v2017_v62  ;;  %14402 = vmatprep.subr.mxu1 %v15988_v0 }
 0x213   :  { %14395 = vmatmul.mubr.f32.vlgmr.msra.gmra.mxu1 %v2018_v2  ;;  %v2019_v28 = vsub.f32 %v2017_v62, %v2018_v2  ;;  %v2547_v2 = vsub.f32 %v16299_v34, %v18429_v43 }
 0x214   :  { %14403 = vmatpush3.msra.mxu1 %v16236_v3  ;;  %14404 = vmatprep.mubr.msk.f32.mxu1 %vm15989_vm0, %v15988_v0  ;;  %v18431_v3 = vand.u32 4294901760, %v16293_v26 }
 0x215   :  { %v2020_v37 = vand.u32 4294901760, %v2019_v28  ;;  %14442 = vmatprep.subr.mxu1 %v15988_v0  ;;  %v18426_v28 = vand.u32 4294901760, %v16326_v48  ;;  %v2548_v41 = vand.u32 4294901760, %v2547_v2 }
 0x216   :  { %v2540_v29 = vsub.f32 %v16293_v26, %v18431_v3 }
 0x217   :  { %14380 = vmatmul.mubr.f32.vlgmr.msra.gmra.mxu0 %v2020_v37  ;;  %14405 = vmatmul.mubr.f32.vlgmr.msra.gmra.mxu1 %v16266_v58  ;;  %v18428_v37 = vand.u32 4294901760, %v16337_v57  ;;  %v2561_v47 = vsub.f32 %v16326_v48, %v18426_v28  ;;  %v16387_v28 = vsub.f32 %v2399_v7, %v16365_v39 }
 0x218   :  { %14388 = vmatpush3.msra.mxu0 %v16239_v5  ;;  %14389 = vmatprep.mubr.msk.f32.mxu0 %vm15989_vm0, %v15988_v0  ;;  %v2554_v5 = vsub.f32 %v16309_v40, %v18427_v51  ;;  %v2396_v51 = vld [vmem:[#allocation5] sm:$0xff] }
 0x219   :  { %14397 = vmatprep.subr.mxu0 %v15988_v0  ;;  %14443 = vmatpush3.msra.mxu1 %v2513_v38  ;;  %v16363_v38 = vsub.f32 %v2401_v45, %v16339_v31  ;;  %v16375_v45 = vsub.f32 %v2400_v52, %v16354_v35  ;;  %v2568_v2 = vsub.f32 %v16337_v57, %v18428_v37  ;;  %v16403_v43 = vand.u32 4294901760, %v2396_v51 }
 0x21a   :  { %14444 = vmatprep.subr.mxu1 %v15988_v0  ;;  %14474 = vmatprep.mubr.msk.f32.mxu1 %vm15989_vm0, %v15988_v0 }
 0x21b   :  { %14390 = vmatmul.mubr.f32.vlgmr.msra.gmra.mxu0 %v2017_v62  ;;  %14445 = vmatpush3.msra.mxu1 %v2520_v42  ;;  %v2541_v62 = vand.u32 4294901760, %v2540_v29  ;;  %v2397_v42 = vld [vmem:[#allocation5 + $0x8] sm:$0xff]  ;;  %v18433_v37 = vand.u32 4294901760, %v16375_v45 }
 0x21c   :  { %14398 = vmatpush3.msra.mxu0 %v2059_v6  ;;  %14399 = vmatprep.mubr.msk.f32.mxu0 %vm15989_vm0, %v15988_v0  ;;  %v2398_v6 = vld [vmem:[#allocation5 + $0x10] sm:$0xff]  ;;  %v16389_v52 = vand.u32 4294901760, %v2397_v42 }
 0x21d   :  { %14407 = vmatprep.subr.mxu0 %v15988_v0  ;;  %14446 = vmatprep.subr.mxu1 %v15988_v0  ;;  %v16377_v29 = vand.u32 4294901760, %v2398_v6 }
 0x21e   :  { %14447 = vmatpush3.msra.mxu1 %v2527_v55  ;;  %v18430_v55 = vand.u32 4294901760, %v16352_v33  ;;  %v16411_v3 = vsub.f32 %v2397_v42, %v16389_v52  ;;  %v16423_v42 = vsub.f32 %v2396_v51, %v16403_v43 }
 0x21f   :  { %14400 = vmatmul.mubr.f32.vlgmr.msra.gmra.mxu0 %v16266_v58  ;;  %14448 = vmatprep.subr.mxu1 %v15988_v0  ;;  %v2555_v58 = vand.u32 4294901760, %v2554_v5  ;;  %v2562_v5 = vand.u32 4294901760, %v2561_v47  ;;  %v16399_v7 = vsub.f32 %v2398_v6, %v16377_v29 }
 0x220   :  { %14408 = vmatpush3.msra.mxu0 %v16251_v32  ;;  %14449 = vmatpush3.msra.mxu1 %v2534_v19  ;;  %v18432_v19 = vand.u32 4294901760, %v16363_v38 }
 0x221   :  { %14409 = vmatprep.subr.mxu0 %v15988_v0  ;;  %14450 = vmatprep.subr.mxu1 %v15988_v0 }
 0x222   :  { %14410 = vmatpush3.msra.mxu0 %v16253_v46  ;;  %14451 = vmatpush3.msra.mxu1 %v2541_v62  ;;  %v2575_v62 = vsub.f32 %v16352_v33, %v18430_v55  ;;  %v2582_v47 = vsub.f32 %v16363_v38, %v18432_v19  ;;  %v18434_v55 = vand.u32 4294901760, %v16387_v28 }
 0x223   :  { %14411 = vmatprep.subr.mxu0 %v15988_v0  ;;  %14452 = vmatprep.subr.mxu1 %v15988_v0 }
 0x224   :  { %14412 = vmatpush3.msra.mxu0 %v16258_v53  ;;  %14453 = vmatpush3.msra.mxu1 %v2548_v41  ;;  %v2569_v41 = vand.u32 4294901760, %v2568_v2  ;;  %v2576_v6 = vand.u32 4294901760, %v2575_v62  ;;  %v2602_v2 = vand.u32 4294901760, %v16399_v7  ;;  %v2583_v19 = vand.u32 4294901760, %v2582_v47 }
 0x225   :  { %14413 = vmatprep.subr.mxu0 %v15988_v0  ;;  %14454 = vmatprep.subr.mxu1 %v15988_v0  ;;  %v2609_v62 = vand.u32 4294901760, %v16411_v3 }
 0x226   :  { %14414 = vmatpush3.msra.mxu0 %v16264_v56  ;;  %14455 = vmatpush3.msra.mxu1 %v2555_v58  ;;  %v2589_v58 = vsub.f32 %v16375_v45, %v18433_v37  ;;  %v2603_v51 = vsub.f32 %v16399_v7, %v2602_v2 }
 0x227   :  { %14415 = vmatprep.subr.mxu0 %v15988_v0  ;;  %14456 = vmatprep.subr.mxu1 %v15988_v0 }
 0x228   :  { %14416 = vmatpush3.msra.mxu0 %v16272_v30  ;;  %14457 = vmatpush3.msra.mxu1 %v2562_v5  ;;  %v2596_v5 = vsub.f32 %v16387_v28, %v18434_v55  ;;  %v2590_v37 = vand.u32 4294901760, %v2589_v58  ;;  %v2610_v55 = vsub.f32 %v16411_v3, %v2609_v62 }
 0x229   :  { %14417 = vmatprep.subr.mxu0 %v15988_v0  ;;  %14458 = vmatprep.subr.mxu1 %v15988_v0 }
 0x22a   :  { %14418 = vmatpush3.msra.mxu0 %v16277_v63  ;;  %14459 = vmatpush3.msra.mxu1 %v2569_v41  ;;  %v2616_v41 = vand.u32 4294901760, %v16423_v42  ;;  %v2597_v47 = vand.u32 4294901760, %v2596_v5  ;;  %v2611_v58 = vand.u32 4294901760, %v2610_v55 }
 0x22b   :  { %14419 = vmatprep.subr.mxu0 %v15988_v0  ;;  %14460 = vmatprep.subr.mxu1 %v15988_v0 }
 0x22c   :  { %14420 = vmatpush3.msra.mxu0 %v16289_v10  ;;  %14461 = vmatpush3.msra.mxu1 %v2576_v6  ;;  %v2604_v6 = vand.u32 4294901760, %v2603_v51 }
 0x22d   :  { %14421 = vmatprep.subr.mxu0 %v15988_v0  ;;  %14462 = vmatprep.subr.mxu1 %v15988_v0 }
 0x22e   :  { %14422 = vmatpush3.msra.mxu0 %v16305_v36  ;;  %14463 = vmatpush3.msra.mxu1 %v2583_v19  ;;  %v2617_v19 = vsub.f32 %v16423_v42, %v2616_v41 }
 0x22f   :  { %14423 = vmatprep.subr.mxu0 %v15988_v0  ;;  %14464 = vmatprep.subr.mxu1 %v15988_v0 }
 0x230   :  { %14424 = vmatpush3.msra.mxu0 %v16315_v44  ;;  %14465 = vmatpush3.msra.mxu1 %v2590_v37  ;;  %v2618_v37 = vand.u32 4294901760, %v2617_v19 }
 0x231   :  { %14425 = vmatprep.subr.mxu0 %v15988_v0  ;;  %14466 = vmatprep.subr.mxu1 %v15988_v0 }
 0x232   :  { %14426 = vmatpush3.msra.mxu0 %v16328_v49  ;;  %14467 = vmatpush3.msra.mxu1 %v2597_v47 }
 0x233   :  { %14427 = vmatprep.subr.mxu0 %v15988_v0  ;;  %14468 = vmatprep.subr.mxu1 %v15988_v0 }
 0x234   :  { %14428 = vmatpush3.msra.mxu0 %v16339_v31  ;;  %14469 = vmatpush3.msra.mxu1 %v2604_v6 }
 0x235   :  { %14429 = vmatprep.subr.mxu0 %v15988_v0  ;;  %14470 = vmatprep.subr.mxu1 %v15988_v0 }
 0x236   :  { %14430 = vmatpush3.msra.mxu0 %v16354_v35  ;;  %14471 = vmatpush3.msra.mxu1 %v2611_v58 }
 0x237   :  { %14431 = vmatprep.subr.mxu0 %v15988_v0  ;;  %14472 = vmatprep.subr.mxu1 %v15988_v0 }
 0x238   :  { %14432 = vmatpush3.msra.mxu0 %v16365_v39  ;;  %14439 = vmatprep.mubr.msk.f32.mxu0 %vm15989_vm0, %v15988_v0 }
 0x239   :  { %14433 = vmatprep.subr.mxu0 %v15988_v0  ;;  %14473 = vmatpush3.msra.mxu1 %v2618_v37 }
 0x23a   :  { %14434 = vmatpush3.msra.mxu0 %v16377_v29  ;;  %14512 = vmatprep.subr.mxu1 %v15988_v0 }
 0x23b   :  { %14435 = vmatprep.subr.mxu0 %v15988_v0  ;;  %14475 = vmatmul.mubr.f32.vlgmr.msra.gmra.mxu1 %v16018_v4 }
 0x23c   :  { %14436 = vmatpush3.msra.mxu0 %v16389_v52  ;;  %14513 = vmatpush3.msra.mxu1 %v16251_v32 }
 0x23d   :  { %14437 = vmatprep.subr.mxu0 %v15988_v0  ;;  %14514 = vmatprep.subr.mxu1 %v15988_v0 }
 0x23e   :  { %14438 = vmatpush3.msra.mxu0 %v16403_v43  ;;  %14515 = vmatpush3.msra.mxu1 %v16253_v46 }
 0x23f   :  { %14440 = vmatmul.mubr.f32.vlgmr.msra.gmra.mxu0 %v16061_v23  ;;  %14477 = vmatprep.subr.mxu0 %v15988_v0  ;;  %v18455_v23 = vand.u32 4294901760, %v16309_v40 }
 0x240   :  { %14478 = vmatpush3.msra.mxu0 %v16256_v50  ;;  %14516 = vmatprep.subr.mxu1 %v15988_v0  ;;  %v18458_v50 = vand.u32 4294901760, %v16352_v33 }
 0x241   :  { %14479 = vmatprep.subr.mxu0 %v15988_v0  ;;  %14517 = vmatpush3.msra.mxu1 %v16258_v53 }
 0x242   :  { %14480 = vmatpush3.msra.mxu0 %v16261_v54  ;;  %14518 = vmatprep.subr.mxu1 %v15988_v0  ;;  %v18460_v54 = vand.u32 4294901760, %v16375_v45 }
 0x243   :  { %14481 = vmatprep.subr.mxu0 %v15988_v0  ;;  %14519 = vmatpush3.msra.mxu1 %v16264_v56 }
 0x244   :  { %14482 = vmatpush3.msra.mxu0 %v16270_v61  ;;  %14520 = vmatprep.subr.mxu1 %v15988_v0 }
 0x245   :  { %14483 = vmatprep.subr.mxu0 %v15988_v0  ;;  %14521 = vmatpush3.msra.mxu1 %v16272_v30 }
 0x246   :  { %14484 = vmatpush3.msra.mxu0 %v16283_v1  ;;  %14522 = vmatprep.subr.mxu1 %v15988_v0 }
 0x247   :  { %14485 = vmatprep.subr.mxu0 %v15988_v0  ;;  %14523 = vmatpush3.msra.mxu1 %v16277_v63 }
 0x248   :  { %14486 = vmatpush3.msra.mxu0 %v16293_v26  ;;  %14524 = vmatprep.subr.mxu1 %v15988_v0 }
 0x249   :  { %14487 = vmatprep.subr.mxu0 %v15988_v0  ;;  %14525 = vmatpush3.msra.mxu1 %v16289_v10 }
 0x24a   :  { %14488 = vmatpush3.msra.mxu0 %v16299_v34  ;;  %14526 = vmatprep.subr.mxu1 %v15988_v0 }
 0x24b   :  { %14489 = vmatprep.subr.mxu0 %v15988_v0  ;;  %14527 = vmatpush3.msra.mxu1 %v16305_v36 }
 0x24c   :  { %14490 = vmatpush3.msra.mxu0 %v16309_v40  ;;  %14528 = vmatprep.subr.mxu1 %v15988_v0 }
 0x24d   :  { %14491 = vmatprep.subr.mxu0 %v15988_v0  ;;  %14529 = vmatpush3.msra.mxu1 %v16315_v44 }
 0x24e   :  { %14492 = vmatpush3.msra.mxu0 %v16326_v48  ;;  %14530 = vmatprep.subr.mxu1 %v15988_v0 }
 0x24f   :  { %14493 = vmatprep.subr.mxu0 %v15988_v0  ;;  %14531 = vmatpush3.msra.mxu1 %v16328_v49 }
 0x250   :  { %14494 = vmatpush3.msra.mxu0 %v16337_v57  ;;  %14532 = vmatprep.subr.mxu1 %v15988_v0 }
 0x251   :  { %14495 = vmatprep.subr.mxu0 %v15988_v0  ;;  %14533 = vmatpush3.msra.mxu1 %v16339_v31 }
 0x252   :  { %14496 = vmatpush3.msra.mxu0 %v16352_v33  ;;  %14534 = vmatprep.subr.mxu1 %v15988_v0 }
 0x253   :  { %14497 = vmatprep.subr.mxu0 %v15988_v0  ;;  %14535 = vmatpush3.msra.mxu1 %v16354_v35 }
 0x254   :  { %14498 = vmatpush3.msra.mxu0 %v16363_v38  ;;  %14536 = vmatprep.subr.mxu1 %v15988_v0 }
 0x255   :  { %14499 = vmatprep.subr.mxu0 %v15988_v0  ;;  %14537 = vmatpush3.msra.mxu1 %v16365_v39 }
 0x256   :  { %14500 = vmatpush3.msra.mxu0 %v16375_v45  ;;  %14538 = vmatprep.subr.mxu1 %v15988_v0  ;;  %v13477_v45 = vld [vmem:[#allocation5 + $0x2bc] ss:$0 sm:$0xff] }
 0x257   :  { %14501 = vmatprep.subr.mxu0 %v15988_v0  ;;  %14539 = vmatpush3.msra.mxu1 %v16377_v29 }
 0x258   :  { %14502 = vmatpush3.msra.mxu0 %v16387_v28  ;;  %14540 = vmatprep.subr.mxu1 %v15988_v0 }
 0x259   :  { %14503 = vmatprep.subr.mxu0 %v15988_v0  ;;  %14541 = vmatpush3.msra.mxu1 %v16389_v52 }
 0x25a   :  { %14504 = vmatpush3.msra.mxu0 %v16399_v7  ;;  %14542 = vmatprep.subr.mxu1 %v15988_v0 }
 0x25b   :  { %14505 = vmatprep.subr.mxu0 %v15988_v0  ;;  %14509 = vmatprep.mubr.msk.f32.mxu0 %vm15989_vm0, %v15988_v0 }
 0x25c   :  { %14506 = vmatpush3.msra.mxu0 %v16411_v3  ;;  %14543 = vmatpush3.msra.mxu1 %v16403_v43 }
 0x25d   :  { %14507 = vmatprep.subr.mxu0 %v15988_v0  ;;  %14544 = vmatprep.mubr.msk.f32.mxu1 %vm15989_vm0, %v15988_v0 }
 0x25e   :  { %14508 = vmatpush3.msra.mxu0 %v16423_v42  ;;  %14582 = vmatprep.subr.mxu1 %v15988_v0 }
 0x25f   :  { %14510 = vmatmul.mubr.f32.vlgmr.msra.gmra.mxu0 %v16029_v11  ;;  %14547 = vmatprep.subr.mxu0 %v15988_v0  ;;  %v18453_v11 = vand.u32 4294901760, %v16293_v26 }
 0x260   :  { %14545 = vmatmul.mubr.f32.vlgmr.msra.gmra.mxu1 %v16041_v15  ;;  %14548 = vmatpush3.msra.mxu0 %v2511_v60  ;;  %v18454_v15 = vand.u32 4294901760, %v16299_v34 }
 0x261   :  { %14583 = vmatpush3.msra.mxu1 %v16251_v32  ;;  %14549 = vmatprep.subr.mxu0 %v15988_v0  ;;  %v18456_v32 = vand.u32 4294901760, %v16326_v48 }
 0x262   :  { %14584 = vmatprep.subr.mxu1 %v15988_v0  ;;  %14550 = vmatpush3.msra.mxu0 %v2518_v59 }
 0x263   :  { %14585 = vmatpush3.msra.mxu1 %v16253_v46  ;;  %14551 = vmatprep.subr.mxu0 %v15988_v0  ;;  %v18457_v46 = vand.u32 4294901760, %v16337_v57 }
 0x264   :  { %14586 = vmatprep.subr.mxu1 %v15988_v0  ;;  %14552 = vmatpush3.msra.mxu0 %v2525_v20 }
 0x265   :  { %14587 = vmatpush3.msra.mxu1 %v16258_v53  ;;  %14553 = vmatprep.subr.mxu0 %v15988_v0  ;;  %v18459_v53 = vand.u32 4294901760, %v16363_v38 }
 0x266   :  { %14588 = vmatprep.subr.mxu1 %v15988_v0  ;;  %14554 = vmatpush3.msra.mxu0 %v2532_v21 }
 0x267   :  { %14589 = vmatpush3.msra.mxu1 %v16264_v56  ;;  %14555 = vmatprep.subr.mxu0 %v15988_v0  ;;  %v18461_v56 = vand.u32 4294901760, %v16387_v28 }
 0x268   :  { %14590 = vmatprep.subr.mxu1 %v15988_v0  ;;  %14556 = vmatpush3.msra.mxu0 %v18453_v11 }
 0x269   :  { %14591 = vmatpush3.msra.mxu1 %v16272_v30  ;;  %14557 = vmatprep.subr.mxu0 %v15988_v0 }
 0x26a   :  { %14592 = vmatprep.subr.mxu1 %v15988_v0  ;;  %14558 = vmatpush3.msra.mxu0 %v18454_v15 }
 0x26b   :  { %14593 = vmatpush3.msra.mxu1 %v16277_v63  ;;  %14559 = vmatprep.subr.mxu0 %v15988_v0  ;;  %v13476_v63 = vld [vmem:[#allocation5 + $0x2b8] ss:$0 sm:$0xff] }
 0x26c   :  { %14594 = vmatprep.subr.mxu1 %v15988_v0  ;;  %14560 = vmatpush3.msra.mxu0 %v18455_v23 }
 0x26d   :  { %14595 = vmatpush3.msra.mxu1 %v16289_v10  ;;  %14561 = vmatprep.subr.mxu0 %v15988_v0 }
 0x26e   :  { %14596 = vmatprep.subr.mxu1 %v15988_v0  ;;  %14562 = vmatpush3.msra.mxu0 %v18456_v32 }
 0x26f   :  { %14597 = vmatpush3.msra.mxu1 %v16305_v36  ;;  %14563 = vmatprep.subr.mxu0 %v15988_v0 }
 0x270   :  { %14598 = vmatprep.subr.mxu1 %v15988_v0  ;;  %14564 = vmatpush3.msra.mxu0 %v18457_v46 }
 0x271   :  { %14599 = vmatpush3.msra.mxu1 %v16315_v44  ;;  %14565 = vmatprep.subr.mxu0 %v15988_v0 }
 0x272   :  { %14600 = vmatprep.subr.mxu1 %v15988_v0  ;;  %14566 = vmatpush3.msra.mxu0 %v18458_v50 }
 0x273   :  { %14601 = vmatpush3.msra.mxu1 %v16328_v49  ;;  %14567 = vmatprep.subr.mxu0 %v15988_v0 }
 0x274   :  { %14602 = vmatprep.subr.mxu1 %v15988_v0  ;;  %14568 = vmatpush3.msra.mxu0 %v18459_v53 }
 0x275   :  { %14603 = vmatpush3.msra.mxu1 %v16339_v31  ;;  %14569 = vmatprep.subr.mxu0 %v15988_v0 }
 0x276   :  { %14604 = vmatprep.subr.mxu1 %v15988_v0  ;;  %14570 = vmatpush3.msra.mxu0 %v18460_v54  ;;  %v3596_v54 = vld [vmem:[#allocation5 + $0x218] sm:$0xff] }
 0x277   :  { %14605 = vmatpush3.msra.mxu1 %v16354_v35  ;;  %14571 = vmatprep.subr.mxu0 %v15988_v0 }
 0x278   :  { %14606 = vmatprep.subr.mxu1 %v15988_v0  ;;  %14572 = vmatpush3.msra.mxu0 %v18461_v56  ;;  %v16711_v56 = vand.u32 4294901760, %v3596_v54 }
 0x279   :  { %14607 = vmatpush3.msra.mxu1 %v16365_v39  ;;  %14573 = vmatprep.subr.mxu0 %v15988_v0 }
 0x27a   :  { %14608 = vmatprep.subr.mxu1 %v15988_v0  ;;  %14574 = vmatpush3.msra.mxu0 %v2602_v2 }
 0x27b   :  { %14609 = vmatpush3.msra.mxu1 %v16377_v29  ;;  %14575 = vmatprep.subr.mxu0 %v15988_v0 }
 0x27c   :  { %14610 = vmatprep.subr.mxu1 %v15988_v0  ;;  %14576 = vmatpush3.msra.mxu0 %v2609_v62 }
 0x27d   :  { %14611 = vmatpush3.msra.mxu1 %v16389_v52  ;;  %14577 = vmatprep.subr.mxu0 %v15988_v0 }
 0x27e   :  { %14612 = vmatprep.subr.mxu1 %v15988_v0  ;;  %14578 = vmatpush3.msra.mxu0 %v2616_v41 }
 0x27f   :  { %14579 = vmatprep.mubr.msk.f32.mxu0 %vm15989_vm0, %v15988_v0  ;;  %14613 = vmatpush3.msra.mxu1 %v16403_v43 }
 0x280   :  { %14614 = vmatprep.mubr.msk.f32.mxu1 %vm15989_vm0, %v15988_v0  ;;  %14580 = vmatmul.mubr.f32.vlgmr.msra.gmra.mxu0 %v16018_v4 }
 0x281   :  { %14615 = vmatmul.mubr.f32.vlgmr.msra.gmra.mxu1 %v16018_v4  ;;  %14617 = vmatprep.subr.mxu0 %v15988_v0 }
 0x282   :  { %14619 = vmatprep.mubr.msk.f32.mxu0 %vm15989_vm0, %v15988_v0  ;;  %14628 = vmatprep.subr.mxu1 %v15988_v0 }
 0x283   :  { %14630 = vmatprep.mubr.msk.f32.mxu1 %vm15989_vm0, %v15988_v0 }
 0x2cf   :  { %v2098_v60 = vpop.f32.mrf.mxu1 }
 0x2d1   :  { %v14386_v61 = vpop.f32.mrf.mxu1 }
 0x2d3   :  { %v2246_v30 = vpop.f32.mrf.mxu1 }
 0x2d5   :  { %v14396_v59 = vpop.f32.mrf.mxu1 }
 0x2d7   :  { %v2022_v1 = vpop.f32.mrf.mxu0  ;;  %v2392_v10 = vpop.f32.mrf.mxu1 }
 0x2d8   :  { %v2023_v20 = vadd.f32 %v13476_v63, %v2022_v1 }
 0x2d9   :  { %v14381_v26 = vpop.f32.mrf.mxu0  ;;  %v14406_v4 = vpop.f32.mrf.mxu1 }
 0x2da   :  { %v2099_v34 = vadd.f32 %v2098_v60, %v2023_v20  ;;  %v16714_v60 = vsub.f32 %v3596_v54, %v16711_v56 }
 0x2db   :  { %v2172_v21 = vpop.f32.mrf.mxu0 }
 0x2dc   :  { %v2173_v36 = vadd.f32 %v2172_v21, %v2099_v34  ;;  %v3708_v61 = vand.u32 4294901760, %v16714_v60 }
 0x2dd   :  { %v14391_v40 = vpop.f32.mrf.mxu0 }
 0x2de   :  { %v2247_v3 = vadd.f32 %v2246_v30, %v2173_v36  ;;  %v3709_v30 = vsub.f32 %v16714_v60, %v3708_v61 }
 0x2df   :  { %v2320_v44 = vpop.f32.mrf.mxu0 }
 0x2e0   :  { %v2321_v43 = vadd.f32 %v2320_v44, %v2247_v3  ;;  %v3710_v59 = vand.u32 4294901760, %v3709_v30 }
 0x2e1   :  { %v14401_v48 = vpop.f32.mrf.mxu0 }
 0x2e2   :  { %v2393_v49 = vadd.f32 %v2392_v10, %v2321_v43 }
 0x2fb   :  { %v2655_v57 = vpop.f32.mrf.mxu1 }
 0x2fd   :  { %v14476_v31 = vpop.f32.mrf.mxu1 }
 0x2ff   :  { %v2504_v28 = vpop.f32.mrf.mxu0 }
 0x300   :  { %v2505_v29 = vadd.f32 %v13477_v45, %v2504_v28 }
 0x301   :  { %v14441_v33 = vpop.f32.mrf.mxu0 }
 0x302   :  { %v2656_v52 = vadd.f32 %v2655_v57, %v2505_v29 }
 0x31f   :  { %v2759_v35 = vpop.f32.mrf.mxu0 }
 0x320   :  { %v2848_v38 = vpop.f32.mrf.mxu1  ;;  %v2760_v7 = vadd.f32 %v2759_v35, %v2656_v52 }
 0x321   :  { %v14511_v39 = vpop.f32.mrf.mxu0 }
 0x322   :  { %v14546_v55 = vpop.f32.mrf.mxu1  ;;  %v2849_v2 = vadd.f32 %v2848_v38, %v2760_v7  ;;  %v3597_v38 = vld [vmem:[#allocation5 + $0x220] sm:$0xff] }
 0x323   :  { %v16723_v7 = vand.u32 4294901760, %v3597_v38 }
 0x340   :  { %v2967_v42 = vpop.f32.mrf.mxu0 }
 0x341   :  { %v2968_v5 = vadd.f32 %v2967_v42, %v2849_v2  ;;  %v3054_v62 = vpop.f32.mrf.mxu1 }
 0x342   :  { %v14581_v51 = vpop.f32.mrf.mxu0 }
 0x343   :  { %v3055_v41 = vadd.f32 %v3054_v62, %v2968_v5  ;;  %v14616_v47 = vpop.f32.mrf.mxu1 }
 0x345   :  { %v3058_v6 = vadd.f32 %v3055_v41, %v2393_v49 }
 0x347   :  { %v3060_v19 = vmul.f32 0.70710677, %v3058_v6  ;;  %v3059_v37 = vmul.f32 0.5, %v3058_v6  ;;  %v16726_v6 = vsub.f32 %v3597_v38, %v16723_v7 }
 0x349   :  { %15904 = verf.f32 %v3060_v19  ;;  %v4154_v30 = vand.u32 4294901760, %v16726_v6 }
 0x356   :  { %v15905_v58 = vpop.eup %15904 }
 0x357   :  { %v3062_v11 = vadd.f32 1.0, %v15905_v58 }
 0x359   :  { %v3063_v15 = vmul.f32 %v3062_v11, %v3059_v37 }
 0x35b   :  { %v16633_v23 = vand.u32 4294901760, %v3063_v15 }
 0x35d   :  { %14618 = vmatpush3.msra.mxu0 %v16633_v23  ;;  %v16637_v32 = vsub.f32 %v3063_v15, %v16633_v23 }
 0x35e   :  { %14620 = vmatmul.mubr.f32.vlgmr.msra.gmra.mxu0 %v16063_v24  ;;  %14639 = vmatprep.subr.mxu0 %v15988_v0 }
 0x35f   :  { %14640 = vmatpush3.msra.mxu0 %v16637_v32  ;;  %14622 = vmatprep.mubr.msk.f32.mxu0 %vm15989_vm0, %v15988_v0  ;;  %v16645_v46 = vand.u32 4294901760, %v16637_v32 }
 0x360   :  { %14661 = vmatprep.subr.mxu0 %v15988_v0 }
 0x361   :  { %v3194_v50 = vsub.f32 %v16637_v32, %v16645_v46 }
 0x362   :  { %14623 = vmatmul.mubr.f32.gmra.mxu0 %v16068_v25 }
 0x363   :  { %14625 = vmatprep.mubr.msk.f32.mxu0 %vm15989_vm0, %v15988_v0  ;;  %v16653_v53 = vand.u32 4294901760, %v3194_v50 }
 0x365   :  { %14629 = vmatpush3.msra.mxu1 %v16653_v53 }
 0x366   :  { %14626 = vmatmul.mubr.f32.gmra.mxu0 %v16082_v27  ;;  %14631 = vmatmul.mubr.f32.vlgmr.msra.gmra.mxu1 %v16022_v8 }
 0x367   :  { %14650 = vmatprep.subr.mxu1 %v15988_v0  ;;  %14633 = vmatprep.mubr.msk.f32.mxu1 %vm15989_vm0, %v15988_v0 }
 0x368   :  { %14651 = vmatpush3.msra.mxu1 %v16633_v23  ;;  %14641 = vmatprep.mubr.msk.f32.mxu0 %vm15989_vm0, %v15988_v0 }
 0x369   :  { %14672 = vmatprep.subr.mxu1 %v15988_v0 }
 0x36a   :  { %14634 = vmatmul.mubr.f32.gmra.mxu1 %v16024_v9  ;;  %14642 = vmatmul.mubr.f32.vlgmr.msra.gmra.mxu0 %v16034_v13 }
 0x36b   :  { %14662 = vmatpush3.msra.mxu0 %v16645_v46  ;;  %14636 = vmatprep.mubr.msk.f32.mxu1 %vm15989_vm0, %v15988_v0 }
 0x36c   :  { %14644 = vmatprep.mubr.msk.f32.mxu0 %vm15989_vm0, %v15988_v0  ;;  %14683 = vmatprep.subr.mxu0 %v15988_v0 }
 0x36e   :  { %14637 = vmatmul.mubr.f32.gmra.mxu1 %v16031_v12  ;;  %14645 = vmatmul.mubr.f32.gmra.mxu0 %v16038_v14 }
 0x36f   :  { %14647 = vmatprep.mubr.msk.f32.mxu0 %vm15989_vm0, %v15988_v0  ;;  %14652 = vmatprep.mubr.msk.f32.mxu1 %vm15989_vm0, %v15988_v0 }
 0x372   :  { %14648 = vmatmul.mubr.f32.gmra.mxu0 %v16044_v16  ;;  %14653 = vmatmul.mubr.f32.vlgmr.msra.gmra.mxu1 %v16047_v17 }
 0x373   :  { %14673 = vmatpush3.msra.mxu1 %v16633_v23  ;;  %14655 = vmatprep.mubr.msk.f32.mxu1 %vm15989_vm0, %v15988_v0 }
 0x374   :  { %14663 = vmatprep.mubr.msk.f32.mxu0 %vm15989_vm0, %v15988_v0  ;;  %14688 = vmatprep.subr.mxu1 %v15988_v0 }
 0x376   :  { %14656 = vmatmul.mubr.f32.gmra.mxu1 %v16050_v18  ;;  %14664 = vmatmul.mubr.f32.vlgmr.msra.gmra.mxu0 %v16022_v8 }
 0x377   :  { %14658 = vmatprep.mubr.msk.f32.mxu1 %vm15989_vm0, %v15988_v0  ;;  %14666 = vmatprep.mubr.msk.f32.mxu0 %vm15989_vm0, %v15988_v0 }
 0x378   :  { %14684 = vmatpush3.xpose.msra.mxu0 %v16711_v56 }
 0x379   :  { %14693 = vmatprep.subr.mxu0 %v15988_v0 }
 0x37a   :  { %14659 = vmatmul.mubr.f32.gmra.mxu1 %v16059_v22  ;;  %14667 = vmatmul.mubr.f32.gmra.mxu0 %v16024_v9 }
 0x37b   :  { %14669 = vmatprep.mubr.msk.f32.mxu0 %vm15989_vm0, %v15988_v0  ;;  %14674 = vmatprep.mubr.msk.f32.mxu1 %vm15989_vm0, %v15988_v0 }
 0x37e   :  { %14670 = vmatmul.mubr.f32.gmra.mxu0 %v16031_v12  ;;  %14675 = vmatmul.mubr.f32.vlgmr.msra.gmra.mxu1 %v16022_v8 }
 0x37f   :  { %14677 = vmatprep.mubr.msk.f32.mxu1 %vm15989_vm0, %v15988_v0  ;;  %14685 = vmatprep.mubr.msk.f32.mxu0 %vm15989_vm0, %v15988_v0 }
 0x380   :  { %14689 = vmatpush3.xpose.msra.mxu1 %v3710_v59 }
 0x381   :  { %14698 = vmatprep.subr.mxu1 %v15988_v0 }
 0x382   :  { %14678 = vmatmul.mubr.f32.gmra.mxu1 %v16024_v9 }
 0x383   :  { %14680 = vmatprep.mubr.msk.f32.mxu1 %vm15989_vm0, %v15988_v0 }
 0x386   :  { %14681 = vmatmul.mubr.f32.gmra.mxu1 %v16031_v12 }
 0x387   :  { %14690 = vmatprep.mubr.msk.f32.mxu1 %vm15989_vm0, %v15988_v0 }
 0x41e   :  { %v3136_v63 = vpop.f32.mrf.mxu0 }
 0x420   :  { %v14621_v1 = vpop.f32.mrf.mxu0 }
 0x422   :  { %v3146_v10 = vpop.f32.mrf.mxu0 }
 0x424   :  { %v14624_v20 = vpop.f32.mrf.mxu0 }
 0x425   :  { %v3598_v20 = vld [vmem:[#allocation5 + $0x228] sm:$0xff] }
 0x426   :  { %v3156_v26 = vpop.f32.mrf.mxu0  ;;  %v3232_v4 = vpop.f32.mrf.mxu1 }
 0x427   :  { %v3233_v45 = vadd.f32 %v3232_v4, %v3136_v63 }
 0x428   :  { %v14627_v34 = vpop.f32.mrf.mxu0  ;;  %v14632_v21 = vpop.f32.mrf.mxu1 }
 0x42a   :  { %v3238_v36 = vpop.f32.mrf.mxu1  ;;  %v3318_v40 = vpop.f32.mrf.mxu0 }
 0x42b   :  { %v3319_v2 = vadd.f32 %v3318_v40, %v3233_v45  ;;  %v3239_v62 = vadd.f32 %v3238_v36, %v3146_v10  ;;  %v4155_v36 = vsub.f32 %v16726_v6, %v4154_v30  ;;  %v16735_v40 = vand.u32 4294901760, %v3598_v20 }
 0x42c   :  { %v14635_v3 = vpop.f32.mrf.mxu1  ;;  %v14643_v44 = vpop.f32.mrf.mxu0 }
 0x42d   :  { %v16744_v38 = vsub.f32 %v3598_v20, %v16735_v40 }
 0x42e   :  { %v3244_v43 = vpop.f32.mrf.mxu1  ;;  %v3325_v48 = vpop.f32.mrf.mxu0 }
 0x42f   :  { %v3326_v19 = vadd.f32 %v3325_v48, %v3239_v62  ;;  %v3245_v3 = vadd.f32 %v3244_v43, %v3156_v26 }
 0x430   :  { %v14638_v49 = vpop.f32.mrf.mxu1  ;;  %v14646_v57 = vpop.f32.mrf.mxu0 }
 0x432   :  { %v3332_v31 = vpop.f32.mrf.mxu0  ;;  %v3406_v28 = vpop.f32.mrf.mxu1 }
 0x433   :  { %v3407_v51 = vadd.f32 %v3406_v28, %v3319_v2  ;;  %v3333_v57 = vadd.f32 %v3332_v31, %v3245_v3 }
 0x434   :  { %v14649_v33 = vpop.f32.mrf.mxu0  ;;  %v14654_v35 = vpop.f32.mrf.mxu1 }
 0x435   :  { %v4156_v33 = vand.u32 4294901760, %v4155_v36 }
 0x436   :  { %v3414_v39 = vpop.f32.mrf.mxu1  ;;  %v3496_v55 = vpop.f32.mrf.mxu0 }
 0x437   :  { %v3497_v58 = vadd.f32 %v3496_v55, %v3407_v51  ;;  %v3415_v15 = vadd.f32 %v3414_v39, %v3326_v19  ;;  %v4953_v51 = vld [vmem:[#allocation5 + $0x268] sm:$0xff] }
 0x438   :  { %v14657_v29 = vpop.f32.mrf.mxu1  ;;  %v14665_v52 = vpop.f32.mrf.mxu0 }
 0x43a   :  { %v3422_v42 = vpop.f32.mrf.mxu1  ;;  %v3502_v5 = vpop.f32.mrf.mxu0 }
 0x43b   :  { %v3503_v63 = vadd.f32 %v3502_v5, %v3415_v15  ;;  %v3423_v26 = vadd.f32 %v3422_v42, %v3333_v57 }
 0x43c   :  { %v14660_v41 = vpop.f32.mrf.mxu1  ;;  %v14668_v47 = vpop.f32.mrf.mxu0 }
 0x43d   :  { %v16812_v41 = vand.u32 4294901760, %v4953_v51 }
 0x43e   :  { %v3508_v37 = vpop.f32.mrf.mxu0  ;;  %v3580_v11 = vpop.f32.mrf.mxu1 }
 0x43f   :  { %v3581_v50 = vadd.f32 %v3580_v11, %v3497_v58  ;;  %v3509_v55 = vadd.f32 %v3508_v37, %v3423_v26  ;;  %v16815_v47 = vsub.f32 %v4953_v51, %v16812_v41 }
 0x440   :  { %v14676_v54 = vpop.f32.mrf.mxu1  ;;  %v14671_v59 = vpop.f32.mrf.mxu0 }
 0x441   :  { %v3665_v1 = vand.u32 4294901760, %v3581_v50 }
 0x442   :  { %v3586_v10 = vpop.f32.mrf.mxu1 }
 0x443   :  { %v3666_v4 = vsub.f32 %v3581_v50, %v3665_v1  ;;  %v3587_v34 = vadd.f32 %v3586_v10, %v3503_v63  ;;  %14691 = vmatmul.mubr.f32.vlgmr.msra.gmra.mxu1 %v3665_v1 }
 0x444   :  { %v14679_v21 = vpop.f32.mrf.mxu1  ;;  %14699 = vmatpush3.xpose.msra.mxu1 %v16711_v56  ;;  %14700 = vmatprep.mubr.msk.f32.mxu1 %vm15989_vm0, %v15988_v0 }
 0x445   :  { %v3667_v44 = vand.u32 4294901760, %v3666_v4  ;;  %v16737_v48 = vand.u32 4294901760, %v3587_v34  ;;  %14708 = vmatprep.subr.mxu1 %v15988_v0 }
 0x446   :  { %v3592_v49 = vpop.f32.mrf.mxu1 }
 0x447   :  { %v3668_v28 = vsub.f32 %v3666_v4, %v3667_v44  ;;  %14701 = vmatmul.mubr.f32.vlgmr.msra.gmra.mxu1 %v3667_v44  ;;  %v4112_v39 = vsub.f32 %v3587_v34, %v16737_v48  ;;  %v3593_v45 = vadd.f32 %v3592_v49, %v3509_v55 }
 0x448   :  { %14709 = vmatpush3.xpose.msra.mxu1 %v16711_v56  ;;  %14710 = vmatprep.mubr.msk.f32.mxu1 %vm15989_vm0, %v15988_v0  ;;  %v14682_v35 = vpop.f32.mrf.mxu1  ;;  %v4600_v56 = vand.u32 4294901760, %v16744_v38 }
 0x449   :  { %v3669_v43 = vand.u32 4294901760, %v3668_v28  ;;  %14718 = vmatprep.subr.mxu1 %v15988_v0  ;;  %v4113_v31 = vand.u32 4294901760, %v4112_v39  ;;  %v4557_v2 = vand.u32 4294901760, %v3593_v45 }
 0x44a   :  { %v4601_v29 = vsub.f32 %v16744_v38, %v4600_v56 }
 0x44b   :  { %14686 = vmatmul.mubr.f32.vlgmr.msra.gmra.mxu0 %v3669_v43  ;;  %14711 = vmatmul.mubr.f32.vlgmr.msra.gmra.mxu1 %v3665_v1  ;;  %v4114_v52 = vsub.f32 %v4112_v39, %v4113_v31 }
 0x44c   :  { %14694 = vmatpush3.xpose.msra.mxu0 %v16714_v60  ;;  %14719 = vmatpush3.xpose.msra.mxu1 %v4156_v33  ;;  %v4602_v60 = vand.u32 4294901760, %v4601_v29 }
 0x44d   :  { %14695 = vmatprep.mubr.msk.f32.mxu0 %vm15989_vm0, %v15988_v0  ;;  %14720 = vmatprep.mubr.msk.f32.mxu1 %vm15989_vm0, %v15988_v0  ;;  %v4115_v42 = vand.u32 4294901760, %v4114_v52 }
 0x44e   :  { %14703 = vmatprep.subr.mxu0 %v15988_v0  ;;  %14728 = vmatprep.subr.mxu1 %v15988_v0 }
 0x44f   :  { %14696 = vmatmul.mubr.f32.vlgmr.msra.gmra.mxu0 %v3666_v4  ;;  %14721 = vmatmul.mubr.f32.vlgmr.msra.gmra.mxu1 %v16737_v48 }
 0x450   :  { %14704 = vmatpush3.xpose.msra.mxu0 %v3708_v61  ;;  %14729 = vmatpush3.xpose.msra.mxu1 %v16723_v7  ;;  %v4558_v61 = vsub.f32 %v3593_v45, %v4557_v2 }
 0x451   :  { %14705 = vmatprep.mubr.msk.f32.mxu0 %vm15989_vm0, %v15988_v0  ;;  %14730 = vmatprep.mubr.msk.f32.mxu1 %vm15989_vm0, %v15988_v0 }
 0x452   :  { %14713 = vmatprep.subr.mxu0 %v15988_v0  ;;  %14738 = vmatprep.subr.mxu1 %v15988_v0 }
 0x453   :  { %14706 = vmatmul.mubr.f32.vlgmr.msra.gmra.mxu0 %v3665_v1  ;;  %14731 = vmatmul.mubr.f32.vlgmr.msra.gmra.mxu1 %v4113_v31 }
 0x454   :  { %14714 = vmatpush3.xpose.msra.mxu0 %v16723_v7  ;;  %14739 = vmatpush3.xpose.msra.mxu1 %v16723_v7  ;;  %v4559_v7 = vand.u32 4294901760, %v4558_v61 }
 0x455   :  { %14715 = vmatprep.mubr.msk.f32.mxu0 %vm15989_vm0, %v15988_v0  ;;  %14740 = vmatprep.mubr.msk.f32.mxu1 %vm15989_vm0, %v15988_v0 }
 0x456   :  { %14723 = vmatprep.subr.mxu0 %v15988_v0  ;;  %14748 = vmatprep.subr.mxu1 %v15988_v0  ;;  %v4560_v5 = vsub.f32 %v4558_v61, %v4559_v7 }
 0x457   :  { %14716 = vmatmul.mubr.f32.vlgmr.msra.gmra.mxu0 %v4115_v42  ;;  %14741 = vmatmul.mubr.f32.vlgmr.msra.gmra.mxu1 %v16737_v48 }
 0x458   :  { %14724 = vmatpush3.xpose.msra.mxu0 %v16726_v6  ;;  %14749 = vmatpush3.xpose.msra.mxu1 %v4602_v60  ;;  %v4561_v62 = vand.u32 4294901760, %v4560_v5  ;;  %v5071_v6 = vand.u32 4294901760, %v16815_v47 }
 0x459   :  { %14725 = vmatprep.mubr.msk.f32.mxu0 %vm15989_vm0, %v15988_v0  ;;  %14750 = vmatprep.mubr.msk.f32.mxu1 %vm15989_vm0, %v15988_v0 }
 0x45a   :  { %14733 = vmatprep.subr.mxu0 %v15988_v0  ;;  %14758 = vmatprep.subr.mxu1 %v15988_v0  ;;  %v5072_v19 = vsub.f32 %v16815_v47, %v5071_v6 }
 0x45b   :  { %14726 = vmatmul.mubr.f32.vlgmr.msra.gmra.mxu0 %v4112_v39  ;;  %14751 = vmatmul.mubr.f32.vlgmr.msra.gmra.mxu1 %v4557_v2 }
 0x45c   :  { %14734 = vmatpush3.xpose.msra.mxu0 %v4154_v30  ;;  %14759 = vmatpush3.xpose.msra.mxu1 %v16735_v40  ;;  %v5073_v58 = vand.u32 4294901760, %v5072_v19 }
 0x45d   :  { %14735 = vmatprep.mubr.msk.f32.mxu0 %vm15989_vm0, %v15988_v0  ;;  %14760 = vmatprep.mubr.msk.f32.mxu1 %vm15989_vm0, %v15988_v0 }
 0x45e   :  { %14743 = vmatprep.subr.mxu0 %v15988_v0  ;;  %14768 = vmatprep.subr.mxu1 %v15988_v0 }
 0x45f   :  { %14736 = vmatmul.mubr.f32.vlgmr.msra.gmra.mxu0 %v16737_v48  ;;  %14761 = vmatmul.mubr.f32.vlgmr.msra.gmra.mxu1 %v4559_v7 }
 0x460   :  { %14744 = vmatpush3.xpose.msra.mxu0 %v16735_v40  ;;  %14769 = vmatpush3.xpose.msra.mxu1 %v16735_v40 }
 0x461   :  { %14745 = vmatprep.mubr.msk.f32.mxu0 %vm15989_vm0, %v15988_v0  ;;  %14770 = vmatprep.mubr.msk.f32.mxu1 %vm15989_vm0, %v15988_v0 }
 0x462   :  { %14753 = vmatprep.subr.mxu0 %v15988_v0  ;;  %14778 = vmatprep.subr.mxu1 %v15988_v0 }
 0x463   :  { %14746 = vmatmul.mubr.f32.vlgmr.msra.gmra.mxu0 %v4561_v62  ;;  %14771 = vmatmul.mubr.f32.vlgmr.msra.gmra.mxu1 %v4557_v2 }
 0x464   :  { %14754 = vmatpush3.xpose.msra.mxu0 %v16744_v38  ;;  %14755 = vmatprep.mubr.msk.f32.mxu0 %vm15989_vm0, %v15988_v0 }
 0x465   :  { %14763 = vmatprep.subr.mxu0 %v15988_v0  ;;  %14780 = vmatprep.mubr.msk.f32.mxu1 %vm15989_vm0, %v15988_v0 }
 0x466   :  { %14779 = vmatpush3.msra.mxu1 %v5073_v58 }
 0x467   :  { %14756 = vmatmul.mubr.f32.vlgmr.msra.gmra.mxu0 %v4558_v61  ;;  %14788 = vmatprep.subr.mxu1 %v15988_v0 }
 0x468   :  { %14764 = vmatpush3.xpose.msra.mxu0 %v4600_v56  ;;  %14765 = vmatprep.mubr.msk.f32.mxu0 %vm15989_vm0, %v15988_v0 }
 0x469   :  { %14773 = vmatprep.subr.mxu0 %v15988_v0 }
 0x46b   :  { %14766 = vmatmul.mubr.f32.vlgmr.msra.gmra.mxu0 %v4557_v2 }
 0x46c   :  { %14775 = vmatprep.mubr.msk.f32.mxu0 %vm15989_vm0, %v15988_v0  ;;  %14774 = vmatpush3.msra.mxu0 %v16812_v41 }
 0x46d   :  { %14783 = vmatprep.subr.mxu0 %v15988_v0 }
 0x503   :  { %v3747_v37 = vpop.f32.mrf.mxu1 }
 0x505   :  { %v14692_v11 = vpop.f32.mrf.mxu1 }
 0x507   :  { %v3895_v15 = vpop.f32.mrf.mxu1 }
 0x509   :  { %v14702_v50 = vpop.f32.mrf.mxu1 }
 0x50b   :  { %v3671_v54 = vpop.f32.mrf.mxu0  ;;  %v4041_v30 = vpop.f32.mrf.mxu1 }
 0x50c   :  { %v3748_v35 = vadd.f32 %v3747_v37, %v3671_v54 }
 0x50d   :  { %v14687_v59 = vpop.f32.mrf.mxu0  ;;  %v14712_v63 = vpop.f32.mrf.mxu1 }
 0x50f   :  { %v3821_v1 = vpop.f32.mrf.mxu0  ;;  %v4193_v20 = vpop.f32.mrf.mxu1 }
 0x510   :  { %v3822_v39 = vadd.f32 %v3821_v1, %v3748_v35 }
 0x511   :  { %v14697_v10 = vpop.f32.mrf.mxu0  ;;  %v14722_v4 = vpop.f32.mrf.mxu1 }
 0x512   :  { %v3896_v52 = vadd.f32 %v3895_v15, %v3822_v39 }
 0x513   :  { %v3969_v34 = vpop.f32.mrf.mxu0  ;;  %v4341_v21 = vpop.f32.mrf.mxu1 }
 0x514   :  { %v3970_v5 = vadd.f32 %v3969_v34, %v3896_v52 }
 0x515   :  { %v14707_v36 = vpop.f32.mrf.mxu0  ;;  %v14732_v40 = vpop.f32.mrf.mxu1 }
 0x516   :  { %v4042_v11 = vadd.f32 %v4041_v30, %v3970_v5 }
 0x517   :  { %v4117_v3 = vpop.f32.mrf.mxu0  ;;  %v4487_v44 = vpop.f32.mrf.mxu1 }
 0x518   :  { %v4194_v57 = vadd.f32 %v4193_v20, %v4117_v3  ;;  %v4937_v15 = vsel %vm42_vm1, %v4042_v11, 0.0  ;;  %v5423_v3 = vld [vmem:[#allocation5 + $0xf8] sm:$0xff] }
 0x519   :  { %v14717_v48 = vpop.f32.mrf.mxu0  ;;  %v14742_v49 = vpop.f32.mrf.mxu1  ;;  %v16827_v30 = vand.u32 4294901760, %v5423_v3 }
 0x51a   :  { %v5421_v48 = vld [vmem:[#allocation5 + $0xe8] sm:$0xff] }
 0x51b   :  { %v4267_v28 = vpop.f32.mrf.mxu0  ;;  %v4639_v33 = vpop.f32.mrf.mxu1 }
 0x51c   :  { %v4268_v38 = vadd.f32 %v4267_v28, %v4194_v57  ;;  %v5420_v28 = vld [vmem:[#allocation5 + $0xe0] sm:$0xff] }
 0x51d   :  { %v14727_v26 = vpop.f32.mrf.mxu0  ;;  %v14752_v43 = vpop.f32.mrf.mxu1 }
 0x51e   :  { %v4342_v31 = vadd.f32 %v4341_v21, %v4268_v38  ;;  %v13478_v21 = vld [vmem:[#allocation5 + $0x2c2] ss:$0 sm:$0xff]  ;;  %v16832_v38 = vsub.f32 %v5423_v3, %v16827_v30  ;;  %v16834_v26 = vand.u32 4294901760, %v5421_v48  ;;  %v5419_v43 = vld [vmem:[#allocation5 + $0xd8] sm:$0xff] }
 0x51f   :  { %v4415_v55 = vpop.f32.mrf.mxu0  ;;  %v4787_v56 = vpop.f32.mrf.mxu1 }
 0x520   :  { %v4416_v61 = vadd.f32 %v4415_v55, %v4342_v31  ;;  %v5418_v31 = vld [vmem:[#allocation5 + $0xd0] sm:$0xff]  ;;  %v16844_v52 = vsub.f32 %v5421_v48, %v16834_v26  ;;  %v5413_v48 = vld [vmem:[#allocation5 + $0xa8] sm:$0xff] }
 0x521   :  { %v14737_v45 = vpop.f32.mrf.mxu0  ;;  %v14762_v29 = vpop.f32.mrf.mxu1  ;;  %v16854_v5 = vand.u32 4294901760, %v5418_v31 }
 0x522   :  { %v4488_v19 = vadd.f32 %v4487_v44, %v4416_v61  ;;  %v5422_v44 = vld [vmem:[#allocation5 + $0xf0] sm:$0xff]  ;;  %v5523_v29 = vand.u32 4294901760, %v16832_v38 }
 0x523   :  { %v4563_v2 = vpop.f32.mrf.mxu0  ;;  %v4933_v60 = vpop.f32.mrf.mxu1  ;;  %v16829_v49 = vand.u32 4294901760, %v5422_v44 }
 0x524   :  { %v4640_v62 = vadd.f32 %v4639_v33, %v4563_v2  ;;  %v4938_v59 = vsel %vm42_vm1, %v4488_v19, 0.0  ;;  %v16846_v2 = vand.u32 4294901760, %v5419_v43 }
 0x525   :  { %v14747_v42 = vpop.f32.mrf.mxu0  ;;  %v14772_v7 = vpop.f32.mrf.mxu1  ;;  %v4939_v10 = vadd.f32 %v4938_v59, %v4937_v15  ;;  %v16837_v55 = vsub.f32 %v5422_v44, %v16829_v49  ;;  %v5415_v59 = vld [vmem:[#allocation5 + $0xb8] sm:$0xff]  ;;  %v16878_v15 = vsub.f32 %v5418_v31, %v16854_v5 }
 0x526   :  { %v16868_v11 = vsub.f32 %v5419_v43, %v16846_v2  ;;  %v5412_v43 = vld [vmem:[#allocation5 + $0xa0] sm:$0xff] }
 0x527   :  { %v4713_v51 = vpop.f32.mrf.mxu0  ;;  %v5530_v42 = vand.u32 4294901760, %v16837_v55 }
 0x528   :  { %v4714_v58 = vadd.f32 %v4713_v51, %v4640_v62  ;;  %v5416_v62 = vld [vmem:[#allocation5 + $0xc0] sm:$0xff] }
 0x529   :  { %v14757_v37 = vpop.f32.mrf.mxu0 }
 0x52a   :  { %v4788_v50 = vadd.f32 %v4787_v56, %v4714_v58  ;;  %v16839_v56 = vand.u32 4294901760, %v5420_v28  ;;  %v5524_v58 = vsub.f32 %v16832_v38, %v5523_v29  ;;  %v5537_v37 = vand.u32 4294901760, %v16844_v52 }
 0x52b   :  { %v4861_v54 = vpop.f32.mrf.mxu0 }
 0x52c   :  { %v4862_v63 = vadd.f32 %v4861_v54, %v4788_v50  ;;  %v16852_v7 = vsub.f32 %v5420_v28, %v16839_v56  ;;  %v16871_v54 = vand.u32 4294901760, %v5416_v62  ;;  %v18436_v28 = vand.u32 4294901760, %v16878_v15 }
 0x52d   :  { %v14767_v1 = vpop.f32.mrf.mxu0 }
 0x52e   :  { %v4934_v20 = vadd.f32 %v4933_v60, %v4862_v63  ;;  %v5417_v60 = vld [vmem:[#allocation5 + $0xc8] sm:$0xff]  ;;  %v5531_v63 = vsub.f32 %v16837_v55, %v5530_v42  ;;  %v5544_v1 = vand.u32 4294901760, %v16852_v7  ;;  %v16894_v44 = vsub.f32 %v5416_v62, %v16871_v54 }
 0x52f   :  { %v16858_v19 = vand.u32 4294901760, %v5417_v60 }
 0x530   :  { %v4940_v4 = vsel %vm42_vm1, %v4934_v20, 0.0  ;;  %v18437_v62 = vand.u32 4294901760, %v16894_v44 }
 0x531   :  { %v4941_v34 = vadd.f32 %v4940_v4, %v4939_v10  ;;  %v16881_v10 = vsub.f32 %v5417_v60, %v16858_v19  ;;  %v5414_v4 = vld [vmem:[#allocation5 + $0xb0] sm:$0xff]  ;;  %v16911_v60 = vand.u32 4294901760, %v5413_v48 }
 0x533   :  { %v4947_v36 = vadd.f32 %v13478_v21, %v4941_v34  ;;  %v5525_v21 = vand.u32 4294901760, %v5524_v58  ;;  %v5538_v34 = vsub.f32 %v16844_v52, %v5537_v37  ;;  %v5411_v58 = vld [vmem:[#allocation5 + $0x98] sm:$0xff] }
 0x535   :  { %v4949_v40 = vmul.f32 0.70710677, %v4947_v36  ;;  %v4948_v33 = vmul.f32 0.5, %v4947_v36  ;;  %v18440_v36 = vand.u32 4294901760, %v16868_v11 }
 0x537   :  { %15906 = verf.f32 %v4949_v40  ;;  %v16890_v40 = vand.u32 4294901760, %v5415_v59  ;;  %v5552_v31 = vsub.f32 %v16868_v11, %v18440_v36 }
 0x544   :  { %v15907_v57 = vpop.eup %15906 }
 0x545   :  { %v4951_v35 = vadd.f32 1.0, %v15907_v57  ;;  %v5545_v57 = vsub.f32 %v16852_v7, %v5544_v1 }
 0x547   :  { %v4952_v39 = vmul.f32 %v4951_v35, %v4948_v33  ;;  %v16900_v33 = vand.u32 4294901760, %v5414_v4  ;;  %v18435_v35 = vand.u32 4294901760, %v16881_v10 }
 0x549   :  { %v4960_v45 = vsel %vm42_vm1, %v4952_v39, 0  ;;  %v5539_v39 = vand.u32 4294901760, %v5538_v34  ;;  %v5410_v34 = vld [vmem:[#allocation5 + $0x90] sm:$0xff] }
 0x54a   :  { %v16848_v61 = vand.u32 4294901760, %v4960_v45 }
 0x54c   :  { %v5029_v51 = vsub.f32 %v4960_v45, %v16848_v61  ;;  %14781 = vmatmul.mubr.f32.vlgmr.msra.gmra.mxu1 %v16848_v61  ;;  %v16909_v45 = vsub.f32 %v5415_v59, %v16890_v40  ;;  %v16922_v59 = vsub.f32 %v5414_v4, %v16900_v33  ;;  %v16934_v4 = vsub.f32 %v5413_v48, %v16911_v60 }
 0x54d   :  { %14789 = vmatpush3.msra.mxu1 %v16812_v41  ;;  %14790 = vmatprep.mubr.msk.f32.mxu1 %vm15989_vm0, %v15988_v0 }
 0x54e   :  { %v5030_v50 = vand.u32 4294901760, %v5029_v51  ;;  %14798 = vmatprep.subr.mxu1 %v15988_v0 }
 0x550   :  { %14791 = vmatmul.mubr.f32.vlgmr.msra.gmra.mxu1 %v5030_v50  ;;  %v5031_v20 = vsub.f32 %v5029_v51, %v5030_v50  ;;  %v5546_v50 = vand.u32 4294901760, %v5545_v57  ;;  %v16936_v57 = vand.u32 4294901760, %v5411_v58 }
 0x551   :  { %14799 = vmatpush3.msra.mxu1 %v16812_v41  ;;  %14800 = vmatprep.mubr.msk.f32.mxu1 %vm15989_vm0, %v15988_v0  ;;  %v5532_v41 = vand.u32 4294901760, %v5531_v63  ;;  %v5559_v63 = vsub.f32 %v16878_v15, %v18436_v28  ;;  %v5408_v28 = vld [vmem:[#allocation5 + $0x80] sm:$0xff] }
 0x552   :  { %14838 = vmatprep.subr.mxu1 %v15988_v0  ;;  %v5032_v3 = vand.u32 4294901760, %v5031_v20  ;;  %v16924_v20 = vand.u32 4294901760, %v5412_v43 }
 0x554   :  { %14776 = vmatmul.mubr.f32.vlgmr.msra.gmra.mxu0 %v5032_v3  ;;  %14801 = vmatmul.mubr.f32.vlgmr.msra.gmra.mxu1 %v16848_v61  ;;  %v5553_v3 = vand.u32 4294901760, %v5552_v31  ;;  %v16947_v48 = vsub.f32 %v5412_v43, %v16924_v20  ;;  %v16949_v31 = vand.u32 4294901760, %v5410_v34  ;;  %v16959_v43 = vsub.f32 %v5411_v58, %v16936_v57 }
 0x555   :  { %14839 = vmatpush3.msra.mxu1 %v5525_v21  ;;  %14784 = vmatpush3.msra.mxu0 %v16815_v47  ;;  %v5566_v21 = vsub.f32 %v16881_v10, %v18435_v35  ;;  %v5560_v47 = vand.u32 4294901760, %v5559_v63  ;;  %v18441_v63 = vand.u32 4294901760, %v16934_v4  ;;  %v16973_v58 = vand.u32 4294901760, %v5408_v28 }
 0x556   :  { %14840 = vmatprep.subr.mxu1 %v15988_v0  ;;  %14785 = vmatprep.mubr.msk.f32.mxu0 %vm15989_vm0, %v15988_v0 }
 0x557   :  { %14841 = vmatpush3.msra.mxu1 %v5532_v41  ;;  %14793 = vmatprep.subr.mxu0 %v15988_v0  ;;  %v18438_v41 = vand.u32 4294901760, %v16909_v45  ;;  %v5567_v35 = vand.u32 4294901760, %v5566_v21 }
 0x558   :  { %14842 = vmatprep.subr.mxu1 %v15988_v0  ;;  %14786 = vmatmul.mubr.f32.vlgmr.msra.gmra.mxu0 %v5029_v51  ;;  %v5573_v51 = vsub.f32 %v16894_v44, %v18437_v62 }
 0x559   :  { %14843 = vmatpush3.msra.mxu1 %v5539_v39  ;;  %14794 = vmatpush3.msra.mxu0 %v5071_v6  ;;  %v5409_v39 = vld [vmem:[#allocation5 + $0x88] sm:$0xff]  ;;  %v18439_v6 = vand.u32 4294901760, %v16922_v59 }
 0x55a   :  { %14844 = vmatprep.subr.mxu1 %v15988_v0  ;;  %14795 = vmatprep.mubr.msk.f32.mxu0 %vm15989_vm0, %v15988_v0  ;;  %v16961_v62 = vand.u32 4294901760, %v5409_v39 }
 0x55b   :  { %14845 = vmatpush3.msra.mxu1 %v5546_v50  ;;  %14803 = vmatprep.subr.mxu0 %v15988_v0  ;;  %v5580_v50 = vsub.f32 %v16909_v45, %v18438_v41  ;;  %v5587_v21 = vsub.f32 %v16922_v59, %v18439_v6  ;;  %v16971_v41 = vsub.f32 %v5410_v34, %v16949_v31  ;;  %v18443_v6 = vand.u32 4294901760, %v16959_v43 }
 0x55c   :  { %14846 = vmatprep.subr.mxu1 %v15988_v0  ;;  %14796 = vmatmul.mubr.f32.vlgmr.msra.gmra.mxu0 %v16848_v61  ;;  %v5574_v61 = vand.u32 4294901760, %v5573_v51  ;;  %v16983_v36 = vsub.f32 %v5409_v39, %v16961_v62 }
 0x55d   :  { %14804 = vmatpush3.msra.mxu0 %v16827_v30  ;;  %14847 = vmatpush3.msra.mxu1 %v5553_v3  ;;  %v18442_v3 = vand.u32 4294901760, %v16947_v48  ;;  %v5581_v51 = vand.u32 4294901760, %v5580_v50  ;;  %v5588_v34 = vand.u32 4294901760, %v5587_v21  ;;  %v5614_v50 = vand.u32 4294901760, %v16971_v41 }
 0x55e   :  { %14805 = vmatprep.subr.mxu0 %v15988_v0  ;;  %14848 = vmatprep.subr.mxu1 %v15988_v0  ;;  %v5621_v21 = vand.u32 4294901760, %v16983_v36 }
 0x55f   :  { %14806 = vmatpush3.msra.mxu0 %v16829_v49  ;;  %14849 = vmatpush3.msra.mxu1 %v5560_v47  ;;  %v5594_v47 = vsub.f32 %v16934_v4, %v18441_v63  ;;  %v16993_v63 = vsub.f32 %v5408_v28, %v16973_v58 }
 0x560   :  { %14807 = vmatprep.subr.mxu0 %v15988_v0  ;;  %14850 = vmatprep.subr.mxu1 %v15988_v0 }
 0x561   :  { %14808 = vmatpush3.msra.mxu0 %v16834_v26  ;;  %14851 = vmatpush3.msra.mxu1 %v5567_v35  ;;  %v5601_v35 = vsub.f32 %v16947_v48, %v18442_v3  ;;  %v5595_v39 = vand.u32 4294901760, %v5594_v47  ;;  %v5615_v3 = vsub.f32 %v16971_v41, %v5614_v50 }
 0x562   :  { %14809 = vmatprep.subr.mxu0 %v15988_v0  ;;  %14852 = vmatprep.subr.mxu1 %v15988_v0 }
 0x563   :  { %14810 = vmatpush3.msra.mxu0 %v16839_v56  ;;  %14853 = vmatpush3.msra.mxu1 %v5574_v61  ;;  %v5608_v61 = vsub.f32 %v16959_v43, %v18443_v6  ;;  %v5602_v28 = vand.u32 4294901760, %v5601_v35  ;;  %v5622_v6 = vsub.f32 %v16983_v36, %v5621_v21 }
 0x564   :  { %14811 = vmatprep.subr.mxu0 %v15988_v0  ;;  %14854 = vmatprep.subr.mxu1 %v15988_v0 }
 0x565   :  { %14812 = vmatpush3.msra.mxu0 %v16846_v2  ;;  %14855 = vmatpush3.msra.mxu1 %v5581_v51  ;;  %v5628_v51 = vand.u32 4294901760, %v16993_v63  ;;  %v5609_v47 = vand.u32 4294901760, %v5608_v61 }
 0x566   :  { %14813 = vmatprep.subr.mxu0 %v15988_v0  ;;  %14856 = vmatprep.subr.mxu1 %v15988_v0 }
 0x567   :  { %14814 = vmatpush3.msra.mxu0 %v16854_v5  ;;  %14857 = vmatpush3.msra.mxu1 %v5588_v34  ;;  %v5616_v34 = vand.u32 4294901760, %v5615_v3  ;;  %v5629_v35 = vsub.f32 %v16993_v63, %v5628_v51 }
 0x568   :  { %14815 = vmatprep.subr.mxu0 %v15988_v0  ;;  %14858 = vmatprep.subr.mxu1 %v15988_v0 }
 0x569   :  { %14816 = vmatpush3.msra.mxu0 %v16858_v19  ;;  %14859 = vmatpush3.msra.mxu1 %v5595_v39  ;;  %v5623_v39 = vand.u32 4294901760, %v5622_v6  ;;  %v5630_v3 = vand.u32 4294901760, %v5629_v35 }
 0x56a   :  { %14817 = vmatprep.subr.mxu0 %v15988_v0  ;;  %14860 = vmatprep.subr.mxu1 %v15988_v0 }
 0x56b   :  { %14818 = vmatpush3.msra.mxu0 %v16871_v54  ;;  %14861 = vmatpush3.msra.mxu1 %v5602_v28 }
 0x56c   :  { %14819 = vmatprep.subr.mxu0 %v15988_v0  ;;  %14862 = vmatprep.subr.mxu1 %v15988_v0 }
 0x56d   :  { %14820 = vmatpush3.msra.mxu0 %v16890_v40  ;;  %14863 = vmatpush3.msra.mxu1 %v5609_v47 }
 0x56e   :  { %14821 = vmatprep.subr.mxu0 %v15988_v0  ;;  %14864 = vmatprep.subr.mxu1 %v15988_v0 }
 0x56f   :  { %14822 = vmatpush3.msra.mxu0 %v16900_v33  ;;  %14865 = vmatpush3.msra.mxu1 %v5616_v34 }
 0x570   :  { %14823 = vmatprep.subr.mxu0 %v15988_v0  ;;  %14866 = vmatprep.subr.mxu1 %v15988_v0 }
 0x571   :  { %14824 = vmatpush3.msra.mxu0 %v16911_v60  ;;  %14867 = vmatpush3.msra.mxu1 %v5623_v39 }
 0x572   :  { %14825 = vmatprep.subr.mxu0 %v15988_v0  ;;  %14868 = vmatprep.subr.mxu1 %v15988_v0 }
 0x573   :  { %14826 = vmatpush3.msra.mxu0 %v16924_v20  ;;  %14869 = vmatpush3.msra.mxu1 %v5630_v3 }
 0x574   :  { %14870 = vmatprep.mubr.msk.f32.mxu1 %vm15989_vm0, %v15988_v0  ;;  %14827 = vmatprep.subr.mxu0 %v15988_v0 }
 0x575   :  { %14871 = vmatmul.mubr.f32.vlgmr.msra.gmra.mxu1 %v16633_v23  ;;  %14908 = vmatprep.subr.mxu1 %v15988_v0 }
 0x576   :  { %14828 = vmatpush3.msra.mxu0 %v16936_v57  ;;  %14909 = vmatpush3.msra.mxu1 %v16827_v30 }
 0x577   :  { %14829 = vmatprep.subr.mxu0 %v15988_v0  ;;  %14910 = vmatprep.subr.mxu1 %v15988_v0 }
 0x578   :  { %14830 = vmatpush3.msra.mxu0 %v16949_v31  ;;  %14911 = vmatpush3.msra.mxu1 %v16829_v49 }
 0x579   :  { %14831 = vmatprep.subr.mxu0 %v15988_v0  ;;  %14912 = vmatprep.subr.mxu1 %v15988_v0 }
 0x57a   :  { %14832 = vmatpush3.msra.mxu0 %v16961_v62  ;;  %14913 = vmatpush3.msra.mxu1 %v16834_v26 }
 0x57b   :  { %14833 = vmatprep.subr.mxu0 %v15988_v0  ;;  %14914 = vmatprep.subr.mxu1 %v15988_v0 }
 0x57c   :  { %14834 = vmatpush3.msra.mxu0 %v16973_v58  ;;  %14835 = vmatprep.mubr.msk.f32.mxu0 %vm15989_vm0, %v15988_v0 }
 0x57d   :  { %14915 = vmatpush3.msra.mxu1 %v16839_v56  ;;  %14836 = vmatmul.mubr.f32.vlgmr.msra.gmra.mxu0 %v16653_v53  ;;  %v18464_v53 = vand.u32 4294901760, %v16881_v10 }
 0x57e   :  { %14873 = vmatprep.subr.mxu0 %v15988_v0  ;;  %14916 = vmatprep.subr.mxu1 %v15988_v0 }
 0x57f   :  { %14874 = vmatpush3.msra.mxu0 %v16832_v38  ;;  %14917 = vmatpush3.msra.mxu1 %v16846_v2  ;;  %v18467_v38 = vand.u32 4294901760, %v16922_v59 }
 0x580   :  { %14875 = vmatprep.subr.mxu0 %v15988_v0  ;;  %14918 = vmatprep.subr.mxu1 %v15988_v0 }
 0x581   :  { %14876 = vmatpush3.msra.mxu0 %v16837_v55  ;;  %14919 = vmatpush3.msra.mxu1 %v16854_v5  ;;  %v18469_v55 = vand.u32 4294901760, %v16947_v48 }
 0x582   :  { %14877 = vmatprep.subr.mxu0 %v15988_v0  ;;  %14920 = vmatprep.subr.mxu1 %v15988_v0 }
 0x583   :  { %14878 = vmatpush3.msra.mxu0 %v16844_v52  ;;  %14921 = vmatpush3.msra.mxu1 %v16858_v19 }
 0x584   :  { %14879 = vmatprep.subr.mxu0 %v15988_v0  ;;  %14922 = vmatprep.subr.mxu1 %v15988_v0 }
 0x585   :  { %14880 = vmatpush3.msra.mxu0 %v16852_v7  ;;  %14923 = vmatpush3.msra.mxu1 %v16871_v54  ;;  %v13479_v7 = vld [vmem:[#allocation5 + $0x2b9] ss:$0 sm:$0xff] }
 0x586   :  { %14881 = vmatprep.subr.mxu0 %v15988_v0  ;;  %14924 = vmatprep.subr.mxu1 %v15988_v0 }
 0x587   :  { %14882 = vmatpush3.msra.mxu0 %v16868_v11  ;;  %14925 = vmatpush3.msra.mxu1 %v16890_v40 }
 0x588   :  { %14883 = vmatprep.subr.mxu0 %v15988_v0  ;;  %14926 = vmatprep.subr.mxu1 %v15988_v0 }
 0x589   :  { %14884 = vmatpush3.msra.mxu0 %v16878_v15  ;;  %14927 = vmatpush3.msra.mxu1 %v16900_v33 }
 0x58a   :  { %14885 = vmatprep.subr.mxu0 %v15988_v0  ;;  %14928 = vmatprep.subr.mxu1 %v15988_v0 }
 0x58b   :  { %14886 = vmatpush3.msra.mxu0 %v16881_v10  ;;  %14929 = vmatpush3.msra.mxu1 %v16911_v60 }
 0x58c   :  { %14887 = vmatprep.subr.mxu0 %v15988_v0  ;;  %14930 = vmatprep.subr.mxu1 %v15988_v0 }
 0x58d   :  { %14888 = vmatpush3.msra.mxu0 %v16894_v44  ;;  %14931 = vmatpush3.msra.mxu1 %v16924_v20 }
 0x58e   :  { %14889 = vmatprep.subr.mxu0 %v15988_v0  ;;  %14932 = vmatprep.subr.mxu1 %v15988_v0 }
 0x58f   :  { %14890 = vmatpush3.msra.mxu0 %v16909_v45  ;;  %14933 = vmatpush3.msra.mxu1 %v16936_v57 }
 0x590   :  { %14891 = vmatprep.subr.mxu0 %v15988_v0  ;;  %14934 = vmatprep.subr.mxu1 %v15988_v0 }
 0x591   :  { %14892 = vmatpush3.msra.mxu0 %v16922_v59  ;;  %14935 = vmatpush3.msra.mxu1 %v16949_v31 }
 0x592   :  { %14893 = vmatprep.subr.mxu0 %v15988_v0  ;;  %14936 = vmatprep.subr.mxu1 %v15988_v0 }
 0x593   :  { %14894 = vmatpush3.msra.mxu0 %v16934_v4  ;;  %14937 = vmatpush3.msra.mxu1 %v16961_v62 }
 0x594   :  { %14895 = vmatprep.subr.mxu0 %v15988_v0  ;;  %14938 = vmatprep.subr.mxu1 %v15988_v0 }
 0x595   :  { %14896 = vmatpush3.msra.mxu0 %v16947_v48  ;;  %14939 = vmatpush3.msra.mxu1 %v16973_v58  ;;  %v13480_v48 = vld [vmem:[#allocation5 + $0x2bd] ss:$0 sm:$0xff] }
 0x596   :  { %14940 = vmatprep.mubr.msk.f32.mxu1 %vm15989_vm0, %v15988_v0  ;;  %14897 = vmatprep.subr.mxu0 %v15988_v0 }
 0x597   :  { %14941 = vmatmul.mubr.f32.vlgmr.msra.gmra.mxu1 %v16645_v46  ;;  %14978 = vmatprep.subr.mxu1 %v15988_v0  ;;  %v18463_v46 = vand.u32 4294901760, %v16878_v15 }
 0x598   :  { %14898 = vmatpush3.msra.mxu0 %v16959_v43  ;;  %14979 = vmatpush3.msra.mxu1 %v16827_v30  ;;  %v18465_v30 = vand.u32 4294901760, %v16894_v44 }
 0x599   :  { %14899 = vmatprep.subr.mxu0 %v15988_v0  ;;  %14980 = vmatprep.subr.mxu1 %v15988_v0 }
 0x59a   :  { %14900 = vmatpush3.msra.mxu0 %v16971_v41  ;;  %14981 = vmatpush3.msra.mxu1 %v16829_v49  ;;  %v18466_v49 = vand.u32 4294901760, %v16909_v45 }
 0x59b   :  { %14901 = vmatprep.subr.mxu0 %v15988_v0  ;;  %14982 = vmatprep.subr.mxu1 %v15988_v0 }
 0x59c   :  { %14902 = vmatpush3.msra.mxu0 %v16983_v36  ;;  %14983 = vmatpush3.msra.mxu1 %v16834_v26  ;;  %v18468_v26 = vand.u32 4294901760, %v16934_v4 }
 0x59d   :  { %14903 = vmatprep.subr.mxu0 %v15988_v0  ;;  %14984 = vmatprep.subr.mxu1 %v15988_v0 }
 0x59e   :  { %14904 = vmatpush3.msra.mxu0 %v16993_v63  ;;  %14905 = vmatprep.mubr.msk.f32.mxu0 %vm15989_vm0, %v15988_v0 }
 0x59f   :  { %14985 = vmatpush3.msra.mxu1 %v16839_v56  ;;  %14906 = vmatmul.mubr.f32.vlgmr.msra.gmra.mxu0 %v16637_v32  ;;  %v18462_v32 = vand.u32 4294901760, %v16868_v11  ;;  %v18470_v56 = vand.u32 4294901760, %v16959_v43 }
 0x5a0   :  { %14943 = vmatprep.subr.mxu0 %v15988_v0  ;;  %14986 = vmatprep.subr.mxu1 %v15988_v0 }
 0x5a1   :  { %14944 = vmatpush3.msra.mxu0 %v5523_v29  ;;  %14987 = vmatpush3.msra.mxu1 %v16846_v2 }
 0x5a2   :  { %14945 = vmatprep.subr.mxu0 %v15988_v0  ;;  %14988 = vmatprep.subr.mxu1 %v15988_v0 }
 0x5a3   :  { %14946 = vmatpush3.msra.mxu0 %v5530_v42  ;;  %14989 = vmatpush3.msra.mxu1 %v16854_v5 }
 0x5a4   :  { %14947 = vmatprep.subr.mxu0 %v15988_v0  ;;  %14990 = vmatprep.subr.mxu1 %v15988_v0 }
 0x5a5   :  { %14948 = vmatpush3.msra.mxu0 %v5537_v37  ;;  %14991 = vmatpush3.msra.mxu1 %v16858_v19 }
 0x5a6   :  { %14949 = vmatprep.subr.mxu0 %v15988_v0  ;;  %14992 = vmatprep.subr.mxu1 %v15988_v0 }
 0x5a7   :  { %14950 = vmatpush3.msra.mxu0 %v5544_v1  ;;  %14993 = vmatpush3.msra.mxu1 %v16871_v54 }
 0x5a8   :  { %14951 = vmatprep.subr.mxu0 %v15988_v0  ;;  %14994 = vmatprep.subr.mxu1 %v15988_v0 }
 0x5a9   :  { %14952 = vmatpush3.msra.mxu0 %v18462_v32  ;;  %14995 = vmatpush3.msra.mxu1 %v16890_v40 }
 0x5aa   :  { %14953 = vmatprep.subr.mxu0 %v15988_v0  ;;  %14996 = vmatprep.subr.mxu1 %v15988_v0 }
 0x5ab   :  { %14954 = vmatpush3.msra.mxu0 %v18463_v46  ;;  %14997 = vmatpush3.msra.mxu1 %v16900_v33 }
 0x5ac   :  { %14955 = vmatprep.subr.mxu0 %v15988_v0  ;;  %14998 = vmatprep.subr.mxu1 %v15988_v0 }
 0x5ad   :  { %14956 = vmatpush3.msra.mxu0 %v18464_v53  ;;  %14999 = vmatpush3.msra.mxu1 %v16911_v60 }
 0x5ae   :  { %14957 = vmatprep.subr.mxu0 %v15988_v0  ;;  %15000 = vmatprep.subr.mxu1 %v15988_v0 }
 0x5af   :  { %14958 = vmatpush3.msra.mxu0 %v18465_v30  ;;  %15001 = vmatpush3.msra.mxu1 %v16924_v20 }
 0x5b0   :  { %14959 = vmatprep.subr.mxu0 %v15988_v0  ;;  %15002 = vmatprep.subr.mxu1 %v15988_v0 }
 0x5b1   :  { %14960 = vmatpush3.msra.mxu0 %v18466_v49  ;;  %15003 = vmatpush3.msra.mxu1 %v16936_v57 }
 0x5b2   :  { %14961 = vmatprep.subr.mxu0 %v15988_v0  ;;  %15004 = vmatprep.subr.mxu1 %v15988_v0 }
 0x5b3   :  { %14962 = vmatpush3.msra.mxu0 %v18467_v38  ;;  %15005 = vmatpush3.msra.mxu1 %v16949_v31 }
 0x5b4   :  { %14963 = vmatprep.subr.mxu0 %v15988_v0  ;;  %15006 = vmatprep.subr.mxu1 %v15988_v0 }
 0x5b5   :  { %14964 = vmatpush3.msra.mxu0 %v18468_v26  ;;  %15007 = vmatpush3.msra.mxu1 %v16961_v62 }
 0x5b6   :  { %14965 = vmatprep.subr.mxu0 %v15988_v0  ;;  %15008 = vmatprep.subr.mxu1 %v15988_v0 }
 0x5b7   :  { %14966 = vmatpush3.msra.mxu0 %v18469_v55  ;;  %15009 = vmatpush3.msra.mxu1 %v16973_v58  ;;  %v6608_v55 = vld [vmem:[#allocation5 + $0x230] sm:$0xff] }
 0x5b8   :  { %15010 = vmatprep.mubr.msk.f32.mxu1 %vm15989_vm0, %v15988_v0  ;;  %14967 = vmatprep.subr.mxu0 %v15988_v0 }
 0x5b9   :  { %15011 = vmatmul.mubr.f32.vlgmr.msra.gmra.mxu1 %v16633_v23  ;;  %14968 = vmatpush3.msra.mxu0 %v18470_v56  ;;  %v17287_v56 = vand.u32 4294901760, %v6608_v55 }
 0x5ba   :  { %14969 = vmatprep.subr.mxu0 %v15988_v0  ;;  %14975 = vmatprep.mubr.msk.f32.mxu0 %vm15989_vm0, %v15988_v0 }
 0x5bb   :  { %14970 = vmatpush3.msra.mxu0 %v5614_v50  ;;  %15024 = vmatprep.subr.mxu1 %v15988_v0 }
 0x5bc   :  { %14971 = vmatprep.subr.mxu0 %v15988_v0  ;;  %15026 = vmatprep.mubr.msk.f32.mxu1 %vm15989_vm0, %v15988_v0 }
 0x5bd   :  { %14972 = vmatpush3.msra.mxu0 %v5621_v21 }
 0x5be   :  { %14973 = vmatprep.subr.mxu0 %v15988_v0 }
 0x5bf   :  { %14974 = vmatpush3.msra.mxu0 %v5628_v51 }
 0x5c0   :  { %14976 = vmatmul.mubr.f32.vlgmr.msra.gmra.mxu0 %v16633_v23  ;;  %15013 = vmatprep.subr.mxu0 %v15988_v0 }
 0x5c1   :  { %15015 = vmatprep.mubr.msk.f32.mxu0 %vm15989_vm0, %v15988_v0 }
 0x60c   :  { %v5110_v29 = vpop.f32.mrf.mxu1 }
 0x60e   :  { %v14782_v52 = vpop.f32.mrf.mxu1 }
 0x610   :  { %v5258_v2 = vpop.f32.mrf.mxu1 }
 0x612   :  { %v14792_v42 = vpop.f32.mrf.mxu1 }
 0x614   :  { %v5034_v5 = vpop.f32.mrf.mxu0  ;;  %v5404_v19 = vpop.f32.mrf.mxu1 }
 0x615   :  { %v5035_v37 = vadd.f32 %v13479_v7, %v5034_v5 }
 0x616   :  { %v14777_v11 = vpop.f32.mrf.mxu0  ;;  %v14802_v54 = vpop.f32.mrf.mxu1 }
 0x617   :  { %v5111_v1 = vadd.f32 %v5110_v29, %v5035_v37  ;;  %v17290_v29 = vsub.f32 %v6608_v55, %v17287_v56 }
 0x618   :  { %v5184_v15 = vpop.f32.mrf.mxu0 }
 0x619   :  { %v5185_v10 = vadd.f32 %v5184_v15, %v5111_v1  ;;  %v6720_v52 = vand.u32 4294901760, %v17290_v29 }
 0x61a   :  { %v14787_v36 = vpop.f32.mrf.mxu0 }
 0x61b   :  { %v5259_v23 = vadd.f32 %v5258_v2, %v5185_v10  ;;  %v6721_v2 = vsub.f32 %v17290_v29, %v6720_v52 }
 0x61c   :  { %v5332_v40 = vpop.f32.mrf.mxu0 }
 0x61d   :  { %v5333_v44 = vadd.f32 %v5332_v40, %v5259_v23  ;;  %v6722_v42 = vand.u32 4294901760, %v6721_v2 }
 0x61e   :  { %v14797_v33 = vpop.f32.mrf.mxu0 }
 0x61f   :  { %v5405_v45 = vadd.f32 %v5404_v19, %v5333_v44 }
 0x635   :  { %v5667_v60 = vpop.f32.mrf.mxu1 }
 0x637   :  { %v14872_v62 = vpop.f32.mrf.mxu1 }
 0x63d   :  { %v5516_v59 = vpop.f32.mrf.mxu0 }
 0x63e   :  { %v5517_v31 = vadd.f32 %v13480_v48, %v5516_v59 }
 0x63f   :  { %v14837_v20 = vpop.f32.mrf.mxu0 }
 0x640   :  { %v5668_v63 = vadd.f32 %v5667_v60, %v5517_v31 }
 0x657   :  { %v5860_v41 = vpop.f32.mrf.mxu1 }
 0x659   :  { %v14942_v4 = vpop.f32.mrf.mxu1 }
 0x65a   :  { %v6609_v4 = vld [vmem:[#allocation5 + $0x238] sm:$0xff] }
 0x65f   :  { %v5771_v57 = vpop.f32.mrf.mxu0 }
 0x660   :  { %v5772_v58 = vadd.f32 %v5771_v57, %v5668_v63 }
 0x661   :  { %v14907_v6 = vpop.f32.mrf.mxu0 }
 0x662   :  { %v5861_v61 = vadd.f32 %v5860_v41, %v5772_v58 }
 0x679   :  { %v6066_v43 = vpop.f32.mrf.mxu1 }
 0x67b   :  { %v15012_v50 = vpop.f32.mrf.mxu1 }
 0x680   :  { %v5979_v21 = vpop.f32.mrf.mxu0 }
 0x681   :  { %v5980_v28 = vadd.f32 %v5979_v21, %v5861_v61 }
 0x682   :  { %v14977_v51 = vpop.f32.mrf.mxu0 }
 0x683   :  { %v6067_v47 = vadd.f32 %v6066_v43, %v5980_v28  ;;  %v17299_v43 = vand.u32 4294901760, %v6609_v4 }
 0x685   :  { %v6070_v34 = vadd.f32 %v6067_v47, %v5405_v45 }
 0x687   :  { %v6072_v35 = vmul.f32 0.70710677, %v6070_v34  ;;  %v6071_v3 = vmul.f32 0.5, %v6070_v34  ;;  %v17302_v34 = vsub.f32 %v6609_v4, %v17299_v43 }
 0x689   :  { %15908 = verf.f32 %v6072_v35  ;;  %v7166_v2 = vand.u32 4294901760, %v17302_v34 }
 0x696   :  { %v15909_v39 = vpop.eup %15908 }
 0x697   :  { %v6074_v32 = vadd.f32 1.0, %v15909_v39 }
 0x699   :  { %v6075_v46 = vmul.f32 %v6074_v32, %v6071_v3 }
 0x69b   :  { %v17209_v53 = vand.u32 4294901760, %v6075_v46 }
 0x69d   :  { %15014 = vmatpush3.msra.mxu0 %v17209_v53  ;;  %v17213_v30 = vsub.f32 %v6075_v46, %v17209_v53 }
 0x69e   :  { %15016 = vmatmul.mubr.f32.vlgmr.msra.gmra.mxu0 %v16063_v24  ;;  %15035 = vmatprep.subr.mxu0 %v15988_v0 }
 0x69f   :  { %15036 = vmatpush3.msra.mxu0 %v17213_v30  ;;  %15018 = vmatprep.mubr.msk.f32.mxu0 %vm15989_vm0, %v15988_v0  ;;  %v17221_v49 = vand.u32 4294901760, %v17213_v30 }
 0x6a0   :  { %15057 = vmatprep.subr.mxu0 %v15988_v0 }
 0x6a1   :  { %v6206_v38 = vsub.f32 %v17213_v30, %v17221_v49 }
 0x6a2   :  { %15019 = vmatmul.mubr.f32.gmra.mxu0 %v16068_v25 }
 0x6a3   :  { %15021 = vmatprep.mubr.msk.f32.mxu0 %vm15989_vm0, %v15988_v0  ;;  %v17229_v26 = vand.u32 4294901760, %v6206_v38 }
 0x6a5   :  { %15025 = vmatpush3.msra.mxu1 %v17229_v26 }
 0x6a6   :  { %15022 = vmatmul.mubr.f32.gmra.mxu0 %v16082_v27  ;;  %15027 = vmatmul.mubr.f32.vlgmr.msra.gmra.mxu1 %v16022_v8 }
 0x6a7   :  { %15046 = vmatprep.subr.mxu1 %v15988_v0  ;;  %15029 = vmatprep.mubr.msk.f32.mxu1 %vm15989_vm0, %v15988_v0 }
 0x6a8   :  { %15047 = vmatpush3.msra.mxu1 %v17209_v53  ;;  %15037 = vmatprep.mubr.msk.f32.mxu0 %vm15989_vm0, %v15988_v0 }
 0x6a9   :  { %15068 = vmatprep.subr.mxu1 %v15988_v0 }
 0x6aa   :  { %15030 = vmatmul.mubr.f32.gmra.mxu1 %v16024_v9  ;;  %15038 = vmatmul.mubr.f32.vlgmr.msra.gmra.mxu0 %v16034_v13 }
 0x6ab   :  { %15058 = vmatpush3.msra.mxu0 %v17221_v49  ;;  %15032 = vmatprep.mubr.msk.f32.mxu1 %vm15989_vm0, %v15988_v0 }
 0x6ac   :  { %15040 = vmatprep.mubr.msk.f32.mxu0 %vm15989_vm0, %v15988_v0  ;;  %15079 = vmatprep.subr.mxu0 %v15988_v0 }
 0x6ae   :  { %15033 = vmatmul.mubr.f32.gmra.mxu1 %v16031_v12  ;;  %15041 = vmatmul.mubr.f32.gmra.mxu0 %v16038_v14 }
 0x6af   :  { %15043 = vmatprep.mubr.msk.f32.mxu0 %vm15989_vm0, %v15988_v0  ;;  %15048 = vmatprep.mubr.msk.f32.mxu1 %vm15989_vm0, %v15988_v0 }
 0x6b2   :  { %15044 = vmatmul.mubr.f32.gmra.mxu0 %v16044_v16  ;;  %15049 = vmatmul.mubr.f32.vlgmr.msra.gmra.mxu1 %v16047_v17 }
 0x6b3   :  { %15069 = vmatpush3.msra.mxu1 %v17209_v53  ;;  %15051 = vmatprep.mubr.msk.f32.mxu1 %vm15989_vm0, %v15988_v0 }
 0x6b4   :  { %15059 = vmatprep.mubr.msk.f32.mxu0 %vm15989_vm0, %v15988_v0  ;;  %15084 = vmatprep.subr.mxu1 %v15988_v0 }
 0x6b6   :  { %15052 = vmatmul.mubr.f32.gmra.mxu1 %v16050_v18  ;;  %15060 = vmatmul.mubr.f32.vlgmr.msra.gmra.mxu0 %v16022_v8 }
 0x6b7   :  { %15054 = vmatprep.mubr.msk.f32.mxu1 %vm15989_vm0, %v15988_v0  ;;  %15062 = vmatprep.mubr.msk.f32.mxu0 %vm15989_vm0, %v15988_v0 }
 0x6b8   :  { %15080 = vmatpush3.xpose.msra.mxu0 %v17287_v56 }
 0x6b9   :  { %15089 = vmatprep.subr.mxu0 %v15988_v0 }
 0x6ba   :  { %15055 = vmatmul.mubr.f32.gmra.mxu1 %v16059_v22  ;;  %15063 = vmatmul.mubr.f32.gmra.mxu0 %v16024_v9 }
 0x6bb   :  { %15065 = vmatprep.mubr.msk.f32.mxu0 %vm15989_vm0, %v15988_v0  ;;  %15070 = vmatprep.mubr.msk.f32.mxu1 %vm15989_vm0, %v15988_v0 }
 0x6be   :  { %15066 = vmatmul.mubr.f32.gmra.mxu0 %v16031_v12  ;;  %15071 = vmatmul.mubr.f32.vlgmr.msra.gmra.mxu1 %v16022_v8 }
 0x6bf   :  { %15073 = vmatprep.mubr.msk.f32.mxu1 %vm15989_vm0, %v15988_v0  ;;  %15081 = vmatprep.mubr.msk.f32.mxu0 %vm15989_vm0, %v15988_v0 }
 0x6c0   :  { %15085 = vmatpush3.xpose.msra.mxu1 %v6722_v42 }
 0x6c1   :  { %15094 = vmatprep.subr.mxu1 %v15988_v0 }
 0x6c2   :  { %15074 = vmatmul.mubr.f32.gmra.mxu1 %v16024_v9 }
 0x6c3   :  { %15076 = vmatprep.mubr.msk.f32.mxu1 %vm15989_vm0, %v15988_v0 }
 0x6c6   :  { %15077 = vmatmul.mubr.f32.gmra.mxu1 %v16031_v12 }
 0x6c7   :  { %15086 = vmatprep.mubr.msk.f32.mxu1 %vm15989_vm0, %v15988_v0 }
 0x75e   :  { %v6148_v7 = vpop.f32.mrf.mxu0 }
 0x760   :  { %v15017_v5 = vpop.f32.mrf.mxu0 }
 0x762   :  { %v6158_v19 = vpop.f32.mrf.mxu0 }
 0x764   :  { %v15020_v37 = vpop.f32.mrf.mxu0 }
 0x765   :  { %v6610_v37 = vld [vmem:[#allocation5 + $0x240] sm:$0xff] }
 0x766   :  { %v6168_v11 = vpop.f32.mrf.mxu0  ;;  %v6244_v54 = vpop.f32.mrf.mxu1 }
 0x767   :  { %v6245_v48 = vadd.f32 %v6244_v54, %v6148_v7 }
 0x768   :  { %v15023_v1 = vpop.f32.mrf.mxu0  ;;  %v15028_v15 = vpop.f32.mrf.mxu1 }
 0x76a   :  { %v6250_v10 = vpop.f32.mrf.mxu1  ;;  %v6330_v36 = vpop.f32.mrf.mxu0 }
 0x76b   :  { %v6331_v58 = vadd.f32 %v6330_v36, %v6245_v48  ;;  %v6251_v21 = vadd.f32 %v6250_v10, %v6158_v19  ;;  %v7167_v10 = vsub.f32 %v17302_v34, %v7166_v2  ;;  %v17311_v36 = vand.u32 4294901760, %v6610_v37 }
 0x76c   :  { %v15031_v23 = vpop.f32.mrf.mxu1  ;;  %v15039_v40 = vpop.f32.mrf.mxu0 }
 0x76d   :  { %v17320_v4 = vsub.f32 %v6610_v37, %v17311_v36 }
 0x76e   :  { %v6256_v44 = vpop.f32.mrf.mxu1  ;;  %v6337_v33 = vpop.f32.mrf.mxu0 }
 0x76f   :  { %v6338_v35 = vadd.f32 %v6337_v33, %v6251_v21  ;;  %v6257_v23 = vadd.f32 %v6256_v44, %v6168_v11 }
 0x770   :  { %v15034_v45 = vpop.f32.mrf.mxu1  ;;  %v15042_v60 = vpop.f32.mrf.mxu0 }
 0x772   :  { %v6344_v62 = vpop.f32.mrf.mxu0  ;;  %v6418_v59 = vpop.f32.mrf.mxu1 }
 0x773   :  { %v6419_v28 = vadd.f32 %v6418_v59, %v6331_v58  ;;  %v6345_v60 = vadd.f32 %v6344_v62, %v6257_v23 }
 0x774   :  { %v15045_v20 = vpop.f32.mrf.mxu0  ;;  %v15050_v41 = vpop.f32.mrf.mxu1 }
 0x775   :  { %v7168_v20 = vand.u32 4294901760, %v7167_v10 }
 0x776   :  { %v6426_v57 = vpop.f32.mrf.mxu1  ;;  %v6508_v6 = vpop.f32.mrf.mxu0 }
 0x777   :  { %v6509_v39 = vadd.f32 %v6508_v6, %v6419_v28  ;;  %v6427_v46 = vadd.f32 %v6426_v57, %v6338_v35  ;;  %v7965_v28 = vld [vmem:[#allocation5 + $0x270] sm:$0xff] }
 0x778   :  { %v15053_v31 = vpop.f32.mrf.mxu1  ;;  %v15061_v63 = vpop.f32.mrf.mxu0 }
 0x77a   :  { %v6434_v50 = vpop.f32.mrf.mxu1  ;;  %v6514_v61 = vpop.f32.mrf.mxu0 }
 0x77b   :  { %v6515_v7 = vadd.f32 %v6514_v61, %v6427_v46  ;;  %v6435_v11 = vadd.f32 %v6434_v50, %v6345_v60 }
 0x77c   :  { %v15056_v51 = vpop.f32.mrf.mxu1  ;;  %v15064_v47 = vpop.f32.mrf.mxu0 }
 0x77d   :  { %v17388_v51 = vand.u32 4294901760, %v7965_v28 }
 0x77e   :  { %v6520_v3 = vpop.f32.mrf.mxu0  ;;  %v6592_v32 = vpop.f32.mrf.mxu1 }
 0x77f   :  { %v6593_v38 = vadd.f32 %v6592_v32, %v6509_v39  ;;  %v6521_v6 = vadd.f32 %v6520_v3, %v6435_v11  ;;  %v17391_v47 = vsub.f32 %v7965_v28, %v17388_v51 }
 0x780   :  { %v15072_v55 = vpop.f32.mrf.mxu1  ;;  %v15067_v42 = vpop.f32.mrf.mxu0 }
 0x781   :  { %v6677_v5 = vand.u32 4294901760, %v6593_v38 }
 0x782   :  { %v6598_v19 = vpop.f32.mrf.mxu1 }
 0x783   :  { %v6678_v54 = vsub.f32 %v6593_v38, %v6677_v5  ;;  %v6599_v1 = vadd.f32 %v6598_v19, %v6515_v7  ;;  %15087 = vmatmul.mubr.f32.vlgmr.msra.gmra.mxu1 %v6677_v5 }
 0x784   :  { %v15075_v15 = vpop.f32.mrf.mxu1  ;;  %15095 = vmatpush3.xpose.msra.mxu1 %v17287_v56  ;;  %15096 = vmatprep.mubr.msk.f32.mxu1 %vm15989_vm0, %v15988_v0 }
 0x785   :  { %v6679_v40 = vand.u32 4294901760, %v6678_v54  ;;  %v17313_v33 = vand.u32 4294901760, %v6599_v1  ;;  %15104 = vmatprep.subr.mxu1 %v15988_v0 }
 0x786   :  { %v6604_v45 = vpop.f32.mrf.mxu1 }
 0x787   :  { %v6680_v59 = vsub.f32 %v6678_v54, %v6679_v40  ;;  %15097 = vmatmul.mubr.f32.vlgmr.msra.gmra.mxu1 %v6679_v40  ;;  %v7124_v57 = vsub.f32 %v6599_v1, %v17313_v33  ;;  %v6605_v48 = vadd.f32 %v6604_v45, %v6521_v6 }
 0x788   :  { %15105 = vmatpush3.xpose.msra.mxu1 %v17287_v56  ;;  %15106 = vmatprep.mubr.msk.f32.mxu1 %vm15989_vm0, %v15988_v0  ;;  %v15078_v41 = vpop.f32.mrf.mxu1  ;;  %v7612_v56 = vand.u32 4294901760, %v17320_v4 }
 0x789   :  { %v6681_v44 = vand.u32 4294901760, %v6680_v59  ;;  %15114 = vmatprep.subr.mxu1 %v15988_v0  ;;  %v7125_v62 = vand.u32 4294901760, %v7124_v57  ;;  %v7569_v58 = vand.u32 4294901760, %v6605_v48 }
 0x78a   :  { %v7613_v31 = vsub.f32 %v17320_v4, %v7612_v56 }
 0x78b   :  { %15082 = vmatmul.mubr.f32.vlgmr.msra.gmra.mxu0 %v6681_v44  ;;  %15107 = vmatmul.mubr.f32.vlgmr.msra.gmra.mxu1 %v6677_v5  ;;  %v7126_v63 = vsub.f32 %v7124_v57, %v7125_v62  ;;  %v7570_v50 = vsub.f32 %v6605_v48, %v7569_v58 }
 0x78c   :  { %15090 = vmatpush3.xpose.msra.mxu0 %v17290_v29  ;;  %15115 = vmatpush3.xpose.msra.mxu1 %v7168_v20  ;;  %v7614_v29 = vand.u32 4294901760, %v7613_v31 }
 0x78d   :  { %15091 = vmatprep.mubr.msk.f32.mxu0 %vm15989_vm0, %v15988_v0  ;;  %15116 = vmatprep.mubr.msk.f32.mxu1 %vm15989_vm0, %v15988_v0 }
 0x78e   :  { %15099 = vmatprep.subr.mxu0 %v15988_v0  ;;  %15124 = vmatprep.subr.mxu1 %v15988_v0 }
 0x78f   :  { %15092 = vmatmul.mubr.f32.vlgmr.msra.gmra.mxu0 %v6678_v54  ;;  %15117 = vmatmul.mubr.f32.vlgmr.msra.gmra.mxu1 %v17313_v33 }
 0x790   :  { %15100 = vmatpush3.xpose.msra.mxu0 %v6720_v52  ;;  %15125 = vmatpush3.xpose.msra.mxu1 %v17299_v43  ;;  %v7127_v52 = vand.u32 4294901760, %v7126_v63 }
 0x791   :  { %15101 = vmatprep.mubr.msk.f32.mxu0 %vm15989_vm0, %v15988_v0  ;;  %15126 = vmatprep.mubr.msk.f32.mxu1 %vm15989_vm0, %v15988_v0 }
 0x792   :  { %15109 = vmatprep.subr.mxu0 %v15988_v0  ;;  %15134 = vmatprep.subr.mxu1 %v15988_v0 }
 0x793   :  { %15102 = vmatmul.mubr.f32.vlgmr.msra.gmra.mxu0 %v6677_v5  ;;  %15127 = vmatmul.mubr.f32.vlgmr.msra.gmra.mxu1 %v7125_v62 }
 0x794   :  { %15110 = vmatpush3.xpose.msra.mxu0 %v17299_v43  ;;  %15135 = vmatpush3.xpose.msra.mxu1 %v17299_v43  ;;  %v7571_v43 = vand.u32 4294901760, %v7570_v50 }
 0x795   :  { %15111 = vmatprep.mubr.msk.f32.mxu0 %vm15989_vm0, %v15988_v0  ;;  %15136 = vmatprep.mubr.msk.f32.mxu1 %vm15989_vm0, %v15988_v0 }
 0x796   :  { %15119 = vmatprep.subr.mxu0 %v15988_v0  ;;  %15144 = vmatprep.subr.mxu1 %v15988_v0  ;;  %v7572_v61 = vsub.f32 %v7570_v50, %v7571_v43 }
 0x797   :  { %15112 = vmatmul.mubr.f32.vlgmr.msra.gmra.mxu0 %v7127_v52  ;;  %15137 = vmatmul.mubr.f32.vlgmr.msra.gmra.mxu1 %v17313_v33 }
 0x798   :  { %15120 = vmatpush3.xpose.msra.mxu0 %v17302_v34  ;;  %15145 = vmatpush3.xpose.msra.mxu1 %v7614_v29  ;;  %v7573_v21 = vand.u32 4294901760, %v7572_v61  ;;  %v8083_v34 = vand.u32 4294901760, %v17391_v47 }
 0x799   :  { %15121 = vmatprep.mubr.msk.f32.mxu0 %vm15989_vm0, %v15988_v0  ;;  %15146 = vmatprep.mubr.msk.f32.mxu1 %vm15989_vm0, %v15988_v0 }
 0x79a   :  { %15129 = vmatprep.subr.mxu0 %v15988_v0  ;;  %15154 = vmatprep.subr.mxu1 %v15988_v0  ;;  %v8084_v35 = vsub.f32 %v17391_v47, %v8083_v34 }
 0x79b   :  { %15122 = vmatmul.mubr.f32.vlgmr.msra.gmra.mxu0 %v7124_v57  ;;  %15147 = vmatmul.mubr.f32.vlgmr.msra.gmra.mxu1 %v7569_v58 }
 0x79c   :  { %15130 = vmatpush3.xpose.msra.mxu0 %v7166_v2  ;;  %15155 = vmatpush3.xpose.msra.mxu1 %v17311_v36  ;;  %v8085_v39 = vand.u32 4294901760, %v8084_v35 }
 0x79d   :  { %15131 = vmatprep.mubr.msk.f32.mxu0 %vm15989_vm0, %v15988_v0  ;;  %15156 = vmatprep.mubr.msk.f32.mxu1 %vm15989_vm0, %v15988_v0 }
 0x79e   :  { %15139 = vmatprep.subr.mxu0 %v15988_v0  ;;  %15164 = vmatprep.subr.mxu1 %v15988_v0 }
 0x79f   :  { %15132 = vmatmul.mubr.f32.vlgmr.msra.gmra.mxu0 %v17313_v33  ;;  %15157 = vmatmul.mubr.f32.vlgmr.msra.gmra.mxu1 %v7571_v43 }
 0x7a0   :  { %15140 = vmatpush3.xpose.msra.mxu0 %v17311_v36  ;;  %15165 = vmatpush3.xpose.msra.mxu1 %v17311_v36 }
 0x7a1   :  { %15141 = vmatprep.mubr.msk.f32.mxu0 %vm15989_vm0, %v15988_v0  ;;  %15166 = vmatprep.mubr.msk.f32.mxu1 %vm15989_vm0, %v15988_v0 }
 0x7a2   :  { %15149 = vmatprep.subr.mxu0 %v15988_v0  ;;  %15174 = vmatprep.subr.mxu1 %v15988_v0 }
 0x7a3   :  { %15142 = vmatmul.mubr.f32.vlgmr.msra.gmra.mxu0 %v7573_v21  ;;  %15167 = vmatmul.mubr.f32.vlgmr.msra.gmra.mxu1 %v7569_v58 }
 0x7a4   :  { %15150 = vmatpush3.xpose.msra.mxu0 %v17320_v4  ;;  %15151 = vmatprep.mubr.msk.f32.mxu0 %vm15989_vm0, %v15988_v0 }
 0x7a5   :  { %15159 = vmatprep.subr.mxu0 %v15988_v0  ;;  %15176 = vmatprep.mubr.msk.f32.mxu1 %vm15989_vm0, %v15988_v0 }
 0x7a6   :  { %15175 = vmatpush3.msra.mxu1 %v8085_v39 }
 0x7a7   :  { %15152 = vmatmul.mubr.f32.vlgmr.msra.gmra.mxu0 %v7570_v50  ;;  %15184 = vmatprep.subr.mxu1 %v15988_v0 }
 0x7a8   :  { %15160 = vmatpush3.xpose.msra.mxu0 %v7612_v56  ;;  %15161 = vmatprep.mubr.msk.f32.mxu0 %vm15989_vm0, %v15988_v0 }
 0x7a9   :  { %15169 = vmatprep.subr.mxu0 %v15988_v0 }
 0x7ab   :  { %15162 = vmatmul.mubr.f32.vlgmr.msra.gmra.mxu0 %v7569_v58 }
 0x7ac   :  { %15171 = vmatprep.mubr.msk.f32.mxu0 %vm15989_vm0, %v15988_v0  ;;  %15170 = vmatpush3.msra.mxu0 %v17388_v51 }
 0x7ad   :  { %15179 = vmatprep.subr.mxu0 %v15988_v0 }
 0x843   :  { %v6759_v3 = vpop.f32.mrf.mxu1 }
 0x845   :  { %v15088_v32 = vpop.f32.mrf.mxu1 }
 0x847   :  { %v6907_v46 = vpop.f32.mrf.mxu1 }
 0x849   :  { %v15098_v38 = vpop.f32.mrf.mxu1 }
 0x84b   :  { %v6683_v55 = vpop.f32.mrf.mxu0  ;;  %v7053_v2 = vpop.f32.mrf.mxu1 }
 0x84c   :  { %v6760_v41 = vadd.f32 %v6759_v3, %v6683_v55 }
 0x84d   :  { %v15083_v42 = vpop.f32.mrf.mxu0  ;;  %v15108_v7 = vpop.f32.mrf.mxu1 }
 0x84f   :  { %v6833_v5 = vpop.f32.mrf.mxu0  ;;  %v7205_v37 = vpop.f32.mrf.mxu1 }
 0x850   :  { %v6834_v57 = vadd.f32 %v6833_v5, %v6760_v41 }
 0x851   :  { %v15093_v19 = vpop.f32.mrf.mxu0  ;;  %v15118_v54 = vpop.f32.mrf.mxu1 }
 0x852   :  { %v6908_v63 = vadd.f32 %v6907_v46, %v6834_v57 }
 0x853   :  { %v6981_v1 = vpop.f32.mrf.mxu0  ;;  %v7353_v15 = vpop.f32.mrf.mxu1 }
 0x854   :  { %v6982_v61 = vadd.f32 %v6981_v1, %v6908_v63 }
 0x855   :  { %v15103_v10 = vpop.f32.mrf.mxu0  ;;  %v15128_v36 = vpop.f32.mrf.mxu1 }
 0x856   :  { %v7054_v32 = vadd.f32 %v7053_v2, %v6982_v61 }
 0x857   :  { %v7129_v23 = vpop.f32.mrf.mxu0  ;;  %v7499_v40 = vpop.f32.mrf.mxu1 }
 0x858   :  { %v7206_v60 = vadd.f32 %v7205_v37, %v7129_v23  ;;  %v7949_v46 = vsel %vm42_vm1, %v7054_v32, 0.0  ;;  %v8435_v23 = vld [vmem:[#allocation5 + $0x178] sm:$0xff] }
 0x859   :  { %v15113_v33 = vpop.f32.mrf.mxu0  ;;  %v15138_v45 = vpop.f32.mrf.mxu1  ;;  %v17403_v2 = vand.u32 4294901760, %v8435_v23 }
 0x85a   :  { %v8433_v33 = vld [vmem:[#allocation5 + $0x168] sm:$0xff] }
 0x85b   :  { %v7279_v59 = vpop.f32.mrf.mxu0  ;;  %v7651_v20 = vpop.f32.mrf.mxu1 }
 0x85c   :  { %v7280_v4 = vadd.f32 %v7279_v59, %v7206_v60  ;;  %v8432_v59 = vld [vmem:[#allocation5 + $0x160] sm:$0xff] }
 0x85d   :  { %v15123_v11 = vpop.f32.mrf.mxu0  ;;  %v15148_v44 = vpop.f32.mrf.mxu1 }
 0x85e   :  { %v7354_v62 = vadd.f32 %v7353_v15, %v7280_v4  ;;  %v13481_v15 = vld [vmem:[#allocation5 + $0x2c3] ss:$0 sm:$0xff]  ;;  %v17408_v4 = vsub.f32 %v8435_v23, %v17403_v2  ;;  %v17410_v11 = vand.u32 4294901760, %v8433_v33  ;;  %v8431_v44 = vld [vmem:[#allocation5 + $0x158] sm:$0xff] }
 0x85f   :  { %v7427_v6 = vpop.f32.mrf.mxu0  ;;  %v7799_v56 = vpop.f32.mrf.mxu1 }
 0x860   :  { %v7428_v52 = vadd.f32 %v7427_v6, %v7354_v62  ;;  %v8430_v62 = vld [vmem:[#allocation5 + $0x150] sm:$0xff]  ;;  %v17420_v63 = vsub.f32 %v8433_v33, %v17410_v11  ;;  %v8425_v33 = vld [vmem:[#allocation5 + $0x128] sm:$0xff] }
 0x861   :  { %v15133_v48 = vpop.f32.mrf.mxu0  ;;  %v15158_v31 = vpop.f32.mrf.mxu1  ;;  %v17430_v61 = vand.u32 4294901760, %v8430_v62 }
 0x862   :  { %v7500_v35 = vadd.f32 %v7499_v40, %v7428_v52  ;;  %v8434_v40 = vld [vmem:[#allocation5 + $0x170] sm:$0xff]  ;;  %v8535_v31 = vand.u32 4294901760, %v17408_v4 }
 0x863   :  { %v7575_v58 = vpop.f32.mrf.mxu0  ;;  %v7945_v29 = vpop.f32.mrf.mxu1  ;;  %v17405_v45 = vand.u32 4294901760, %v8434_v40 }
 0x864   :  { %v7652_v21 = vadd.f32 %v7651_v20, %v7575_v58  ;;  %v7950_v42 = vsel %vm42_vm1, %v7500_v35, 0.0  ;;  %v17422_v58 = vand.u32 4294901760, %v8431_v44 }
 0x865   :  { %v15143_v50 = vpop.f32.mrf.mxu0  ;;  %v15168_v43 = vpop.f32.mrf.mxu1  ;;  %v7951_v19 = vadd.f32 %v7950_v42, %v7949_v46  ;;  %v17413_v6 = vsub.f32 %v8434_v40, %v17405_v45  ;;  %v8427_v42 = vld [vmem:[#allocation5 + $0x138] sm:$0xff]  ;;  %v17454_v46 = vsub.f32 %v8430_v62, %v17430_v61 }
 0x866   :  { %v17444_v32 = vsub.f32 %v8431_v44, %v17422_v58  ;;  %v8424_v44 = vld [vmem:[#allocation5 + $0x120] sm:$0xff] }
 0x867   :  { %v7725_v28 = vpop.f32.mrf.mxu0  ;;  %v8542_v50 = vand.u32 4294901760, %v17413_v6 }
 0x868   :  { %v7726_v39 = vadd.f32 %v7725_v28, %v7652_v21  ;;  %v8428_v21 = vld [vmem:[#allocation5 + $0x140] sm:$0xff] }
 0x869   :  { %v15153_v3 = vpop.f32.mrf.mxu0 }
 0x86a   :  { %v7800_v38 = vadd.f32 %v7799_v56, %v7726_v39  ;;  %v17415_v56 = vand.u32 4294901760, %v8432_v59  ;;  %v8536_v39 = vsub.f32 %v17408_v4, %v8535_v31  ;;  %v8549_v3 = vand.u32 4294901760, %v17420_v63 }
 0x86b   :  { %v7873_v55 = vpop.f32.mrf.mxu0 }
 0x86c   :  { %v7874_v7 = vadd.f32 %v7873_v55, %v7800_v38  ;;  %v17428_v43 = vsub.f32 %v8432_v59, %v17415_v56  ;;  %v17447_v55 = vand.u32 4294901760, %v8428_v21  ;;  %v18445_v59 = vand.u32 4294901760, %v17454_v46 }
 0x86d   :  { %v15163_v5 = vpop.f32.mrf.mxu0 }
 0x86e   :  { %v7946_v37 = vadd.f32 %v7945_v29, %v7874_v7  ;;  %v8429_v29 = vld [vmem:[#allocation5 + $0x148] sm:$0xff]  ;;  %v8543_v7 = vsub.f32 %v17413_v6, %v8542_v50  ;;  %v8556_v5 = vand.u32 4294901760, %v17428_v43  ;;  %v17470_v40 = vsub.f32 %v8428_v21, %v17447_v55 }
 0x86f   :  { %v17434_v35 = vand.u32 4294901760, %v8429_v29 }
 0x870   :  { %v7952_v54 = vsel %vm42_vm1, %v7946_v37, 0.0  ;;  %v18446_v21 = vand.u32 4294901760, %v17470_v40 }
 0x871   :  { %v7953_v1 = vadd.f32 %v7952_v54, %v7951_v19  ;;  %v17457_v19 = vsub.f32 %v8429_v29, %v17434_v35  ;;  %v8426_v54 = vld [vmem:[#allocation5 + $0x130] sm:$0xff]  ;;  %v17487_v29 = vand.u32 4294901760, %v8425_v33 }
 0x873   :  { %v7959_v10 = vadd.f32 %v13481_v15, %v7953_v1  ;;  %v8537_v15 = vand.u32 4294901760, %v8536_v39  ;;  %v8550_v1 = vsub.f32 %v17420_v63, %v8549_v3  ;;  %v8423_v39 = vld [vmem:[#allocation5 + $0x118] sm:$0xff] }
 0x875   :  { %v7961_v36 = vmul.f32 0.70710677, %v7959_v10  ;;  %v7960_v20 = vmul.f32 0.5, %v7959_v10  ;;  %v18449_v10 = vand.u32 4294901760, %v17444_v32 }
 0x877   :  { %15910 = verf.f32 %v7961_v36  ;;  %v17466_v36 = vand.u32 4294901760, %v8427_v42  ;;  %v8564_v62 = vsub.f32 %v17444_v32, %v18449_v10 }
 0x884   :  { %v15911_v60 = vpop.eup %15910 }
 0x885   :  { %v7963_v41 = vadd.f32 1.0, %v15911_v60  ;;  %v8557_v60 = vsub.f32 %v17428_v43, %v8556_v5 }
 0x887   :  { %v7964_v57 = vmul.f32 %v7963_v41, %v7960_v20  ;;  %v17476_v20 = vand.u32 4294901760, %v8426_v54  ;;  %v18444_v41 = vand.u32 4294901760, %v17457_v19 }
 0x889   :  { %v7972_v48 = vsel %vm42_vm1, %v7964_v57, 0  ;;  %v8551_v57 = vand.u32 4294901760, %v8550_v1  ;;  %v8422_v1 = vld [vmem:[#allocation5 + $0x110] sm:$0xff] }
 0x88a   :  { %v17424_v52 = vand.u32 4294901760, %v7972_v48 }
 0x88c   :  { %v8041_v28 = vsub.f32 %v7972_v48, %v17424_v52  ;;  %15177 = vmatmul.mubr.f32.vlgmr.msra.gmra.mxu1 %v17424_v52  ;;  %v17485_v48 = vsub.f32 %v8427_v42, %v17466_v36  ;;  %v17498_v42 = vsub.f32 %v8426_v54, %v17476_v20  ;;  %v17510_v54 = vsub.f32 %v8425_v33, %v17487_v29 }
 0x88d   :  { %15185 = vmatpush3.msra.mxu1 %v17388_v51  ;;  %15186 = vmatprep.mubr.msk.f32.mxu1 %vm15989_vm0, %v15988_v0 }
 0x88e   :  { %v8042_v38 = vand.u32 4294901760, %v8041_v28  ;;  %15194 = vmatprep.subr.mxu1 %v15988_v0 }
 0x890   :  { %15187 = vmatmul.mubr.f32.vlgmr.msra.gmra.mxu1 %v8042_v38  ;;  %v8043_v37 = vsub.f32 %v8041_v28, %v8042_v38  ;;  %v8558_v38 = vand.u32 4294901760, %v8557_v60  ;;  %v17512_v60 = vand.u32 4294901760, %v8423_v39 }
 0x891   :  { %15195 = vmatpush3.msra.mxu1 %v17388_v51  ;;  %15196 = vmatprep.mubr.msk.f32.mxu1 %vm15989_vm0, %v15988_v0  ;;  %v8544_v51 = vand.u32 4294901760, %v8543_v7  ;;  %v8571_v7 = vsub.f32 %v17454_v46, %v18445_v59  ;;  %v8420_v59 = vld [vmem:[#allocation5 + $0x100] sm:$0xff] }
 0x892   :  { %15234 = vmatprep.subr.mxu1 %v15988_v0  ;;  %v8044_v23 = vand.u32 4294901760, %v8043_v37  ;;  %v17500_v37 = vand.u32 4294901760, %v8424_v44 }
 0x894   :  { %15172 = vmatmul.mubr.f32.vlgmr.msra.gmra.mxu0 %v8044_v23  ;;  %15197 = vmatmul.mubr.f32.vlgmr.msra.gmra.mxu1 %v17424_v52  ;;  %v8565_v23 = vand.u32 4294901760, %v8564_v62  ;;  %v17523_v33 = vsub.f32 %v8424_v44, %v17500_v37  ;;  %v17525_v62 = vand.u32 4294901760, %v8422_v1  ;;  %v17535_v44 = vsub.f32 %v8423_v39, %v17512_v60 }
 0x895   :  { %15235 = vmatpush3.msra.mxu1 %v8537_v15  ;;  %15180 = vmatpush3.msra.mxu0 %v17391_v47  ;;  %v8578_v15 = vsub.f32 %v17457_v19, %v18444_v41  ;;  %v8572_v47 = vand.u32 4294901760, %v8571_v7  ;;  %v18450_v7 = vand.u32 4294901760, %v17510_v54  ;;  %v17549_v39 = vand.u32 4294901760, %v8420_v59 }
 0x896   :  { %15236 = vmatprep.subr.mxu1 %v15988_v0  ;;  %15181 = vmatprep.mubr.msk.f32.mxu0 %vm15989_vm0, %v15988_v0 }
 0x897   :  { %15237 = vmatpush3.msra.mxu1 %v8544_v51  ;;  %15189 = vmatprep.subr.mxu0 %v15988_v0  ;;  %v18447_v51 = vand.u32 4294901760, %v17485_v48  ;;  %v8579_v41 = vand.u32 4294901760, %v8578_v15 }
 0x898   :  { %15238 = vmatprep.subr.mxu1 %v15988_v0  ;;  %15182 = vmatmul.mubr.f32.vlgmr.msra.gmra.mxu0 %v8041_v28  ;;  %v8585_v28 = vsub.f32 %v17470_v40, %v18446_v21 }
 0x899   :  { %15239 = vmatpush3.msra.mxu1 %v8551_v57  ;;  %15190 = vmatpush3.msra.mxu0 %v8083_v34  ;;  %v8421_v57 = vld [vmem:[#allocation5 + $0x108] sm:$0xff]  ;;  %v18448_v34 = vand.u32 4294901760, %v17498_v42 }
 0x89a   :  { %15240 = vmatprep.subr.mxu1 %v15988_v0  ;;  %15191 = vmatprep.mubr.msk.f32.mxu0 %vm15989_vm0, %v15988_v0  ;;  %v17537_v21 = vand.u32 4294901760, %v8421_v57 }
 0x89b   :  { %15241 = vmatpush3.msra.mxu1 %v8558_v38  ;;  %15199 = vmatprep.subr.mxu0 %v15988_v0  ;;  %v8592_v38 = vsub.f32 %v17485_v48, %v18447_v51  ;;  %v8599_v15 = vsub.f32 %v17498_v42, %v18448_v34  ;;  %v17547_v51 = vsub.f32 %v8422_v1, %v17525_v62  ;;  %v18452_v34 = vand.u32 4294901760, %v17535_v44 }
 0x89c   :  { %15242 = vmatprep.subr.mxu1 %v15988_v0  ;;  %15192 = vmatmul.mubr.f32.vlgmr.msra.gmra.mxu0 %v17424_v52  ;;  %v8586_v52 = vand.u32 4294901760, %v8585_v28  ;;  %v17559_v10 = vsub.f32 %v8421_v57, %v17537_v21 }
 0x89d   :  { %15200 = vmatpush3.msra.mxu0 %v17403_v2  ;;  %15243 = vmatpush3.msra.mxu1 %v8565_v23  ;;  %v18451_v23 = vand.u32 4294901760, %v17523_v33  ;;  %v8593_v28 = vand.u32 4294901760, %v8592_v38  ;;  %v8600_v1 = vand.u32 4294901760, %v8599_v15  ;;  %v8626_v38 = vand.u32 4294901760, %v17547_v51 }
 0x89e   :  { %15201 = vmatprep.subr.mxu0 %v15988_v0  ;;  %15244 = vmatprep.subr.mxu1 %v15988_v0  ;;  %v8633_v15 = vand.u32 4294901760, %v17559_v10 }
 0x89f   :  { %15202 = vmatpush3.msra.mxu0 %v17405_v45  ;;  %15245 = vmatpush3.msra.mxu1 %v8572_v47  ;;  %v8606_v47 = vsub.f32 %v17510_v54, %v18450_v7  ;;  %v17569_v7 = vsub.f32 %v8420_v59, %v17549_v39 }
 0x8a0   :  { %15203 = vmatprep.subr.mxu0 %v15988_v0  ;;  %15246 = vmatprep.subr.mxu1 %v15988_v0 }
 0x8a1   :  { %15204 = vmatpush3.msra.mxu0 %v17410_v11  ;;  %15247 = vmatpush3.msra.mxu1 %v8579_v41  ;;  %v8613_v41 = vsub.f32 %v17523_v33, %v18451_v23  ;;  %v8607_v57 = vand.u32 4294901760, %v8606_v47  ;;  %v8627_v23 = vsub.f32 %v17547_v51, %v8626_v38 }
 0x8a2   :  { %15205 = vmatprep.subr.mxu0 %v15988_v0  ;;  %15248 = vmatprep.subr.mxu1 %v15988_v0 }
 0x8a3   :  { %15206 = vmatpush3.msra.mxu0 %v17415_v56  ;;  %15249 = vmatpush3.msra.mxu1 %v8586_v52  ;;  %v8620_v52 = vsub.f32 %v17535_v44, %v18452_v34  ;;  %v8614_v59 = vand.u32 4294901760, %v8613_v41  ;;  %v8634_v34 = vsub.f32 %v17559_v10, %v8633_v15 }
 0x8a4   :  { %15207 = vmatprep.subr.mxu0 %v15988_v0  ;;  %15250 = vmatprep.subr.mxu1 %v15988_v0 }
 0x8a5   :  { %15208 = vmatpush3.msra.mxu0 %v17422_v58  ;;  %15251 = vmatpush3.msra.mxu1 %v8593_v28  ;;  %v8640_v28 = vand.u32 4294901760, %v17569_v7  ;;  %v8621_v47 = vand.u32 4294901760, %v8620_v52 }
 0x8a6   :  { %15209 = vmatprep.subr.mxu0 %v15988_v0  ;;  %15252 = vmatprep.subr.mxu1 %v15988_v0 }
 0x8a7   :  { %15210 = vmatpush3.msra.mxu0 %v17430_v61  ;;  %15253 = vmatpush3.msra.mxu1 %v8600_v1  ;;  %v8628_v1 = vand.u32 4294901760, %v8627_v23  ;;  %v8641_v41 = vsub.f32 %v17569_v7, %v8640_v28 }
 0x8a8   :  { %15211 = vmatprep.subr.mxu0 %v15988_v0  ;;  %15254 = vmatprep.subr.mxu1 %v15988_v0 }
 0x8a9   :  { %15212 = vmatpush3.msra.mxu0 %v17434_v35  ;;  %15255 = vmatpush3.msra.mxu1 %v8607_v57  ;;  %v8635_v57 = vand.u32 4294901760, %v8634_v34  ;;  %v8642_v23 = vand.u32 4294901760, %v8641_v41 }
 0x8aa   :  { %15213 = vmatprep.subr.mxu0 %v15988_v0  ;;  %15256 = vmatprep.subr.mxu1 %v15988_v0 }
 0x8ab   :  { %15214 = vmatpush3.msra.mxu0 %v17447_v55  ;;  %15257 = vmatpush3.msra.mxu1 %v8614_v59 }
 0x8ac   :  { %15215 = vmatprep.subr.mxu0 %v15988_v0  ;;  %15258 = vmatprep.subr.mxu1 %v15988_v0 }
 0x8ad   :  { %15216 = vmatpush3.msra.mxu0 %v17466_v36  ;;  %15259 = vmatpush3.msra.mxu1 %v8621_v47 }
 0x8ae   :  { %15217 = vmatprep.subr.mxu0 %v15988_v0  ;;  %15260 = vmatprep.subr.mxu1 %v15988_v0 }
 0x8af   :  { %15218 = vmatpush3.msra.mxu0 %v17476_v20  ;;  %15261 = vmatpush3.msra.mxu1 %v8628_v1 }
 0x8b0   :  { %15219 = vmatprep.subr.mxu0 %v15988_v0  ;;  %15262 = vmatprep.subr.mxu1 %v15988_v0 }
 0x8b1   :  { %15220 = vmatpush3.msra.mxu0 %v17487_v29  ;;  %15263 = vmatpush3.msra.mxu1 %v8635_v57 }
 0x8b2   :  { %15221 = vmatprep.subr.mxu0 %v15988_v0  ;;  %15264 = vmatprep.subr.mxu1 %v15988_v0 }
 0x8b3   :  { %15222 = vmatpush3.msra.mxu0 %v17500_v37  ;;  %15265 = vmatpush3.msra.mxu1 %v8642_v23 }
 0x8b4   :  { %15266 = vmatprep.mubr.msk.f32.mxu1 %vm15989_vm0, %v15988_v0  ;;  %15223 = vmatprep.subr.mxu0 %v15988_v0 }
 0x8b5   :  { %15267 = vmatmul.mubr.f32.vlgmr.msra.gmra.mxu1 %v17209_v53  ;;  %15304 = vmatprep.subr.mxu1 %v15988_v0 }
 0x8b6   :  { %15224 = vmatpush3.msra.mxu0 %v17512_v60  ;;  %15305 = vmatpush3.msra.mxu1 %v17403_v2 }
 0x8b7   :  { %15225 = vmatprep.subr.mxu0 %v15988_v0  ;;  %15306 = vmatprep.subr.mxu1 %v15988_v0 }
 0x8b8   :  { %15226 = vmatpush3.msra.mxu0 %v17525_v62  ;;  %15307 = vmatpush3.msra.mxu1 %v17405_v45 }
 0x8b9   :  { %15227 = vmatprep.subr.mxu0 %v15988_v0  ;;  %15308 = vmatprep.subr.mxu1 %v15988_v0 }
 0x8ba   :  { %15228 = vmatpush3.msra.mxu0 %v17537_v21  ;;  %15309 = vmatpush3.msra.mxu1 %v17410_v11 }
 0x8bb   :  { %15229 = vmatprep.subr.mxu0 %v15988_v0  ;;  %15310 = vmatprep.subr.mxu1 %v15988_v0 }
 0x8bc   :  { %15230 = vmatpush3.msra.mxu0 %v17549_v39  ;;  %15231 = vmatprep.mubr.msk.f32.mxu0 %vm15989_vm0, %v15988_v0 }
 0x8bd   :  { %15311 = vmatpush3.msra.mxu1 %v17415_v56  ;;  %15232 = vmatmul.mubr.f32.vlgmr.msra.gmra.mxu0 %v17229_v26  ;;  %v18473_v26 = vand.u32 4294901760, %v17457_v19 }
 0x8be   :  { %15269 = vmatprep.subr.mxu0 %v15988_v0  ;;  %15312 = vmatprep.subr.mxu1 %v15988_v0 }
 0x8bf   :  { %15270 = vmatpush3.msra.mxu0 %v17408_v4  ;;  %15313 = vmatpush3.msra.mxu1 %v17422_v58  ;;  %v18476_v4 = vand.u32 4294901760, %v17498_v42 }
 0x8c0   :  { %15271 = vmatprep.subr.mxu0 %v15988_v0  ;;  %15314 = vmatprep.subr.mxu1 %v15988_v0 }
 0x8c1   :  { %15272 = vmatpush3.msra.mxu0 %v17413_v6  ;;  %15315 = vmatpush3.msra.mxu1 %v17430_v61  ;;  %v18478_v6 = vand.u32 4294901760, %v17523_v33 }
 0x8c2   :  { %15273 = vmatprep.subr.mxu0 %v15988_v0  ;;  %15316 = vmatprep.subr.mxu1 %v15988_v0 }
 0x8c3   :  { %15274 = vmatpush3.msra.mxu0 %v17420_v63  ;;  %15317 = vmatpush3.msra.mxu1 %v17434_v35 }
 0x8c4   :  { %15275 = vmatprep.subr.mxu0 %v15988_v0  ;;  %15318 = vmatprep.subr.mxu1 %v15988_v0 }
 0x8c5   :  { %15276 = vmatpush3.msra.mxu0 %v17428_v43  ;;  %15319 = vmatpush3.msra.mxu1 %v17447_v55  ;;  %v13482_v43 = vld [vmem:[#allocation5 + $0x2ba] ss:$0 sm:$0xff] }
 0x8c6   :  { %15277 = vmatprep.subr.mxu0 %v15988_v0  ;;  %15320 = vmatprep.subr.mxu1 %v15988_v0 }
 0x8c7   :  { %15278 = vmatpush3.msra.mxu0 %v17444_v32  ;;  %15321 = vmatpush3.msra.mxu1 %v17466_v36 }
 0x8c8   :  { %15279 = vmatprep.subr.mxu0 %v15988_v0  ;;  %15322 = vmatprep.subr.mxu1 %v15988_v0 }
 0x8c9   :  { %15280 = vmatpush3.msra.mxu0 %v17454_v46  ;;  %15323 = vmatpush3.msra.mxu1 %v17476_v20 }
 0x8ca   :  { %15281 = vmatprep.subr.mxu0 %v15988_v0  ;;  %15324 = vmatprep.subr.mxu1 %v15988_v0 }
 0x8cb   :  { %15282 = vmatpush3.msra.mxu0 %v17457_v19  ;;  %15325 = vmatpush3.msra.mxu1 %v17487_v29 }
 0x8cc   :  { %15283 = vmatprep.subr.mxu0 %v15988_v0  ;;  %15326 = vmatprep.subr.mxu1 %v15988_v0 }
 0x8cd   :  { %15284 = vmatpush3.msra.mxu0 %v17470_v40  ;;  %15327 = vmatpush3.msra.mxu1 %v17500_v37 }
 0x8ce   :  { %15285 = vmatprep.subr.mxu0 %v15988_v0  ;;  %15328 = vmatprep.subr.mxu1 %v15988_v0 }
 0x8cf   :  { %15286 = vmatpush3.msra.mxu0 %v17485_v48  ;;  %15329 = vmatpush3.msra.mxu1 %v17512_v60 }
 0x8d0   :  { %15287 = vmatprep.subr.mxu0 %v15988_v0  ;;  %15330 = vmatprep.subr.mxu1 %v15988_v0 }
 0x8d1   :  { %15288 = vmatpush3.msra.mxu0 %v17498_v42  ;;  %15331 = vmatpush3.msra.mxu1 %v17525_v62 }
 0x8d2   :  { %15289 = vmatprep.subr.mxu0 %v15988_v0  ;;  %15332 = vmatprep.subr.mxu1 %v15988_v0 }
 0x8d3   :  { %15290 = vmatpush3.msra.mxu0 %v17510_v54  ;;  %15333 = vmatpush3.msra.mxu1 %v17537_v21 }
 0x8d4   :  { %15291 = vmatprep.subr.mxu0 %v15988_v0  ;;  %15334 = vmatprep.subr.mxu1 %v15988_v0 }
 0x8d5   :  { %15292 = vmatpush3.msra.mxu0 %v17523_v33  ;;  %15335 = vmatpush3.msra.mxu1 %v17549_v39  ;;  %v13483_v33 = vld [vmem:[#allocation5 + $0x2be] ss:$0 sm:$0xff] }
 0x8d6   :  { %15336 = vmatprep.mubr.msk.f32.mxu1 %vm15989_vm0, %v15988_v0  ;;  %15293 = vmatprep.subr.mxu0 %v15988_v0 }
 0x8d7   :  { %15337 = vmatmul.mubr.f32.vlgmr.msra.gmra.mxu1 %v17221_v49  ;;  %15374 = vmatprep.subr.mxu1 %v15988_v0  ;;  %v18472_v49 = vand.u32 4294901760, %v17454_v46 }
 0x8d8   :  { %15294 = vmatpush3.msra.mxu0 %v17535_v44  ;;  %15375 = vmatpush3.msra.mxu1 %v17403_v2  ;;  %v18474_v2 = vand.u32 4294901760, %v17470_v40 }
 0x8d9   :  { %15295 = vmatprep.subr.mxu0 %v15988_v0  ;;  %15376 = vmatprep.subr.mxu1 %v15988_v0 }
 0x8da   :  { %15296 = vmatpush3.msra.mxu0 %v17547_v51  ;;  %15377 = vmatpush3.msra.mxu1 %v17405_v45  ;;  %v18475_v45 = vand.u32 4294901760, %v17485_v48 }
 0x8db   :  { %15297 = vmatprep.subr.mxu0 %v15988_v0  ;;  %15378 = vmatprep.subr.mxu1 %v15988_v0 }
 0x8dc   :  { %15298 = vmatpush3.msra.mxu0 %v17559_v10  ;;  %15379 = vmatpush3.msra.mxu1 %v17410_v11  ;;  %v18477_v11 = vand.u32 4294901760, %v17510_v54 }
 0x8dd   :  { %15299 = vmatprep.subr.mxu0 %v15988_v0  ;;  %15380 = vmatprep.subr.mxu1 %v15988_v0 }
 0x8de   :  { %15300 = vmatpush3.msra.mxu0 %v17569_v7  ;;  %15301 = vmatprep.mubr.msk.f32.mxu0 %vm15989_vm0, %v15988_v0 }
 0x8df   :  { %15381 = vmatpush3.msra.mxu1 %v17415_v56  ;;  %15302 = vmatmul.mubr.f32.vlgmr.msra.gmra.mxu0 %v17213_v30  ;;  %v18471_v30 = vand.u32 4294901760, %v17444_v32  ;;  %v18479_v56 = vand.u32 4294901760, %v17535_v44 }
 0x8e0   :  { %15339 = vmatprep.subr.mxu0 %v15988_v0  ;;  %15382 = vmatprep.subr.mxu1 %v15988_v0 }
 0x8e1   :  { %15340 = vmatpush3.msra.mxu0 %v8535_v31  ;;  %15383 = vmatpush3.msra.mxu1 %v17422_v58 }
 0x8e2   :  { %15341 = vmatprep.subr.mxu0 %v15988_v0  ;;  %15384 = vmatprep.subr.mxu1 %v15988_v0 }
 0x8e3   :  { %15342 = vmatpush3.msra.mxu0 %v8542_v50  ;;  %15385 = vmatpush3.msra.mxu1 %v17430_v61 }
 0x8e4   :  { %15343 = vmatprep.subr.mxu0 %v15988_v0  ;;  %15386 = vmatprep.subr.mxu1 %v15988_v0 }
 0x8e5   :  { %15344 = vmatpush3.msra.mxu0 %v8549_v3  ;;  %15387 = vmatpush3.msra.mxu1 %v17434_v35 }
 0x8e6   :  { %15345 = vmatprep.subr.mxu0 %v15988_v0  ;;  %15388 = vmatprep.subr.mxu1 %v15988_v0 }
 0x8e7   :  { %15346 = vmatpush3.msra.mxu0 %v8556_v5  ;;  %15389 = vmatpush3.msra.mxu1 %v17447_v55 }
 0x8e8   :  { %15347 = vmatprep.subr.mxu0 %v15988_v0  ;;  %15390 = vmatprep.subr.mxu1 %v15988_v0 }
 0x8e9   :  { %15348 = vmatpush3.msra.mxu0 %v18471_v30  ;;  %15391 = vmatpush3.msra.mxu1 %v17466_v36 }
 0x8ea   :  { %15349 = vmatprep.subr.mxu0 %v15988_v0  ;;  %15392 = vmatprep.subr.mxu1 %v15988_v0 }
 0x8eb   :  { %15350 = vmatpush3.msra.mxu0 %v18472_v49  ;;  %15393 = vmatpush3.msra.mxu1 %v17476_v20 }
 0x8ec   :  { %15351 = vmatprep.subr.mxu0 %v15988_v0  ;;  %15394 = vmatprep.subr.mxu1 %v15988_v0 }
 0x8ed   :  { %15352 = vmatpush3.msra.mxu0 %v18473_v26  ;;  %15395 = vmatpush3.msra.mxu1 %v17487_v29 }
 0x8ee   :  { %15353 = vmatprep.subr.mxu0 %v15988_v0  ;;  %15396 = vmatprep.subr.mxu1 %v15988_v0 }
 0x8ef   :  { %15354 = vmatpush3.msra.mxu0 %v18474_v2  ;;  %15397 = vmatpush3.msra.mxu1 %v17500_v37 }
 0x8f0   :  { %15355 = vmatprep.subr.mxu0 %v15988_v0  ;;  %15398 = vmatprep.subr.mxu1 %v15988_v0 }
 0x8f1   :  { %15356 = vmatpush3.msra.mxu0 %v18475_v45  ;;  %15399 = vmatpush3.msra.mxu1 %v17512_v60 }
 0x8f2   :  { %15357 = vmatprep.subr.mxu0 %v15988_v0  ;;  %15400 = vmatprep.subr.mxu1 %v15988_v0 }
 0x8f3   :  { %15358 = vmatpush3.msra.mxu0 %v18476_v4  ;;  %15401 = vmatpush3.msra.mxu1 %v17525_v62 }
 0x8f4   :  { %15359 = vmatprep.subr.mxu0 %v15988_v0  ;;  %15402 = vmatprep.subr.mxu1 %v15988_v0 }
 0x8f5   :  { %15360 = vmatpush3.msra.mxu0 %v18477_v11  ;;  %15403 = vmatpush3.msra.mxu1 %v17537_v21 }
 0x8f6   :  { %15361 = vmatprep.subr.mxu0 %v15988_v0  ;;  %15404 = vmatprep.subr.mxu1 %v15988_v0 }
 0x8f7   :  { %15362 = vmatpush3.msra.mxu0 %v18478_v6  ;;  %15405 = vmatpush3.msra.mxu1 %v17549_v39 }
 0x8f8   :  { %15406 = vmatprep.mubr.msk.f32.mxu1 %vm15989_vm0, %v15988_v0  ;;  %15363 = vmatprep.subr.mxu0 %v15988_v0 }
 0x8f9   :  { %15407 = vmatmul.mubr.f32.vlgmr.msra.gmra.mxu1 %v17209_v53  ;;  %15364 = vmatpush3.msra.mxu0 %v18479_v56 }
 0x8fa   :  { %15365 = vmatprep.subr.mxu0 %v15988_v0  ;;  %15371 = vmatprep.mubr.msk.f32.mxu0 %vm15989_vm0, %v15988_v0 }
 0x8fb   :  { %15366 = vmatpush3.msra.mxu0 %v8626_v38  ;;  %15420 = vmatprep.subr.mxu1 %v15988_v0 }
 0x8fc   :  { %15367 = vmatprep.subr.mxu0 %v15988_v0  ;;  %15422 = vmatprep.mubr.msk.f32.mxu1 %vm15989_vm0, %v15988_v0 }
 0x8fd   :  { %15368 = vmatpush3.msra.mxu0 %v8633_v15 }
 0x8fe   :  { %15369 = vmatprep.subr.mxu0 %v15988_v0 }
 0x8ff   :  { %15370 = vmatpush3.msra.mxu0 %v8640_v28 }
 0x900   :  { %15372 = vmatmul.mubr.f32.vlgmr.msra.gmra.mxu0 %v17209_v53  ;;  %15409 = vmatprep.subr.mxu0 %v15988_v0 }
 0x901   :  { %15411 = vmatprep.mubr.msk.f32.mxu0 %vm15989_vm0, %v15988_v0 }
 0x94c   :  { %v8122_v31 = vpop.f32.mrf.mxu1 }
 0x94e   :  { %v15178_v63 = vpop.f32.mrf.mxu1 }
 0x950   :  { %v8270_v58 = vpop.f32.mrf.mxu1 }
 0x952   :  { %v15188_v50 = vpop.f32.mrf.mxu1 }
 0x954   :  { %v8046_v61 = vpop.f32.mrf.mxu0  ;;  %v8416_v35 = vpop.f32.mrf.mxu1 }
 0x955   :  { %v8047_v3 = vadd.f32 %v13482_v43, %v8046_v61 }
 0x956   :  { %v15173_v32 = vpop.f32.mrf.mxu0  ;;  %v15198_v55 = vpop.f32.mrf.mxu1 }
 0x957   :  { %v8123_v5 = vadd.f32 %v8122_v31, %v8047_v3 }
 0x958   :  { %v8196_v46 = vpop.f32.mrf.mxu0 }
 0x959   :  { %v8197_v19 = vadd.f32 %v8196_v46, %v8123_v5 }
 0x95a   :  { %v15183_v10 = vpop.f32.mrf.mxu0 }
 0x95b   :  { %v8271_v53 = vadd.f32 %v8270_v58, %v8197_v19  ;;  %v9621_v19 = vld [vmem:[#allocation5 + $0x250] sm:$0xff] }
 0x95c   :  { %v8344_v36 = vpop.f32.mrf.mxu0 }
 0x95d   :  { %v8345_v40 = vadd.f32 %v8344_v36, %v8271_v53 }
 0x95e   :  { %v15193_v20 = vpop.f32.mrf.mxu0 }
 0x95f   :  { %v8417_v48 = vadd.f32 %v8416_v35, %v8345_v40 }
 0x975   :  { %v8679_v29 = vpop.f32.mrf.mxu1 }
 0x977   :  { %v15268_v21 = vpop.f32.mrf.mxu1 }
 0x97d   :  { %v8528_v42 = vpop.f32.mrf.mxu0 }
 0x97e   :  { %v8529_v62 = vadd.f32 %v13483_v33, %v8528_v42 }
 0x97f   :  { %v15233_v37 = vpop.f32.mrf.mxu0 }
 0x980   :  { %v8680_v7 = vadd.f32 %v8679_v29, %v8529_v62 }
 0x997   :  { %v8872_v51 = vpop.f32.mrf.mxu1 }
 0x999   :  { %v15338_v54 = vpop.f32.mrf.mxu1 }
 0x99f   :  { %v8783_v60 = vpop.f32.mrf.mxu0 }
 0x9a0   :  { %v8784_v39 = vadd.f32 %v8783_v60, %v8680_v7 }
 0x9a1   :  { %v15303_v34 = vpop.f32.mrf.mxu0 }
 0x9a2   :  { %v8873_v52 = vadd.f32 %v8872_v51, %v8784_v39 }
 0x9b9   :  { %v9078_v44 = vpop.f32.mrf.mxu1 }
 0x9bb   :  { %v15408_v38 = vpop.f32.mrf.mxu1 }
 0x9c0   :  { %v8991_v15 = vpop.f32.mrf.mxu0 }
 0x9c1   :  { %v8992_v59 = vadd.f32 %v8991_v15, %v8873_v52 }
 0x9c2   :  { %v15373_v28 = vpop.f32.mrf.mxu0 }
 0x9c3   :  { %v9079_v47 = vadd.f32 %v9078_v44, %v8992_v59 }
 0x9c5   :  { %v9082_v1 = vadd.f32 %v9079_v47, %v8417_v48  ;;  %v17875_v48 = vand.u32 4294901760, %v9621_v19 }
 0x9c7   :  { %v9084_v41 = vmul.f32 0.70710677, %v9082_v1  ;;  %v9083_v23 = vmul.f32 0.5, %v9082_v1  ;;  %v17878_v34 = vsub.f32 %v9621_v19, %v17875_v48  ;;  %v9622_v1 = vld [vmem:[#allocation5 + $0x258] sm:$0xff] }
 0x9c9   :  { %15912 = verf.f32 %v9084_v41  ;;  %v10178_v15 = vand.u32 4294901760, %v17878_v34 }
 0x9d6   :  { %v15913_v57 = vpop.eup %15912 }
 0x9d7   :  { %v9086_v30 = vadd.f32 1.0, %v15913_v57 }
 0x9d9   :  { %v9087_v49 = vmul.f32 %v9086_v30, %v9083_v23 }
 0x9db   :  { %v17785_v26 = vand.u32 4294901760, %v9087_v49 }
 0x9dd   :  { %15410 = vmatpush3.msra.mxu0 %v17785_v26  ;;  %v17789_v2 = vsub.f32 %v9087_v49, %v17785_v26  ;;  %v10179_v49 = vsub.f32 %v17878_v34, %v10178_v15 }
 0x9de   :  { %15412 = vmatmul.mubr.f32.vlgmr.msra.gmra.mxu0 %v16063_v24  ;;  %15431 = vmatprep.subr.mxu0 %v15988_v0 }
 0x9df   :  { %15432 = vmatpush3.msra.mxu0 %v17789_v2  ;;  %15414 = vmatprep.mubr.msk.f32.mxu0 %vm15989_vm0, %v15988_v0  ;;  %v17797_v45 = vand.u32 4294901760, %v17789_v2 }
 0x9e0   :  { %15453 = vmatprep.subr.mxu0 %v15988_v0 }
 0x9e1   :  { %v9218_v4 = vsub.f32 %v17789_v2, %v17797_v45 }
 0x9e2   :  { %15415 = vmatmul.mubr.f32.gmra.mxu0 %v16068_v25 }
 0x9e3   :  { %15417 = vmatprep.mubr.msk.f32.mxu0 %vm15989_vm0, %v15988_v0  ;;  %v17805_v24 = vand.u32 4294901760, %v9218_v4  ;;  %v17887_v4 = vand.u32 4294901760, %v9622_v1 }
 0x9e5   :  { %15421 = vmatpush3.msra.mxu1 %v17805_v24 }
 0x9e6   :  { %15418 = vmatmul.mubr.f32.gmra.mxu0 %v16082_v27  ;;  %15423 = vmatmul.mubr.f32.vlgmr.msra.gmra.mxu1 %v16022_v8 }
 0x9e7   :  { %15442 = vmatprep.subr.mxu1 %v15988_v0  ;;  %15425 = vmatprep.mubr.msk.f32.mxu1 %vm15989_vm0, %v15988_v0 }
 0x9e8   :  { %15443 = vmatpush3.msra.mxu1 %v17785_v26  ;;  %15433 = vmatprep.mubr.msk.f32.mxu0 %vm15989_vm0, %v15988_v0 }
 0x9e9   :  { %15464 = vmatprep.subr.mxu1 %v15988_v0 }
 0x9ea   :  { %15426 = vmatmul.mubr.f32.gmra.mxu1 %v16024_v9  ;;  %15434 = vmatmul.mubr.f32.vlgmr.msra.gmra.mxu0 %v16034_v13  ;;  %v9620_v13 = vld [vmem:[#allocation5 + $0x248] sm:$0xff] }
 0x9eb   :  { %15454 = vmatpush3.msra.mxu0 %v17797_v45  ;;  %15428 = vmatprep.mubr.msk.f32.mxu1 %vm15989_vm0, %v15988_v0 }
 0x9ec   :  { %15436 = vmatprep.mubr.msk.f32.mxu0 %vm15989_vm0, %v15988_v0  ;;  %15475 = vmatprep.subr.mxu0 %v15988_v0 }
 0x9ee   :  { %15429 = vmatmul.mubr.f32.gmra.mxu1 %v16031_v12  ;;  %15437 = vmatmul.mubr.f32.gmra.mxu0 %v16038_v14  ;;  %v17863_v14 = vand.u32 4294901760, %v9620_v13 }
 0x9ef   :  { %15439 = vmatprep.mubr.msk.f32.mxu0 %vm15989_vm0, %v15988_v0  ;;  %15444 = vmatprep.mubr.msk.f32.mxu1 %vm15989_vm0, %v15988_v0 }
 0x9f2   :  { %15440 = vmatmul.mubr.f32.gmra.mxu0 %v16044_v16  ;;  %15445 = vmatmul.mubr.f32.vlgmr.msra.gmra.mxu1 %v16047_v17 }
 0x9f3   :  { %15465 = vmatpush3.msra.mxu1 %v17785_v26  ;;  %15447 = vmatprep.mubr.msk.f32.mxu1 %vm15989_vm0, %v15988_v0 }
 0x9f4   :  { %15455 = vmatprep.mubr.msk.f32.mxu0 %vm15989_vm0, %v15988_v0  ;;  %15480 = vmatprep.subr.mxu1 %v15988_v0 }
 0x9f6   :  { %15448 = vmatmul.mubr.f32.gmra.mxu1 %v16050_v18  ;;  %15456 = vmatmul.mubr.f32.vlgmr.msra.gmra.mxu0 %v16022_v8 }
 0x9f7   :  { %15450 = vmatprep.mubr.msk.f32.mxu1 %vm15989_vm0, %v15988_v0  ;;  %15458 = vmatprep.mubr.msk.f32.mxu0 %vm15989_vm0, %v15988_v0 }
 0x9f8   :  { %15476 = vmatpush3.xpose.msra.mxu0 %v17863_v14 }
 0x9f9   :  { %15485 = vmatprep.subr.mxu0 %v15988_v0 }
 0x9fa   :  { %15451 = vmatmul.mubr.f32.gmra.mxu1 %v16059_v22  ;;  %15459 = vmatmul.mubr.f32.gmra.mxu0 %v16024_v9 }
 0x9fb   :  { %15461 = vmatprep.mubr.msk.f32.mxu0 %vm15989_vm0, %v15988_v0  ;;  %15466 = vmatprep.mubr.msk.f32.mxu1 %vm15989_vm0, %v15988_v0 }
 0x9fe   :  { %15462 = vmatmul.mubr.f32.gmra.mxu0 %v16031_v12  ;;  %15467 = vmatmul.mubr.f32.vlgmr.msra.gmra.mxu1 %v16022_v8  ;;  %v17866_v8 = vsub.f32 %v9620_v13, %v17863_v14 }
 0x9ff   :  { %15469 = vmatprep.mubr.msk.f32.mxu1 %vm15989_vm0, %v15988_v0  ;;  %15477 = vmatprep.mubr.msk.f32.mxu0 %vm15989_vm0, %v15988_v0 }
 0xa02   :  { %15470 = vmatmul.mubr.f32.gmra.mxu1 %v16024_v9  ;;  %v9732_v9 = vand.u32 4294901760, %v17866_v8 }
 0xa03   :  { %15472 = vmatprep.mubr.msk.f32.mxu1 %vm15989_vm0, %v15988_v0 }
 0xa04   :  { %v9733_v16 = vsub.f32 %v17866_v8, %v9732_v9 }
 0xa06   :  { %15473 = vmatmul.mubr.f32.gmra.mxu1 %v16031_v12  ;;  %v9734_v12 = vand.u32 4294901760, %v9733_v16 }
 0xa07   :  { %15482 = vmatprep.mubr.msk.f32.mxu1 %vm15989_vm0, %v15988_v0 }
 0xa08   :  { %15481 = vmatpush3.xpose.msra.mxu1 %v9734_v12 }
 0xa09   :  { %15490 = vmatprep.subr.mxu1 %v15988_v0 }
 0xa9e   :  { %v9160_v17 = vpop.f32.mrf.mxu0 }
 0xaa0   :  { %v15413_v18 = vpop.f32.mrf.mxu0 }
 0xaa2   :  { %v9170_v22 = vpop.f32.mrf.mxu0 }
 0xaa4   :  { %v15416_v25 = vpop.f32.mrf.mxu0 }
 0xaa5   :  { %v10180_v25 = vand.u32 4294901760, %v10179_v49 }
 0xaa6   :  { %v9180_v27 = vpop.f32.mrf.mxu0  ;;  %v9256_v11 = vpop.f32.mrf.mxu1 }
 0xaa7   :  { %v9257_v36 = vadd.f32 %v9256_v11, %v9160_v17 }
 0xaa8   :  { %v15419_v6 = vpop.f32.mrf.mxu0  ;;  %v15424_v56 = vpop.f32.mrf.mxu1 }
 0xaa9   :  { %v17896_v6 = vsub.f32 %v9622_v1, %v17887_v4 }
 0xaaa   :  { %v9262_v31 = vpop.f32.mrf.mxu1  ;;  %v9342_v63 = vpop.f32.mrf.mxu0 }
 0xaab   :  { %v9343_v29 = vadd.f32 %v9342_v63, %v9257_v36  ;;  %v9263_v37 = vadd.f32 %v9262_v31, %v9170_v22 }
 0xaac   :  { %v15427_v58 = vpop.f32.mrf.mxu1  ;;  %v15435_v50 = vpop.f32.mrf.mxu0 }
 0xaae   :  { %v9268_v43 = vpop.f32.mrf.mxu1  ;;  %v9349_v61 = vpop.f32.mrf.mxu0 }
 0xaaf   :  { %v9350_v33 = vadd.f32 %v9349_v61, %v9263_v37  ;;  %v9269_v13 = vadd.f32 %v9268_v43, %v9180_v27 }
 0xab0   :  { %v15430_v35 = vpop.f32.mrf.mxu1  ;;  %v15438_v3 = vpop.f32.mrf.mxu0 }
 0xab2   :  { %v9356_v32 = vpop.f32.mrf.mxu0  ;;  %v9430_v55 = vpop.f32.mrf.mxu1 }
 0xab3   :  { %v9431_v51 = vadd.f32 %v9430_v55, %v9343_v29  ;;  %v9357_v18 = vadd.f32 %v9356_v32, %v9269_v13 }
 0xab4   :  { %v15441_v5 = vpop.f32.mrf.mxu0  ;;  %v15446_v46 = vpop.f32.mrf.mxu1 }
 0xab5   :  { %v10977_v46 = vld [vmem:[#allocation5 + $0x278] sm:$0xff] }
 0xab6   :  { %v9438_v10 = vpop.f32.mrf.mxu1  ;;  %v9520_v53 = vpop.f32.mrf.mxu0  ;;  %v17964_v19 = vand.u32 4294901760, %v10977_v46 }
 0xab7   :  { %v9521_v62 = vadd.f32 %v9520_v53, %v9431_v51  ;;  %v9439_v39 = vadd.f32 %v9438_v10, %v9350_v33 }
 0xab8   :  { %v15449_v40 = vpop.f32.mrf.mxu1  ;;  %v15457_v20 = vpop.f32.mrf.mxu0  ;;  %v17967_v10 = vsub.f32 %v10977_v46, %v17964_v19 }
 0xaba   :  { %v9446_v21 = vpop.f32.mrf.mxu1  ;;  %v9526_v42 = vpop.f32.mrf.mxu0  ;;  %v11095_v53 = vand.u32 4294901760, %v17967_v10 }
 0xabb   :  { %v9527_v28 = vadd.f32 %v9526_v42, %v9439_v39  ;;  %v9447_v27 = vadd.f32 %v9446_v21, %v9357_v18 }
 0xabc   :  { %v15452_v54 = vpop.f32.mrf.mxu1  ;;  %v15460_v60 = vpop.f32.mrf.mxu0  ;;  %v11096_v36 = vsub.f32 %v17967_v10, %v11095_v53 }
 0xabe   :  { %v9532_v7 = vpop.f32.mrf.mxu0  ;;  %v9604_v44 = vpop.f32.mrf.mxu1  ;;  %v11097_v40 = vand.u32 4294901760, %v11096_v36 }
 0xabf   :  { %v9605_v38 = vadd.f32 %v9604_v44, %v9521_v62  ;;  %v9533_v63 = vadd.f32 %v9532_v7, %v9447_v27 }
 0xac0   :  { %v15468_v52 = vpop.f32.mrf.mxu1  ;;  %v15463_v59 = vpop.f32.mrf.mxu0 }
 0xac1   :  { %v9689_v47 = vand.u32 4294901760, %v9605_v38 }
 0xac2   :  { %v9610_v41 = vpop.f32.mrf.mxu1 }
 0xac3   :  { %v9690_v57 = vsub.f32 %v9605_v38, %v9689_v47  ;;  %v9611_v23 = vadd.f32 %v9610_v41, %v9527_v28  ;;  %15483 = vmatmul.mubr.f32.vlgmr.msra.gmra.mxu1 %v9689_v47 }
 0xac4   :  { %v15471_v30 = vpop.f32.mrf.mxu1  ;;  %15491 = vmatpush3.xpose.msra.mxu1 %v17863_v14  ;;  %15492 = vmatprep.mubr.msk.f32.mxu1 %vm15989_vm0, %v15988_v0 }
 0xac5   :  { %v9691_v16 = vand.u32 4294901760, %v9690_v57  ;;  %v17889_v12 = vand.u32 4294901760, %v9611_v23  ;;  %15500 = vmatprep.subr.mxu1 %v15988_v0 }
 0xac6   :  { %v9616_v17 = vpop.f32.mrf.mxu1 }
 0xac7   :  { %v9692_v22 = vsub.f32 %v9690_v57, %v9691_v16  ;;  %15493 = vmatmul.mubr.f32.vlgmr.msra.gmra.mxu1 %v9691_v16  ;;  %v10136_v31 = vsub.f32 %v9611_v23, %v17889_v12  ;;  %v9617_v50 = vadd.f32 %v9616_v17, %v9533_v63 }
 0xac8   :  { %15501 = vmatpush3.xpose.msra.mxu1 %v17863_v14  ;;  %15502 = vmatprep.mubr.msk.f32.mxu1 %vm15989_vm0, %v15988_v0  ;;  %v15474_v11 = vpop.f32.mrf.mxu1  ;;  %v10624_v14 = vand.u32 4294901760, %v17896_v6 }
 0xac9   :  { %v9693_v56 = vand.u32 4294901760, %v9692_v22  ;;  %15510 = vmatprep.subr.mxu1 %v15988_v0  ;;  %v10137_v58 = vand.u32 4294901760, %v10136_v31  ;;  %v10581_v35 = vand.u32 4294901760, %v9617_v50 }
 0xaca   :  { %v10625_v43 = vsub.f32 %v17896_v6, %v10624_v14 }
 0xacb   :  { %15478 = vmatmul.mubr.f32.vlgmr.msra.gmra.mxu0 %v9693_v56  ;;  %15503 = vmatmul.mubr.f32.vlgmr.msra.gmra.mxu1 %v9689_v47  ;;  %v10138_v61 = vsub.f32 %v10136_v31, %v10137_v58  ;;  %v10582_v3 = vsub.f32 %v9617_v50, %v10581_v35 }
 0xacc   :  { %15486 = vmatpush3.xpose.msra.mxu0 %v17866_v8  ;;  %15511 = vmatpush3.xpose.msra.mxu1 %v10180_v25  ;;  %v10626_v8 = vand.u32 4294901760, %v10625_v43 }
 0xacd   :  { %15487 = vmatprep.mubr.msk.f32.mxu0 %vm15989_vm0, %v15988_v0  ;;  %15512 = vmatprep.mubr.msk.f32.mxu1 %vm15989_vm0, %v15988_v0  ;;  %v10583_v32 = vand.u32 4294901760, %v10582_v3 }
 0xace   :  { %15495 = vmatprep.subr.mxu0 %v15988_v0  ;;  %15520 = vmatprep.subr.mxu1 %v15988_v0 }
 0xacf   :  { %15488 = vmatmul.mubr.f32.vlgmr.msra.gmra.mxu0 %v9690_v57  ;;  %15513 = vmatmul.mubr.f32.vlgmr.msra.gmra.mxu1 %v17889_v12  ;;  %v10584_v55 = vsub.f32 %v10582_v3, %v10583_v32 }
 0xad0   :  { %15496 = vmatpush3.xpose.msra.mxu0 %v9732_v9  ;;  %15521 = vmatpush3.xpose.msra.mxu1 %v17875_v48  ;;  %v10139_v9 = vand.u32 4294901760, %v10138_v61 }
 0xad1   :  { %15497 = vmatprep.mubr.msk.f32.mxu0 %vm15989_vm0, %v15988_v0  ;;  %15522 = vmatprep.mubr.msk.f32.mxu1 %vm15989_vm0, %v15988_v0  ;;  %v10585_v5 = vand.u32 4294901760, %v10584_v55 }
 0xad2   :  { %15505 = vmatprep.subr.mxu0 %v15988_v0  ;;  %15530 = vmatprep.subr.mxu1 %v15988_v0 }
 0xad3   :  { %15498 = vmatmul.mubr.f32.vlgmr.msra.gmra.mxu0 %v9689_v47  ;;  %15523 = vmatmul.mubr.f32.vlgmr.msra.gmra.mxu1 %v10137_v58 }
 0xad4   :  { %15506 = vmatpush3.xpose.msra.mxu0 %v17875_v48  ;;  %15531 = vmatpush3.xpose.msra.mxu1 %v17875_v48 }
 0xad5   :  { %15507 = vmatprep.mubr.msk.f32.mxu0 %vm15989_vm0, %v15988_v0  ;;  %15532 = vmatprep.mubr.msk.f32.mxu1 %vm15989_vm0, %v15988_v0 }
 0xad6   :  { %15515 = vmatprep.subr.mxu0 %v15988_v0  ;;  %15540 = vmatprep.subr.mxu1 %v15988_v0 }
 0xad7   :  { %15508 = vmatmul.mubr.f32.vlgmr.msra.gmra.mxu0 %v10139_v9  ;;  %15533 = vmatmul.mubr.f32.vlgmr.msra.gmra.mxu1 %v17889_v12 }
 0xad8   :  { %15516 = vmatpush3.xpose.msra.mxu0 %v17878_v34  ;;  %15541 = vmatpush3.xpose.msra.mxu1 %v10626_v8 }
 0xad9   :  { %15517 = vmatprep.mubr.msk.f32.mxu0 %vm15989_vm0, %v15988_v0  ;;  %15542 = vmatprep.mubr.msk.f32.mxu1 %vm15989_vm0, %v15988_v0 }
 0xada   :  { %15525 = vmatprep.subr.mxu0 %v15988_v0  ;;  %15550 = vmatprep.subr.mxu1 %v15988_v0 }
 0xadb   :  { %15518 = vmatmul.mubr.f32.vlgmr.msra.gmra.mxu0 %v10136_v31  ;;  %15543 = vmatmul.mubr.f32.vlgmr.msra.gmra.mxu1 %v10581_v35 }
 0xadc   :  { %15526 = vmatpush3.xpose.msra.mxu0 %v10178_v15  ;;  %15551 = vmatpush3.xpose.msra.mxu1 %v17887_v4 }
 0xadd   :  { %15527 = vmatprep.mubr.msk.f32.mxu0 %vm15989_vm0, %v15988_v0  ;;  %15552 = vmatprep.mubr.msk.f32.mxu1 %vm15989_vm0, %v15988_v0 }
 0xade   :  { %15535 = vmatprep.subr.mxu0 %v15988_v0  ;;  %15560 = vmatprep.subr.mxu1 %v15988_v0 }
 0xadf   :  { %15528 = vmatmul.mubr.f32.vlgmr.msra.gmra.mxu0 %v17889_v12  ;;  %15553 = vmatmul.mubr.f32.vlgmr.msra.gmra.mxu1 %v10583_v32 }
 0xae0   :  { %15536 = vmatpush3.xpose.msra.mxu0 %v17887_v4  ;;  %15561 = vmatpush3.xpose.msra.mxu1 %v17887_v4 }
 0xae1   :  { %15537 = vmatprep.mubr.msk.f32.mxu0 %vm15989_vm0, %v15988_v0  ;;  %15562 = vmatprep.mubr.msk.f32.mxu1 %vm15989_vm0, %v15988_v0 }
 0xae2   :  { %15545 = vmatprep.subr.mxu0 %v15988_v0  ;;  %15570 = vmatprep.subr.mxu1 %v15988_v0 }
 0xae3   :  { %15538 = vmatmul.mubr.f32.vlgmr.msra.gmra.mxu0 %v10585_v5  ;;  %15563 = vmatmul.mubr.f32.vlgmr.msra.gmra.mxu1 %v10581_v35 }
 0xae4   :  { %15546 = vmatpush3.xpose.msra.mxu0 %v17896_v6  ;;  %15547 = vmatprep.mubr.msk.f32.mxu0 %vm15989_vm0, %v15988_v0 }
 0xae5   :  { %15555 = vmatprep.subr.mxu0 %v15988_v0  ;;  %15572 = vmatprep.mubr.msk.f32.mxu1 %vm15989_vm0, %v15988_v0 }
 0xae6   :  { %15571 = vmatpush3.msra.mxu1 %v11097_v40  ;;  %v13484_v40 = vld [vmem:[#allocation5 + $0x2c4] ss:$0 sm:$0xff] }
 0xae7   :  { %15548 = vmatmul.mubr.f32.vlgmr.msra.gmra.mxu0 %v10582_v3  ;;  %15580 = vmatprep.subr.mxu1 %v15988_v0 }
 0xae8   :  { %15556 = vmatpush3.xpose.msra.mxu0 %v10624_v14  ;;  %15557 = vmatprep.mubr.msk.f32.mxu0 %vm15989_vm0, %v15988_v0 }
 0xae9   :  { %15565 = vmatprep.subr.mxu0 %v15988_v0 }
 0xaeb   :  { %15558 = vmatmul.mubr.f32.vlgmr.msra.gmra.mxu0 %v10581_v35 }
 0xaec   :  { %15567 = vmatprep.mubr.msk.f32.mxu0 %vm15989_vm0, %v15988_v0  ;;  %15566 = vmatpush3.msra.mxu0 %v17964_v19 }
 0xaed   :  { %15575 = vmatprep.subr.mxu0 %v15988_v0 }
 0xb83   :  { %v9771_v20 = vpop.f32.mrf.mxu1 }
 0xb85   :  { %v15484_v48 = vpop.f32.mrf.mxu1 }
 0xb87   :  { %v9919_v29 = vpop.f32.mrf.mxu1 }
 0xb89   :  { %v15494_v21 = vpop.f32.mrf.mxu1 }
 0xb8a   :  { %v11447_v21 = vld [vmem:[#allocation5 + $0x1f8] sm:$0xff] }
 0xb8b   :  { %v9695_v42 = vpop.f32.mrf.mxu0  ;;  %v10065_v37 = vpop.f32.mrf.mxu1 }
 0xb8c   :  { %v9772_v57 = vadd.f32 %v9771_v20, %v9695_v42  ;;  %v11446_v42 = vld [vmem:[#allocation5 + $0x1f0] sm:$0xff] }
 0xb8d   :  { %v15479_v51 = vpop.f32.mrf.mxu0  ;;  %v15504_v54 = vpop.f32.mrf.mxu1 }
 0xb8e   :  { %v11445_v51 = vld [vmem:[#allocation5 + $0x1e8] sm:$0xff]  ;;  %v17981_v54 = vand.u32 4294901760, %v11446_v42 }
 0xb8f   :  { %v9845_v60 = vpop.f32.mrf.mxu0  ;;  %v10217_v34 = vpop.f32.mrf.mxu1 }
 0xb90   :  { %v9846_v4 = vadd.f32 %v9845_v60, %v9772_v57  ;;  %v11441_v57 = vld [vmem:[#allocation5 + $0x1c8] sm:$0xff] }
 0xb91   :  { %v15489_v33 = vpop.f32.mrf.mxu0  ;;  %v15514_v62 = vpop.f32.mrf.mxu1 }
 0xb92   :  { %v9920_v22 = vadd.f32 %v9919_v29, %v9846_v4 }
 0xb93   :  { %v9993_v7 = vpop.f32.mrf.mxu0  ;;  %v10365_v44 = vpop.f32.mrf.mxu1 }
 0xb94   :  { %v9994_v31 = vadd.f32 %v9993_v7, %v9920_v22 }
 0xb95   :  { %v15499_v39 = vpop.f32.mrf.mxu0  ;;  %v15524_v38 = vpop.f32.mrf.mxu1 }
 0xb96   :  { %v10066_v61 = vadd.f32 %v10065_v37, %v9994_v31  ;;  %v17979_v37 = vand.u32 4294901760, %v11447_v21  ;;  %v11443_v39 = vld [vmem:[#allocation5 + $0x1d8] sm:$0xff] }
 0xb97   :  { %v10141_v52 = vpop.f32.mrf.mxu0  ;;  %v10511_v15 = vpop.f32.mrf.mxu1 }
 0xb98   :  { %v10218_v47 = vadd.f32 %v10217_v34, %v10141_v52  ;;  %v10961_v55 = vsel %vm42_vm1, %v10066_v61, 0.0  ;;  %v11444_v34 = vld [vmem:[#allocation5 + $0x1e0] sm:$0xff]  ;;  %v17984_v7 = vsub.f32 %v11447_v21, %v17979_v37  ;;  %v17989_v52 = vsub.f32 %v11446_v42, %v17981_v54  ;;  %v11435_v42 = vld [vmem:[#allocation5 + $0x198] sm:$0xff] }
 0xb99   :  { %v15509_v59 = vpop.f32.mrf.mxu0  ;;  %v15534_v28 = vpop.f32.mrf.mxu1 }
 0xb9a   :  { %v11442_v59 = vld [vmem:[#allocation5 + $0x1d0] sm:$0xff] }
 0xb9b   :  { %v10291_v1 = vpop.f32.mrf.mxu0  ;;  %v10663_v41 = vpop.f32.mrf.mxu1  ;;  %v18006_v4 = vand.u32 4294901760, %v11442_v59 }
 0xb9c   :  { %v10292_v23 = vadd.f32 %v10291_v1, %v10218_v47  ;;  %v11547_v47 = vand.u32 4294901760, %v17984_v7 }
 0xb9d   :  { %v15519_v30 = vpop.f32.mrf.mxu0  ;;  %v15544_v49 = vpop.f32.mrf.mxu1  ;;  %v18030_v31 = vsub.f32 %v11442_v59, %v18006_v4 }
 0xb9e   :  { %v10366_v12 = vadd.f32 %v10365_v44, %v10292_v23  ;;  %v17986_v44 = vand.u32 4294901760, %v11445_v51  ;;  %v11554_v30 = vand.u32 4294901760, %v17989_v52 }
 0xb9f   :  { %v10439_v13 = vpop.f32.mrf.mxu0  ;;  %v10811_v16 = vpop.f32.mrf.mxu1 }
 0xba0   :  { %v10440_v6 = vadd.f32 %v10439_v13, %v10366_v12  ;;  %v17996_v1 = vsub.f32 %v11445_v51, %v17986_v44  ;;  %v11440_v13 = vld [vmem:[#allocation5 + $0x1c0] sm:$0xff]  ;;  %v18010_v12 = vand.u32 4294901760, %v11441_v57 }
 0xba1   :  { %v15529_v17 = vpop.f32.mrf.mxu0  ;;  %v15554_v18 = vpop.f32.mrf.mxu1 }
 0xba2   :  { %v10512_v58 = vadd.f32 %v10511_v15, %v10440_v6  ;;  %v17991_v15 = vand.u32 4294901760, %v11444_v34  ;;  %v11548_v17 = vsub.f32 %v17984_v7, %v11547_v47  ;;  %v11561_v18 = vand.u32 4294901760, %v17996_v1  ;;  %v11439_v6 = vld [vmem:[#allocation5 + $0x1b8] sm:$0xff] }
 0xba3   :  { %v10587_v25 = vpop.f32.mrf.mxu0  ;;  %v10957_v11 = vpop.f32.mrf.mxu1 }
 0xba4   :  { %v10664_v63 = vadd.f32 %v10663_v41, %v10587_v25  ;;  %v10962_v9 = vsel %vm42_vm1, %v10512_v58, 0.0  ;;  %v17998_v41 = vand.u32 4294901760, %v11443_v39  ;;  %v18004_v49 = vsub.f32 %v11444_v34, %v17991_v15  ;;  %v11438_v58 = vld [vmem:[#allocation5 + $0x1b0] sm:$0xff] }
 0xba5   :  { %v15539_v27 = vpop.f32.mrf.mxu0  ;;  %v15564_v56 = vpop.f32.mrf.mxu1  ;;  %v10963_v46 = vadd.f32 %v10962_v9, %v10961_v55  ;;  %v11582_v55 = vand.u32 4294901760, %v18030_v31 }
 0xba6   :  { %v18020_v22 = vsub.f32 %v11443_v39, %v17998_v41  ;;  %v11555_v27 = vsub.f32 %v17989_v52, %v11554_v30  ;;  %v11568_v56 = vand.u32 4294901760, %v18004_v49  ;;  %v11434_v39 = vld [vmem:[#allocation5 + $0x190] sm:$0xff] }
 0xba7   :  { %v10737_v14 = vpop.f32.mrf.mxu0 }
 0xba8   :  { %v10738_v50 = vadd.f32 %v10737_v14, %v10664_v63  ;;  %v18033_v14 = vsub.f32 %v11441_v57, %v18010_v12  ;;  %v11575_v61 = vand.u32 4294901760, %v18020_v22  ;;  %v18088_v57 = vand.u32 4294901760, %v11435_v42 }
 0xba9   :  { %v15549_v43 = vpop.f32.mrf.mxu0 }
 0xbaa   :  { %v10812_v35 = vadd.f32 %v10811_v16, %v10738_v50  ;;  %v11549_v50 = vand.u32 4294901760, %v11548_v17  ;;  %v11562_v43 = vsub.f32 %v17996_v1, %v11561_v18 }
 0xbab   :  { %v10885_v8 = vpop.f32.mrf.mxu0 }
 0xbac   :  { %v10886_v3 = vadd.f32 %v10885_v8, %v10812_v35  ;;  %v18042_v35 = vand.u32 4294901760, %v11439_v6 }
 0xbad   :  { %v15559_v32 = vpop.f32.mrf.mxu0 }
 0xbae   :  { %v10958_v5 = vadd.f32 %v10957_v11, %v10886_v3  ;;  %v18023_v11 = vand.u32 4294901760, %v11440_v13  ;;  %v11437_v3 = vld [vmem:[#allocation5 + $0x1a8] sm:$0xff]  ;;  %v11569_v32 = vsub.f32 %v18004_v49, %v11568_v56 }
 0xbb0   :  { %v10964_v36 = vsel %vm42_vm1, %v10958_v5, 0.0  ;;  %v18046_v9 = vsub.f32 %v11440_v13, %v18023_v11  ;;  %v18052_v5 = vand.u32 4294901760, %v11438_v58  ;;  %v11570_v51 = vand.u32 4294901760, %v11569_v32 }
 0xbb1   :  { %v10965_v20 = vadd.f32 %v10964_v36, %v10963_v46  ;;  %v11589_v46 = vand.u32 4294901760, %v18033_v14  ;;  %v11436_v36 = vld [vmem:[#allocation5 + $0x1a0] sm:$0xff] }
 0xbb2   :  { %v11596_v21 = vand.u32 4294901760, %v18046_v9  ;;  %v18074_v34 = vsub.f32 %v11438_v58, %v18052_v5 }
 0xbb3   :  { %v10971_v48 = vadd.f32 %v13484_v40, %v10965_v20  ;;  %v11563_v40 = vand.u32 4294901760, %v11562_v43  ;;  %v11576_v20 = vsub.f32 %v18020_v22, %v11575_v61 }
 0xbb4   :  { %v11597_v13 = vsub.f32 %v18046_v9, %v11596_v21 }
 0xbb5   :  { %v10973_v29 = vmul.f32 0.70710677, %v10971_v48  ;;  %v10972_v33 = vmul.f32 0.5, %v10971_v48  ;;  %v18061_v48 = vsub.f32 %v11439_v6, %v18042_v35 }
 0xbb7   :  { %15914 = verf.f32 %v10973_v29  ;;  %v18063_v29 = vand.u32 4294901760, %v11437_v3  ;;  %v11603_v59 = vand.u32 4294901760, %v18061_v48 }
 0xbc4   :  { %v15915_v60 = vpop.eup %15914 }
 0xbc5   :  { %v10975_v62 = vadd.f32 1.0, %v15915_v60  ;;  %v11583_v60 = vsub.f32 %v18030_v31, %v11582_v55 }
 0xbc7   :  { %v10976_v38 = vmul.f32 %v10975_v62, %v10972_v33  ;;  %v18076_v33 = vand.u32 4294901760, %v11436_v36  ;;  %v11590_v62 = vsub.f32 %v18033_v14, %v11589_v46 }
 0xbc9   :  { %v10984_v28 = vsel %vm42_vm1, %v10976_v38, 0  ;;  %v11577_v38 = vand.u32 4294901760, %v11576_v20  ;;  %v18099_v17 = vsub.f32 %v11436_v36, %v18076_v33  ;;  %v11591_v6 = vand.u32 4294901760, %v11590_v62 }
 0xbca   :  { %v18000_v23 = vand.u32 4294901760, %v10984_v28 }
 0xbcc   :  { %v11053_v16 = vsub.f32 %v10984_v28, %v18000_v23  ;;  %15573 = vmatmul.mubr.f32.vlgmr.msra.gmra.mxu1 %v18000_v23  ;;  %v18086_v28 = vsub.f32 %v11437_v3, %v18063_v29  ;;  %v11624_v3 = vand.u32 4294901760, %v18099_v17 }
 0xbcd   :  { %15581 = vmatpush3.msra.mxu1 %v17964_v19  ;;  %15582 = vmatprep.mubr.msk.f32.mxu1 %vm15989_vm0, %v15988_v0 }
 0xbce   :  { %v11054_v25 = vand.u32 4294901760, %v11053_v16  ;;  %15590 = vmatprep.subr.mxu1 %v15988_v0  ;;  %v11617_v58 = vand.u32 4294901760, %v18086_v28 }
 0xbd0   :  { %15583 = vmatmul.mubr.f32.vlgmr.msra.gmra.mxu1 %v11054_v25  ;;  %v11055_v63 = vsub.f32 %v11053_v16, %v11054_v25  ;;  %v18101_v25 = vand.u32 4294901760, %v11434_v39 }
 0xbd1   :  { %15591 = vmatpush3.msra.mxu1 %v17964_v19  ;;  %15592 = vmatprep.mubr.msk.f32.mxu1 %vm15989_vm0, %v15988_v0  ;;  %v11556_v19 = vand.u32 4294901760, %v11555_v27  ;;  %v11432_v27 = vld [vmem:[#allocation5 + $0x180] sm:$0xff] }
 0xbd2   :  { %15630 = vmatprep.subr.mxu1 %v15988_v0  ;;  %v11056_v8 = vand.u32 4294901760, %v11055_v63  ;;  %v11604_v63 = vsub.f32 %v18061_v48, %v11603_v59  ;;  %v18125_v32 = vand.u32 4294901760, %v11432_v27 }
 0xbd4   :  { %15568 = vmatmul.mubr.f32.vlgmr.msra.gmra.mxu0 %v11056_v8  ;;  %15593 = vmatmul.mubr.f32.vlgmr.msra.gmra.mxu1 %v18000_v23  ;;  %v11605_v36 = vand.u32 4294901760, %v11604_v63 }
 0xbd5   :  { %15631 = vmatpush3.msra.mxu1 %v11549_v50  ;;  %15576 = vmatpush3.msra.mxu0 %v17967_v10  ;;  %v11584_v10 = vand.u32 4294901760, %v11583_v60  ;;  %v18111_v50 = vsub.f32 %v11435_v42, %v18088_v57  ;;  %v11625_v60 = vsub.f32 %v18099_v17, %v11624_v3 }
 0xbd6   :  { %15632 = vmatprep.subr.mxu1 %v15988_v0  ;;  %15577 = vmatprep.mubr.msk.f32.mxu0 %vm15989_vm0, %v15988_v0 }
 0xbd7   :  { %15633 = vmatpush3.msra.mxu1 %v11556_v19  ;;  %15585 = vmatprep.subr.mxu0 %v15988_v0  ;;  %v18123_v19 = vsub.f32 %v11434_v39, %v18101_v25  ;;  %v11631_v20 = vand.u32 4294901760, %v18111_v50  ;;  %v18145_v39 = vsub.f32 %v11432_v27, %v18125_v32 }
 0xbd8   :  { %15634 = vmatprep.subr.mxu1 %v15988_v0  ;;  %15578 = vmatmul.mubr.f32.vlgmr.msra.gmra.mxu0 %v11053_v16  ;;  %v11433_v16 = vld [vmem:[#allocation5 + $0x188] sm:$0xff] }
 0xbd9   :  { %15635 = vmatpush3.msra.mxu1 %v11563_v40  ;;  %15586 = vmatpush3.msra.mxu0 %v11095_v53  ;;  %v11610_v53 = vand.u32 4294901760, %v18074_v34  ;;  %v18113_v43 = vand.u32 4294901760, %v11433_v16  ;;  %v11618_v40 = vsub.f32 %v18086_v28, %v11617_v58  ;;  %v11638_v62 = vand.u32 4294901760, %v18123_v19 }
 0xbda   :  { %15636 = vmatprep.subr.mxu1 %v15988_v0  ;;  %15587 = vmatprep.mubr.msk.f32.mxu0 %vm15989_vm0, %v15988_v0  ;;  %v11652_v27 = vand.u32 4294901760, %v18145_v39 }
 0xbdb   :  { %15637 = vmatpush3.msra.mxu1 %v11570_v51  ;;  %15595 = vmatprep.subr.mxu0 %v15988_v0  ;;  %v11611_v8 = vsub.f32 %v18074_v34, %v11610_v53  ;;  %v18135_v42 = vsub.f32 %v11433_v16, %v18113_v43 }
 0xbdc   :  { %15638 = vmatprep.subr.mxu1 %v15988_v0  ;;  %15588 = vmatmul.mubr.f32.vlgmr.msra.gmra.mxu0 %v18000_v23  ;;  %v11598_v23 = vand.u32 4294901760, %v11597_v13  ;;  %v11632_v13 = vsub.f32 %v18111_v50, %v11631_v20 }
 0xbdd   :  { %15596 = vmatpush3.msra.mxu0 %v17979_v37  ;;  %15639 = vmatpush3.msra.mxu1 %v11577_v38  ;;  %v11612_v51 = vand.u32 4294901760, %v11611_v8  ;;  %v11619_v38 = vand.u32 4294901760, %v11618_v40  ;;  %v11645_v16 = vand.u32 4294901760, %v18135_v42 }
 0xbde   :  { %15597 = vmatprep.subr.mxu0 %v15988_v0  ;;  %15640 = vmatprep.subr.mxu1 %v15988_v0  ;;  %v11633_v63 = vand.u32 4294901760, %v11632_v13 }
 0xbdf   :  { %15598 = vmatpush3.msra.mxu0 %v17981_v54  ;;  %15641 = vmatpush3.msra.mxu1 %v11584_v10  ;;  %v11626_v10 = vand.u32 4294901760, %v11625_v60 }
 0xbe0   :  { %15599 = vmatprep.subr.mxu0 %v15988_v0  ;;  %15642 = vmatprep.subr.mxu1 %v15988_v0 }
 0xbe1   :  { %15600 = vmatpush3.msra.mxu0 %v17986_v44  ;;  %15643 = vmatpush3.msra.mxu1 %v11591_v6  ;;  %v11639_v6 = vsub.f32 %v18123_v19, %v11638_v62 }
 0xbe2   :  { %15601 = vmatprep.subr.mxu0 %v15988_v0  ;;  %15644 = vmatprep.subr.mxu1 %v15988_v0 }
 0xbe3   :  { %15602 = vmatpush3.msra.mxu0 %v17991_v15  ;;  %15645 = vmatpush3.msra.mxu1 %v11598_v23  ;;  %v11646_v23 = vsub.f32 %v18135_v42, %v11645_v16  ;;  %v11640_v8 = vand.u32 4294901760, %v11639_v6 }
 0xbe4   :  { %15603 = vmatprep.subr.mxu0 %v15988_v0  ;;  %15646 = vmatprep.subr.mxu1 %v15988_v0 }
 0xbe5   :  { %15604 = vmatpush3.msra.mxu0 %v17998_v41  ;;  %15647 = vmatpush3.msra.mxu1 %v11605_v36  ;;  %v11653_v36 = vsub.f32 %v18145_v39, %v11652_v27  ;;  %v11647_v40 = vand.u32 4294901760, %v11646_v23 }
 0xbe6   :  { %15605 = vmatprep.subr.mxu0 %v15988_v0  ;;  %15648 = vmatprep.subr.mxu1 %v15988_v0 }
 0xbe7   :  { %15606 = vmatpush3.msra.mxu0 %v18006_v4  ;;  %15649 = vmatpush3.msra.mxu1 %v11612_v51  ;;  %v11654_v51 = vand.u32 4294901760, %v11653_v36  ;;  %v13487_v36 = vld [vmem:[#allocation5 + $0x2c5] ss:$0 sm:$0xff] }
 0xbe8   :  { %15607 = vmatprep.subr.mxu0 %v15988_v0  ;;  %15650 = vmatprep.subr.mxu1 %v15988_v0 }
 0xbe9   :  { %15608 = vmatpush3.msra.mxu0 %v18010_v12  ;;  %15651 = vmatpush3.msra.mxu1 %v11619_v38 }
 0xbea   :  { %15609 = vmatprep.subr.mxu0 %v15988_v0  ;;  %15652 = vmatprep.subr.mxu1 %v15988_v0 }
 0xbeb   :  { %15610 = vmatpush3.msra.mxu0 %v18023_v11  ;;  %15653 = vmatpush3.msra.mxu1 %v11626_v10 }
 0xbec   :  { %15611 = vmatprep.subr.mxu0 %v15988_v0  ;;  %15654 = vmatprep.subr.mxu1 %v15988_v0 }
 0xbed   :  { %15612 = vmatpush3.msra.mxu0 %v18042_v35  ;;  %15655 = vmatpush3.msra.mxu1 %v11633_v63 }
 0xbee   :  { %15613 = vmatprep.subr.mxu0 %v15988_v0  ;;  %15656 = vmatprep.subr.mxu1 %v15988_v0 }
 0xbef   :  { %15614 = vmatpush3.msra.mxu0 %v18052_v5  ;;  %15657 = vmatpush3.msra.mxu1 %v11640_v8 }
 0xbf0   :  { %15615 = vmatprep.subr.mxu0 %v15988_v0  ;;  %15658 = vmatprep.subr.mxu1 %v15988_v0 }
 0xbf1   :  { %15616 = vmatpush3.msra.mxu0 %v18063_v29  ;;  %15659 = vmatpush3.msra.mxu1 %v11647_v40 }
 0xbf2   :  { %15617 = vmatprep.subr.mxu0 %v15988_v0  ;;  %15660 = vmatprep.subr.mxu1 %v15988_v0 }
 0xbf3   :  { %15618 = vmatpush3.msra.mxu0 %v18076_v33  ;;  %15661 = vmatpush3.msra.mxu1 %v11654_v51 }
 0xbf4   :  { %15662 = vmatprep.mubr.msk.f32.mxu1 %vm15989_vm0, %v15988_v0  ;;  %15619 = vmatprep.subr.mxu0 %v15988_v0 }
 0xbf5   :  { %15663 = vmatmul.mubr.f32.vlgmr.msra.gmra.mxu1 %v17785_v26  ;;  %15700 = vmatprep.subr.mxu1 %v15988_v0 }
 0xbf6   :  { %15620 = vmatpush3.msra.mxu0 %v18088_v57  ;;  %15701 = vmatpush3.msra.mxu1 %v17979_v37 }
 0xbf7   :  { %15621 = vmatprep.subr.mxu0 %v15988_v0  ;;  %15702 = vmatprep.subr.mxu1 %v15988_v0 }
 0xbf8   :  { %15622 = vmatpush3.msra.mxu0 %v18101_v25  ;;  %15703 = vmatpush3.msra.mxu1 %v17981_v54 }
 0xbf9   :  { %15623 = vmatprep.subr.mxu0 %v15988_v0  ;;  %15704 = vmatprep.subr.mxu1 %v15988_v0 }
 0xbfa   :  { %15624 = vmatpush3.msra.mxu0 %v18113_v43  ;;  %15705 = vmatpush3.msra.mxu1 %v17986_v44 }
 0xbfb   :  { %15625 = vmatprep.subr.mxu0 %v15988_v0  ;;  %15706 = vmatprep.subr.mxu1 %v15988_v0 }
 0xbfc   :  { %15626 = vmatpush3.msra.mxu0 %v18125_v32  ;;  %15627 = vmatprep.mubr.msk.f32.mxu0 %vm15989_vm0, %v15988_v0 }
 0xbfd   :  { %15707 = vmatpush3.msra.mxu1 %v17991_v15  ;;  %15628 = vmatmul.mubr.f32.vlgmr.msra.gmra.mxu0 %v17805_v24 }
 0xbfe   :  { %15665 = vmatprep.subr.mxu0 %v15988_v0  ;;  %15708 = vmatprep.subr.mxu1 %v15988_v0 }
 0xbff   :  { %15666 = vmatpush3.msra.mxu0 %v17984_v7  ;;  %15709 = vmatpush3.msra.mxu1 %v17998_v41 }
 0xc00   :  { %15667 = vmatprep.subr.mxu0 %v15988_v0  ;;  %15710 = vmatprep.subr.mxu1 %v15988_v0 }
 0xc01   :  { %15668 = vmatpush3.msra.mxu0 %v17989_v52  ;;  %15711 = vmatpush3.msra.mxu1 %v18006_v4 }
 0xc02   :  { %15669 = vmatprep.subr.mxu0 %v15988_v0  ;;  %15712 = vmatprep.subr.mxu1 %v15988_v0 }
 0xc03   :  { %15670 = vmatpush3.msra.mxu0 %v17996_v1  ;;  %15713 = vmatpush3.msra.mxu1 %v18010_v12 }
 0xc04   :  { %15671 = vmatprep.subr.mxu0 %v15988_v0  ;;  %15714 = vmatprep.subr.mxu1 %v15988_v0 }
 0xc05   :  { %15672 = vmatpush3.msra.mxu0 %v18004_v49  ;;  %15715 = vmatpush3.msra.mxu1 %v18023_v11 }
 0xc06   :  { %15673 = vmatprep.subr.mxu0 %v15988_v0  ;;  %15716 = vmatprep.subr.mxu1 %v15988_v0 }
 0xc07   :  { %15674 = vmatpush3.msra.mxu0 %v18020_v22  ;;  %15717 = vmatpush3.msra.mxu1 %v18042_v35 }
 0xc08   :  { %15675 = vmatprep.subr.mxu0 %v15988_v0  ;;  %15718 = vmatprep.subr.mxu1 %v15988_v0 }
 0xc09   :  { %15676 = vmatpush3.msra.mxu0 %v18030_v31  ;;  %15719 = vmatpush3.msra.mxu1 %v18052_v5 }
 0xc0a   :  { %15677 = vmatprep.subr.mxu0 %v15988_v0  ;;  %15720 = vmatprep.subr.mxu1 %v15988_v0 }
 0xc0b   :  { %15678 = vmatpush3.msra.mxu0 %v18033_v14  ;;  %15721 = vmatpush3.msra.mxu1 %v18063_v29 }
 0xc0c   :  { %15679 = vmatprep.subr.mxu0 %v15988_v0  ;;  %15722 = vmatprep.subr.mxu1 %v15988_v0 }
 0xc0d   :  { %15680 = vmatpush3.msra.mxu0 %v18046_v9  ;;  %15723 = vmatpush3.msra.mxu1 %v18076_v33 }
 0xc0e   :  { %15681 = vmatprep.subr.mxu0 %v15988_v0  ;;  %15724 = vmatprep.subr.mxu1 %v15988_v0 }
 0xc0f   :  { %15682 = vmatpush3.msra.mxu0 %v18061_v48  ;;  %15725 = vmatpush3.msra.mxu1 %v18088_v57 }
 0xc10   :  { %15683 = vmatprep.subr.mxu0 %v15988_v0  ;;  %15726 = vmatprep.subr.mxu1 %v15988_v0 }
 0xc11   :  { %15684 = vmatpush3.msra.mxu0 %v18074_v34  ;;  %15727 = vmatpush3.msra.mxu1 %v18101_v25 }
 0xc12   :  { %15685 = vmatprep.subr.mxu0 %v15988_v0  ;;  %15728 = vmatprep.subr.mxu1 %v15988_v0 }
 0xc13   :  { %15686 = vmatpush3.msra.mxu0 %v18086_v28  ;;  %15729 = vmatpush3.msra.mxu1 %v18113_v43 }
 0xc14   :  { %15687 = vmatprep.subr.mxu0 %v15988_v0  ;;  %15730 = vmatprep.subr.mxu1 %v15988_v0 }
 0xc15   :  { %15688 = vmatpush3.msra.mxu0 %v18099_v17  ;;  %15731 = vmatpush3.msra.mxu1 %v18125_v32 }
 0xc16   :  { %15732 = vmatprep.mubr.msk.f32.mxu1 %vm15989_vm0, %v15988_v0  ;;  %15689 = vmatprep.subr.mxu0 %v15988_v0 }
 0xc17   :  { %15733 = vmatmul.mubr.f32.vlgmr.msra.gmra.mxu1 %v17797_v45  ;;  %15770 = vmatprep.subr.mxu1 %v15988_v0 }
 0xc18   :  { %15690 = vmatpush3.msra.mxu0 %v18111_v50  ;;  %15771 = vmatpush3.msra.mxu1 %v17979_v37 }
 0xc19   :  { %15691 = vmatprep.subr.mxu0 %v15988_v0  ;;  %15772 = vmatprep.subr.mxu1 %v15988_v0 }
 0xc1a   :  { %15692 = vmatpush3.msra.mxu0 %v18123_v19  ;;  %15773 = vmatpush3.msra.mxu1 %v17981_v54 }
 0xc1b   :  { %15693 = vmatprep.subr.mxu0 %v15988_v0  ;;  %15774 = vmatprep.subr.mxu1 %v15988_v0 }
 0xc1c   :  { %15694 = vmatpush3.msra.mxu0 %v18135_v42  ;;  %15775 = vmatpush3.msra.mxu1 %v17986_v44 }
 0xc1d   :  { %15695 = vmatprep.subr.mxu0 %v15988_v0  ;;  %15776 = vmatprep.subr.mxu1 %v15988_v0 }
 0xc1e   :  { %15696 = vmatpush3.msra.mxu0 %v18145_v39  ;;  %15697 = vmatprep.mubr.msk.f32.mxu0 %vm15989_vm0, %v15988_v0  ;;  %v12552_v39 = vld [vmem:[#allocation5 + $0x288] sm:$0xff] }
 0xc1f   :  { %15777 = vmatpush3.msra.mxu1 %v17991_v15  ;;  %15698 = vmatmul.mubr.f32.vlgmr.msra.gmra.mxu0 %v17789_v2  ;;  %v12095_v2 = vld [vmem:[#allocation5 + $0x280] sm:$0xff]  ;;  %v12592_v38 = vand.u32 4294901760, %v12552_v39 }
 0xc20   :  { %15735 = vmatprep.subr.mxu0 %v15988_v0  ;;  %15778 = vmatprep.subr.mxu1 %v15988_v0  ;;  %v12132_v45 = vand.u32 4294901760, %v12095_v2 }
 0xc21   :  { %15736 = vmatpush3.msra.mxu0 %v11547_v47  ;;  %15779 = vmatpush3.msra.mxu1 %v17998_v41  ;;  %v13485_v47 = vld [vmem:[#allocation5 + $0x2bb] ss:$0 sm:$0xff]  ;;  %v12669_v13 = vsub.f32 %v12552_v39, %v12592_v38 }
 0xc22   :  { %15737 = vmatprep.subr.mxu0 %v15988_v0  ;;  %15780 = vmatprep.subr.mxu1 %v15988_v0  ;;  %v18361_v24 = vsub.f32 %v12095_v2, %v12132_v45 }
 0xc23   :  { %15738 = vmatpush3.msra.mxu0 %v11554_v30  ;;  %15781 = vmatpush3.msra.mxu1 %v18006_v4 }
 0xc24   :  { %15739 = vmatprep.subr.mxu0 %v15988_v0  ;;  %15782 = vmatprep.subr.mxu1 %v15988_v0  ;;  %v12210_v37 = vand.u32 4294901760, %v18361_v24 }
 0xc25   :  { %15740 = vmatpush3.msra.mxu0 %v11561_v18  ;;  %15783 = vmatpush3.msra.mxu1 %v18010_v12 }
 0xc26   :  { %15741 = vmatprep.subr.mxu0 %v15988_v0  ;;  %15784 = vmatprep.subr.mxu1 %v15988_v0  ;;  %v12211_v54 = vsub.f32 %v18361_v24, %v12210_v37 }
 0xc27   :  { %15742 = vmatpush3.msra.mxu0 %v11568_v56  ;;  %15785 = vmatpush3.msra.mxu1 %v18023_v11 }
 0xc28   :  { %15743 = vmatprep.subr.mxu0 %v15988_v0  ;;  %15786 = vmatprep.subr.mxu1 %v15988_v0  ;;  %v12212_v7 = vand.u32 4294901760, %v12211_v54 }
 0xc29   :  { %15744 = vmatpush3.msra.mxu0 %v11575_v61  ;;  %15787 = vmatpush3.msra.mxu1 %v18042_v35 }
 0xc2a   :  { %15745 = vmatprep.subr.mxu0 %v15988_v0  ;;  %15788 = vmatprep.subr.mxu1 %v15988_v0 }
 0xc2b   :  { %15746 = vmatpush3.msra.mxu0 %v11582_v55  ;;  %15789 = vmatpush3.msra.mxu1 %v18052_v5 }
 0xc2c   :  { %15747 = vmatprep.subr.mxu0 %v15988_v0  ;;  %15790 = vmatprep.subr.mxu1 %v15988_v0 }
 0xc2d   :  { %15748 = vmatpush3.msra.mxu0 %v11589_v46  ;;  %15791 = vmatpush3.msra.mxu1 %v18063_v29 }
 0xc2e   :  { %15749 = vmatprep.subr.mxu0 %v15988_v0  ;;  %15792 = vmatprep.subr.mxu1 %v15988_v0 }
 0xc2f   :  { %15750 = vmatpush3.msra.mxu0 %v11596_v21  ;;  %15793 = vmatpush3.msra.mxu1 %v18076_v33  ;;  %v13486_v33 = vld [vmem:[#allocation5 + $0x2bf] ss:$0 sm:$0xff] }
 0xc30   :  { %15751 = vmatprep.subr.mxu0 %v15988_v0  ;;  %15794 = vmatprep.subr.mxu1 %v15988_v0 }
 0xc31   :  { %15752 = vmatpush3.msra.mxu0 %v11603_v59  ;;  %15795 = vmatpush3.msra.mxu1 %v18088_v57 }
 0xc32   :  { %15753 = vmatprep.subr.mxu0 %v15988_v0  ;;  %15796 = vmatprep.subr.mxu1 %v15988_v0 }
 0xc33   :  { %15754 = vmatpush3.msra.mxu0 %v11610_v53  ;;  %15797 = vmatpush3.msra.mxu1 %v18101_v25 }
 0xc34   :  { %15755 = vmatprep.subr.mxu0 %v15988_v0  ;;  %15798 = vmatprep.subr.mxu1 %v15988_v0 }
 0xc35   :  { %15756 = vmatpush3.msra.mxu0 %v11617_v58  ;;  %15799 = vmatpush3.msra.mxu1 %v18113_v43 }
 0xc36   :  { %15757 = vmatprep.subr.mxu0 %v15988_v0  ;;  %15800 = vmatprep.subr.mxu1 %v15988_v0 }
 0xc37   :  { %15758 = vmatpush3.msra.mxu0 %v11624_v3  ;;  %15801 = vmatpush3.msra.mxu1 %v18125_v32 }
 0xc38   :  { %15802 = vmatprep.mubr.msk.f32.mxu1 %vm15989_vm0, %v15988_v0  ;;  %15759 = vmatprep.subr.mxu0 %v15988_v0 }
 0xc39   :  { %15803 = vmatmul.mubr.f32.vlgmr.msra.gmra.mxu1 %v17785_v26  ;;  %15760 = vmatpush3.msra.mxu0 %v11631_v20 }
 0xc3a   :  { %15761 = vmatprep.subr.mxu0 %v15988_v0  ;;  %15767 = vmatprep.mubr.msk.f32.mxu0 %vm15989_vm0, %v15988_v0 }
 0xc3b   :  { %15762 = vmatpush3.msra.mxu0 %v11638_v62  ;;  %15810 = vmatprep.subr.mxu1 %v15988_v0 }
 0xc3c   :  { %15763 = vmatprep.subr.mxu0 %v15988_v0  ;;  %15812 = vmatprep.mubr.msk.f32.mxu1 %vm15989_vm0, %v15988_v0 }
 0xc3d   :  { %15764 = vmatpush3.msra.mxu0 %v11645_v16  ;;  %15811 = vmatpush3.xpose.msra.mxu1 %v12212_v7  ;;  %v12670_v16 = vand.u32 4294901760, %v12669_v13 }
 0xc3e   :  { %15765 = vmatprep.subr.mxu0 %v15988_v0  ;;  %15820 = vmatprep.subr.mxu1 %v15988_v0 }
 0xc3f   :  { %15766 = vmatpush3.msra.mxu0 %v11652_v27  ;;  %v12671_v10 = vsub.f32 %v12669_v13, %v12670_v16 }
 0xc40   :  { %15768 = vmatmul.mubr.f32.vlgmr.msra.gmra.mxu0 %v17785_v26  ;;  %15805 = vmatprep.subr.mxu0 %v15988_v0 }
 0xc41   :  { %15807 = vmatprep.mubr.msk.f32.mxu0 %vm15989_vm0, %v15988_v0  ;;  %15806 = vmatpush3.xpose.msra.mxu0 %v12132_v45  ;;  %v12672_v6 = vand.u32 4294901760, %v12671_v10 }
 0xc42   :  { %15815 = vmatprep.subr.mxu0 %v15988_v0 }
 0xc8c   :  { %v11134_v26 = vpop.f32.mrf.mxu1 }
 0xc8e   :  { %v15574_v44 = vpop.f32.mrf.mxu1 }
 0xc90   :  { %v11282_v52 = vpop.f32.mrf.mxu1 }
 0xc92   :  { %v15584_v15 = vpop.f32.mrf.mxu1 }
 0xc94   :  { %v11058_v1 = vpop.f32.mrf.mxu0  ;;  %v11428_v41 = vpop.f32.mrf.mxu1 }
 0xc95   :  { %v11059_v30 = vadd.f32 %v13485_v47, %v11058_v1 }
 0xc96   :  { %v15569_v49 = vpop.f32.mrf.mxu0  ;;  %v15594_v4 = vpop.f32.mrf.mxu1 }
 0xc97   :  { %v11135_v12 = vadd.f32 %v11134_v26, %v11059_v30 }
 0xc98   :  { %v11208_v18 = vpop.f32.mrf.mxu0 }
 0xc99   :  { %v11209_v22 = vadd.f32 %v11208_v18, %v11135_v12 }
 0xc9a   :  { %v15579_v11 = vpop.f32.mrf.mxu0 }
 0xc9b   :  { %v11283_v56 = vadd.f32 %v11282_v52, %v11209_v22 }
 0xc9c   :  { %v11356_v31 = vpop.f32.mrf.mxu0 }
 0xc9d   :  { %v11357_v14 = vadd.f32 %v11356_v31, %v11283_v56 }
 0xc9e   :  { %v15589_v61 = vpop.f32.mrf.mxu0 }
 0xc9f   :  { %v11429_v35 = vadd.f32 %v11428_v41, %v11357_v14  ;;  %v13007_v61 = vld [vmem:[#allocation5 + $0x2a8] sm:$0xff] }
 0xcb5   :  { %v11691_v9 = vpop.f32.mrf.mxu1 }
 0xcb7   :  { %v15664_v55 = vpop.f32.mrf.mxu1 }
 0xcbd   :  { %v11540_v5 = vpop.f32.mrf.mxu0 }
 0xcbe   :  { %v11541_v59 = vadd.f32 %v13486_v33, %v11540_v5 }
 0xcbf   :  { %v15629_v46 = vpop.f32.mrf.mxu0 }
 0xcc0   :  { %v11692_v28 = vadd.f32 %v11691_v9, %v11541_v59  ;;  %v13010_v9 = vsel %vm42_vm1, %v13007_v61, 0 }
 0xcc1   :  { %v13078_v46 = vand.u32 4294901760, %v13010_v9 }
 0xcc3   :  { %v13079_v33 = vsub.f32 %v13010_v9, %v13078_v46 }
 0xcd7   :  { %v11884_v48 = vpop.f32.mrf.mxu1 }
 0xcd9   :  { %v15734_v29 = vpop.f32.mrf.mxu1 }
 0xcda   :  { %v13488_v29 = vld [vmem:[#allocation5 + $0x2c0] ss:$0 sm:$0xff] }
 0xcdf   :  { %v11795_v21 = vpop.f32.mrf.mxu0 }
 0xce0   :  { %v11796_v53 = vadd.f32 %v11795_v21, %v11692_v28 }
 0xce1   :  { %v15699_v34 = vpop.f32.mrf.mxu0 }
 0xce2   :  { %v11885_v25 = vadd.f32 %v11884_v48, %v11796_v53 }
 0xcf9   :  { %v12090_v57 = vpop.f32.mrf.mxu1 }
 0xcfb   :  { %v15804_v17 = vpop.f32.mrf.mxu1 }
 0xd00   :  { %v12003_v58 = vpop.f32.mrf.mxu0 }
 0xd01   :  { %v12004_v50 = vadd.f32 %v12003_v58, %v11885_v25  ;;  %v13080_v25 = vand.u32 4294901760, %v13079_v33 }
 0xd02   :  { %v15769_v43 = vpop.f32.mrf.mxu0 }
 0xd03   :  { %v12091_v3 = vadd.f32 %v12090_v57, %v12004_v50 }
 0xd05   :  { %v12094_v19 = vadd.f32 %v12091_v3, %v11429_v35 }
 0xd07   :  { %v12167_v32 = vand.u32 4294901760, %v12094_v19 }
 0xd09   :  { %v12168_v20 = vsub.f32 %v12094_v19, %v12167_v32  ;;  %15813 = vmatmul.mubr.f32.vlgmr.msra.gmra.mxu1 %v12167_v32  ;;  %v13081_v19 = vsub.f32 %v13079_v33, %v13080_v25 }
 0xd0a   :  { %15821 = vmatpush3.xpose.msra.mxu1 %v12132_v45  ;;  %15822 = vmatprep.mubr.msk.f32.mxu1 %vm15989_vm0, %v15988_v0 }
 0xd0b   :  { %v12169_v42 = vand.u32 4294901760, %v12168_v20  ;;  %15830 = vmatprep.subr.mxu1 %v15988_v0 }
 0xd0d   :  { %v12170_v60 = vsub.f32 %v12168_v20, %v12169_v42  ;;  %15823 = vmatmul.mubr.f32.vlgmr.msra.gmra.mxu1 %v12169_v42 }
 0xd0e   :  { %15831 = vmatpush3.xpose.msra.mxu1 %v12132_v45  ;;  %15832 = vmatprep.mubr.msk.f32.mxu1 %vm15989_vm0, %v15988_v0 }
 0xd0f   :  { %v12171_v62 = vand.u32 4294901760, %v12170_v60  ;;  %15840 = vmatprep.subr.mxu1 %v15988_v0  ;;  %v13082_v60 = vand.u32 4294901760, %v13081_v19 }
 0xd11   :  { %15808 = vmatmul.mubr.f32.vlgmr.msra.gmra.mxu0 %v12171_v62  ;;  %15833 = vmatmul.mubr.f32.vlgmr.msra.gmra.mxu1 %v12167_v32 }
 0xd12   :  { %15816 = vmatpush3.xpose.msra.mxu0 %v18361_v24  ;;  %15817 = vmatprep.mubr.msk.f32.mxu0 %vm15989_vm0, %v15988_v0 }
 0xd13   :  { %15825 = vmatprep.subr.mxu0 %v15988_v0  ;;  %15842 = vmatprep.mubr.msk.f32.mxu1 %vm15989_vm0, %v15988_v0 }
 0xd14   :  { %15841 = vmatpush3.msra.mxu1 %v12672_v6  ;;  %v13008_v6 = vld [vmem:[#allocation5 + $0x2b0] sm:$0xff] }
 0xd15   :  { %15818 = vmatmul.mubr.f32.vlgmr.msra.gmra.mxu0 %v12168_v20  ;;  %15850 = vmatprep.subr.mxu1 %v15988_v0 }
 0xd16   :  { %15826 = vmatpush3.xpose.msra.mxu0 %v12210_v37  ;;  %15827 = vmatprep.mubr.msk.f32.mxu0 %vm15989_vm0, %v15988_v0 }
 0xd17   :  { %15835 = vmatprep.subr.mxu0 %v15988_v0 }
 0xd19   :  { %15828 = vmatmul.mubr.f32.vlgmr.msra.gmra.mxu0 %v12167_v32 }
 0xd1a   :  { %15837 = vmatprep.mubr.msk.f32.mxu0 %vm15989_vm0, %v15988_v0  ;;  %15836 = vmatpush3.msra.mxu0 %v12592_v38 }
 0xd1b   :  { %15845 = vmatprep.subr.mxu0 %v15988_v0 }
 0xdc9   :  { %v12249_v27 = vpop.f32.mrf.mxu1 }
 0xdcb   :  { %v15814_v63 = vpop.f32.mrf.mxu1 }
 0xdcd   :  { %v12397_v23 = vpop.f32.mrf.mxu1 }
 0xdcf   :  { %v15824_v8 = vpop.f32.mrf.mxu1 }
 0xdd1   :  { %v12173_v40 = vpop.f32.mrf.mxu0  ;;  %v12543_v51 = vpop.f32.mrf.mxu1 }
 0xdd2   :  { %v12174_v2 = vadd.f32 %v13487_v36, %v12173_v40 }
 0xdd3   :  { %v15809_v45 = vpop.f32.mrf.mxu0  ;;  %v15834_v24 = vpop.f32.mrf.mxu1 }
 0xdd4   :  { %v12250_v37 = vadd.f32 %v12249_v27, %v12174_v2 }
 0xdd5   :  { %v12323_v54 = vpop.f32.mrf.mxu0 }
 0xdd6   :  { %v12324_v7 = vadd.f32 %v12323_v54, %v12250_v37 }
 0xdd7   :  { %v15819_v26 = vpop.f32.mrf.mxu0 }
 0xdd8   :  { %v12398_v44 = vadd.f32 %v12397_v23, %v12324_v7 }
 0xdd9   :  { %v12471_v52 = vpop.f32.mrf.mxu0 }
 0xdda   :  { %v12472_v15 = vadd.f32 %v12471_v52, %v12398_v44 }
 0xddb   :  { %v15829_v47 = vpop.f32.mrf.mxu0 }
 0xddc   :  { %v12544_v1 = vadd.f32 %v12543_v51, %v12472_v15 }
 0xdde   :  { %v12548_v41 = vmul.f32 0.70710677, %v12544_v1  ;;  %v12547_v49 = vmul.f32 0.5, %v12544_v1 }
 0xde0   :  { %15916 = verf.f32 %v12548_v41 }
 0xded   :  { %v15917_v30 = vpop.eup %15916 }
 0xdee   :  { %v12550_v4 = vadd.f32 1.0, %v15917_v30 }
 0xdf0   :  { %v12551_v12 = vmul.f32 %v12550_v4, %v12547_v49 }
 0xdf2   :  { %v12559_v18 = vsel %vm42_vm1, %v12551_v12, 0 }
 0xdf3   :  { %v12627_v22 = vand.u32 4294901760, %v12559_v18 }
 0xdf5   :  { %v12628_v11 = vsub.f32 %v12559_v18, %v12627_v22  ;;  %15843 = vmatmul.mubr.f32.vlgmr.msra.gmra.mxu1 %v12627_v22 }
 0xdf6   :  { %15851 = vmatpush3.msra.mxu1 %v12592_v38  ;;  %15852 = vmatprep.mubr.msk.f32.mxu1 %vm15989_vm0, %v15988_v0 }
 0xdf7   :  { %v12629_v56 = vand.u32 4294901760, %v12628_v11  ;;  %15860 = vmatprep.subr.mxu1 %v15988_v0 }
 0xdf9   :  { %15853 = vmatmul.mubr.f32.vlgmr.msra.gmra.mxu1 %v12629_v56  ;;  %v12630_v31 = vsub.f32 %v12628_v11, %v12629_v56 }
 0xdfa   :  { %15861 = vmatpush3.msra.mxu1 %v12592_v38  ;;  %15862 = vmatprep.mubr.msk.f32.mxu1 %vm15989_vm0, %v15988_v0 }
 0xdfb   :  { %v12631_v14 = vand.u32 4294901760, %v12630_v31  ;;  %15870 = vmatprep.subr.mxu1 %v15988_v0 }
 0xdfd   :  { %15838 = vmatmul.mubr.f32.vlgmr.msra.gmra.mxu0 %v12631_v14  ;;  %15863 = vmatmul.mubr.f32.vlgmr.msra.gmra.mxu1 %v12627_v22 }
 0xdfe   :  { %15846 = vmatpush3.msra.mxu0 %v12669_v13  ;;  %15847 = vmatprep.mubr.msk.f32.mxu0 %vm15989_vm0, %v15988_v0 }
 0xdff   :  { %15855 = vmatprep.subr.mxu0 %v15988_v0  ;;  %15872 = vmatprep.mubr.msk.f32.mxu1 %vm15989_vm0, %v15988_v0 }
 0xe01   :  { %15848 = vmatmul.mubr.f32.vlgmr.msra.gmra.mxu0 %v12628_v11 }
 0xe02   :  { %15856 = vmatpush3.msra.mxu0 %v12670_v16  ;;  %15857 = vmatprep.mubr.msk.f32.mxu0 %vm15989_vm0, %v15988_v0 }
 0xe03   :  { %15865 = vmatprep.subr.mxu0 %v15988_v0 }
 0xe05   :  { %15858 = vmatmul.mubr.f32.vlgmr.msra.gmra.mxu0 %v12627_v22 }
 0xe06   :  { %15867 = vmatprep.mubr.msk.f32.mxu0 %vm15989_vm0, %v15988_v0 }
 0xeb5   :  { %v12709_v35 = vpop.f32.mrf.mxu1 }
 0xeb7   :  { %v15844_v55 = vpop.f32.mrf.mxu1 }
 0xeb9   :  { %v12857_v5 = vpop.f32.mrf.mxu1 }
 0xebb   :  { %v15854_v48 = vpop.f32.mrf.mxu1 }
 0xebd   :  { %v12633_v21 = vpop.f32.mrf.mxu0  ;;  %v13003_v34 = vpop.f32.mrf.mxu1 }
 0xebe   :  { %v12634_v59 = vadd.f32 %v13488_v29, %v12633_v21 }
 0xebf   :  { %v15839_v28 = vpop.f32.mrf.mxu0  ;;  %v15864_v57 = vpop.f32.mrf.mxu1 }
 0xec0   :  { %v12710_v53 = vadd.f32 %v12709_v35, %v12634_v59 }
 0xec1   :  { %v12783_v17 = vpop.f32.mrf.mxu0 }
 0xec2   :  { %v12784_v58 = vadd.f32 %v12783_v17, %v12710_v53 }
 0xec3   :  { %v15849_v50 = vpop.f32.mrf.mxu0 }
 0xec4   :  { %v12858_v43 = vadd.f32 %v12857_v5, %v12784_v58 }
 0xec5   :  { %v12931_v3 = vpop.f32.mrf.mxu0 }
 0xec6   :  { %v12932_v32 = vadd.f32 %v12931_v3, %v12858_v43 }
 0xec7   :  { %v15859_v20 = vpop.f32.mrf.mxu0 }
 0xec8   :  { %v13004_v42 = vadd.f32 %v13003_v34, %v12932_v32 }
 0xeca   :  { %v13043_v62 = vand.u32 4294901760, %v13004_v42 }
 0xecc   :  { %v13120_v39 = vsub.f32 %v13004_v42, %v13043_v62  ;;  %15866 = vmatpush3.msra.mxu0 %v13043_v62 }
 0xecd   :  { %15868 = vmatmul.mubr.f32.vlgmr.msra.gmra.mxu0 %v13082_v60  ;;  %15875 = vmatprep.subr.mxu0 %v15988_v0 }
 0xece   :  { %15876 = vmatpush3.msra.mxu0 %v13120_v39  ;;  %15877 = vmatprep.mubr.msk.f32.mxu0 %vm15989_vm0, %v15988_v0  ;;  %v13121_v38 = vand.u32 4294901760, %v13120_v39 }
 0xecf   :  { %15885 = vmatprep.subr.mxu0 %v15988_v0 }
 0xed0   :  { %v13122_v13 = vsub.f32 %v13120_v39, %v13121_v38 }
 0xed1   :  { %15878 = vmatmul.mubr.f32.vlgmr.msra.gmra.mxu0 %v13079_v33 }
 0xed2   :  { %15886 = vmatpush3.msra.mxu0 %v13121_v38  ;;  %v13123_v16 = vand.u32 4294901760, %v13122_v13  ;;  %15887 = vmatprep.mubr.msk.f32.mxu0 %vm15989_vm0, %v15988_v0 }
 0xed4   :  { %15871 = vmatpush3.msra.mxu1 %v13123_v16 }
 0xed5   :  { %15873 = vmatmul.mubr.f32.vlgmr.msra.gmra.mxu1 %v13078_v46  ;;  %15880 = vmatprep.subr.mxu1 %v15988_v0 }
 0xed6   :  { %15881 = vmatpush3.msra.mxu1 %v13043_v62  ;;  %15882 = vmatprep.mubr.msk.f32.mxu1 %vm15989_vm0, %v15988_v0 }
 0xed7   :  { %15890 = vmatprep.subr.mxu1 %v15988_v0  ;;  %15888 = vmatmul.mubr.f32.vlgmr.msra.gmra.mxu0 %v13078_v46 }
 0xed9   :  { %15883 = vmatmul.mubr.f32.vlgmr.msra.gmra.mxu1 %v13080_v25 }
 0xeda   :  { %15891 = vmatpush3.msra.mxu1 %v13043_v62  ;;  %15892 = vmatprep.mubr.msk.f32.mxu1 %vm15989_vm0, %v15988_v0 }
 0xedd   :  { %15893 = vmatmul.mubr.f32.vlgmr.msra.gmra.mxu1 %v13078_v46 }
 0xf8d   :  { %v13084_v10 = vpop.f32.mrf.mxu0 }
 0xf8e   :  { %v13085_v23 = vadd.f32 %v13084_v10, %v13008_v6 }
 0xf8f   :  { %v15869_v27 = vpop.f32.mrf.mxu0 }
 0xf91   :  { %v13234_v63 = vpop.f32.mrf.mxu0 }
 0xf93   :  { %v15879_v8 = vpop.f32.mrf.mxu0 }
 0xf95   :  { %v13160_v36 = vpop.f32.mrf.mxu1 }
 0xf96   :  { %v13161_v40 = vadd.f32 %v13160_v36, %v13085_v23 }
 0xf97   :  { %v15874_v51 = vpop.f32.mrf.mxu1  ;;  %v13382_v2 = vpop.f32.mrf.mxu0 }
 0xf98   :  { %v13235_v45 = vadd.f32 %v13234_v63, %v13161_v40 }
 0xf99   :  { %v13308_v24 = vpop.f32.mrf.mxu1  ;;  %v15889_v37 = vpop.f32.mrf.mxu0 }
 0xf9a   :  { %v13309_v54 = vadd.f32 %v13308_v24, %v13235_v45 }
 0xf9b   :  { %v15884_v7 = vpop.f32.mrf.mxu1 }
 0xf9c   :  { %v13383_v26 = vadd.f32 %v13382_v2, %v13309_v54 }
 0xf9d   :  { %v13454_v0 = vpop.f32.mrf.mxu1 }
 0xf9e   :  { %v13455_v44 = vadd.f32 %v13454_v0, %v13383_v26 }
 0xf9f   :  { %v15894_v52 = vpop.f32.mrf.mxu1 }
 0xfa0   :  { %13458 = vst [vmem:[#allocation7] sm:$0xff] %v13455_v44 }
 0xfa1   :  { %15969 = shalt.err (!%p15966_p0)
}
 0xfa2   :  { %13468 = dma.vmem_to_hbm [thread:$0]  %s13466_s1, 128, %s18425_s2, [#allocation4]  }
 0xfa3   :  { %15982 = dma.done.wait [#allocation4], 128  }
 0xfa4   :  { %15983 = vsyncadd [#allocation4], 4294967168 }
 0xfa5   :  { %13472 = vsyncpa [#allocation3], 1 }
 0xfa6   :  { %13473 = vsyncpa [#allocation6], 1 }
 0xfa7   :  { %13474 = vsyncpa [#allocation4], 1 }

</bundles_post_ra>
